<compile_context>
chip_gen: v5e
topology: v5e:2x2
jax: 0.10.0
libtpu: 0.0.40
codegen_flags: <defaults>
</compile_context>

<pallas_src>
from functools import partial

import jax
import jax.numpy as jnp
from jax import lax
from jax.experimental import pallas as pl
from jax.experimental.pallas import tpu as pltpu

FEATURES = 32          # features
KNN = 4                # knn
LAYERS = 2             # layers
HIDDEN = 32            # scale_hidden_dim
LIMIT_ACTIONS = 0.1    # scale_limit_actions
VOCAB = 100            # nn.Embedding(100, features)
VOCAB_PAD = 128        # embedding table padded to one lane tile

_BIG = 1e30            # "+inf" stand-in for masked distances


# ---------------------------------------------------------------------------
# Fused per-structure forward kernel (grid = (B,), one structure per grid point)
# ---------------------------------------------------------------------------

def _autoencoder_kernel(counts_ref, frac_ref, z_ref, emb_ref,
                        mw1_ref, mw2_ref, mb_ref,
                        uw1_ref, uw2_ref, ub_ref,
                        aw_ref, ab_ref, ah_ref,
                        rho_ref):
    a = frac_ref.shape[1]                    # padded atoms per structure (static)
    s = pl.program_id(0)
    count = counts_ref[s]                    # actual atom count of this structure (int32 scalar)

    frac = frac_ref[0]                       # (A, 3)  fractional coords (x % 1)
    zc = z_ref[0]                            # (A, 1)  int32 species ids

    # ---- h = embedding(z): one-hot @ table on the MXU (no serial gather) ----
    one_hot = (lax.broadcasted_iota(jnp.int32, (a, VOCAB_PAD), 1) == zc).astype(jnp.float32)
    h = jnp.dot(one_hot, emb_ref[...], preferred_element_type=jnp.float32)   # (A, F) f32

    # ---- masks / pooling weights rebuilt in-kernel from the atom count ----
    row_atom = lax.broadcasted_iota(jnp.int32, (a, a), 0)
    col_atom = lax.broadcasted_iota(jnp.int32, (a, a), 1)
    pair_valid = (row_atom < count) & (col_atom < count) & (row_atom != col_atom)
    eye_pair = row_atom == col_atom
    colf = col_atom.astype(jnp.float32)
    ones_row = jnp.ones((1, a), jnp.float32)

    col_a = lax.broadcasted_iota(jnp.int32, (1, a), 1)
    mask_row = jnp.where(col_a < count, jnp.float32(1.0), jnp.float32(0.0))      # (1, A)
    pool_row = mask_row / jnp.sum(mask_row, axis=-1, keepdims=True)              # mean pooling

    lane9 = lax.broadcasted_iota(jnp.int32, (1, 9), 1)
    eye_flat = jnp.where((lane9 == 0) | (lane9 == 4) | (lane9 == 8),
                         jnp.float32(1.0), jnp.float32(0.0))                     # (1, 9)
    lane3 = lax.broadcasted_iota(jnp.int32, (a, 3), 1)

    cell_flat = eye_flat          # actions_init(cell): input cell values are dropped
    action_rho = eye_flat

    def build_adj(rho_flat):
        # cartesian positions pos = frac @ cell (cell shared by all atoms of the structure);
        # assembled as a value with lane-iota selects (no scratch / width-1 stores).
        pos = jnp.zeros((a, 3), jnp.float32)
        for k in range(3):
            colk = (frac[:, 0:1] * rho_flat[0:1, k:k + 1]
                    + frac[:, 1:2] * rho_flat[0:1, 3 + k:4 + k]
                    + frac[:, 2:3] * rho_flat[0:1, 6 + k:7 + k])                 # (A, 1)
            pos = pos + jnp.where(lane3 == k, colk, 0.0)
        # pairwise distances via the Gram matrix: one NT MXU matmul + broadcasts
        gram = lax.dot_general(pos, pos, (((1,), (1,)), ((), ())),
                               preferred_element_type=jnp.float32)               # (A, A)
        diag = jnp.where(eye_pair, gram, 0.0)
        sq_row = jnp.sum(diag, axis=-1, keepdims=True)                           # (A, 1) |p_i|^2
        sq_col = jnp.dot(ones_row, diag, preferred_element_type=jnp.float32)     # (1, A) |p_j|^2
        dist = jnp.sqrt(jnp.maximum(sq_row + sq_col - 2.0 * gram, 0.0) + 1e-12)
        weights = jnp.exp(-dist)
        remaining = jnp.where(pair_valid, dist, _BIG)
        adj = jnp.zeros((a, a), jnp.float32)
        for _ in range(KNN):                                   # KNN min+mask sweeps (top-k)
            row_min = jnp.min(remaining, axis=-1, keepdims=True)
            is_min = (remaining <= row_min) & (remaining < _BIG)
            sel = jnp.min(jnp.where(is_min, colf, jnp.float32(a)),
                          axis=-1, keepdims=True)
            chosen = colf == sel
            adj = adj + jnp.where(chosen, weights, 0.0)
            remaining = jnp.where(chosen, _BIG, remaining)
        adj = adj / (jnp.sum(adj, axis=-1, keepdims=True) + 1e-9)
        return adj.astype(jnp.bfloat16)                        # hoisted: cast once per rebuild

    def mpnn(hh, adj_bf, w1_ref, w2_ref, b_ref, l):
        # h + tanh(h @ W1 + (A @ h) @ W2 + b)   (residual message-passing stand-in)
        hh_bf = hh.astype(jnp.bfloat16)                        # hoisted: one cast, reused
        agg = jnp.dot(adj_bf, hh_bf, preferred_element_type=jnp.float32)
        pre = (jnp.dot(hh_bf, w1_ref[l], preferred_element_type=jnp.float32)
               + jnp.dot(agg.astype(jnp.bfloat16), w2_ref[l],
                         preferred_element_type=jnp.float32)
               + b_ref[l])
        return hh + jnp.tanh(pre)

    def actions_head(hh, l):
        # per-node SiLU MLP -> 9 logits, mean-pooled over the structure's valid atoms
        hh_bf = hh.astype(jnp.bfloat16)
        hid = jnp.dot(hh_bf, aw_ref[l], preferred_element_type=jnp.float32) + ab_ref[l]
        hid = hid * jax.nn.sigmoid(hid)
        scores = jnp.dot(hid.astype(jnp.bfloat16), ah_ref[l],
                         preferred_element_type=jnp.float32)                     # (A, 9)
        return jnp.dot(pool_row, scores, preferred_element_type=jnp.float32)     # (1, 9)

    def bmm_flat(am, bm):
        # 3x3 product on row-major flattened (1, 9) operands, assembled in vregs (no scratch)
        out = jnp.zeros((1, 9), jnp.float32)
        for i in range(3):
            for j in range(3):
                val = (am[:, 3 * i:3 * i + 1] * bm[:, j:j + 1]
                       + am[:, 3 * i + 1:3 * i + 2] * bm[:, 3 + j:4 + j]
                       + am[:, 3 * i + 2:3 * i + 3] * bm[:, 6 + j:7 + j])        # (1, 1)
                out = out + jnp.where(lane9 == (3 * i + j), val, 0.0)
        return out

    # geometry from the identity cell
    adj_bf = build_adj(cell_flat)

    # encoder message-passing stack
    for l in range(LAYERS):
        h = mpnn(h, adj_bf, mw1_ref, mw2_ref, mb_ref, l)

    rho_prime = cell_flat
    for l in range(LAYERS):
        h = mpnn(h, adj_bf, uw1_ref, uw2_ref, ub_ref, l)       # update[l]
        pooled = actions_head(h, l)                            # (1, 9)
        action = eye_flat + LIMIT_ACTIONS * jnp.tanh(pooled)
        action_rho = bmm_flat(action, action_rho)              # bmm(action, action_rho)
        rho_prime = bmm_flat(action_rho, cell_flat)            # bmm(action_rho, cell)
        adj_bf = build_adj(rho_prime)                          # geometry.update_vectors()

    rho_ref[0] = rho_prime                                     # geometry.cell (flat, this struct)


# ---------------------------------------------------------------------------
# Parameters and wrapper
# ---------------------------------------------------------------------------

def init_params(key):
    keys = [key]

    def nxt():
        keys[0], sub = jax.random.split(keys[0])
        return sub

    def mpnn_stack():
        w1 = 0.1 * jax.random.normal(nxt(), (LAYERS, FEATURES, FEATURES), jnp.float32)
        w2 = 0.1 * jax.random.normal(nxt(), (LAYERS, FEATURES, FEATURES), jnp.float32)
        bias = jnp.zeros((LAYERS, 1, FEATURES), jnp.float32)
        return w1.astype(jnp.bfloat16), w2.astype(jnp.bfloat16), bias

    mw1, mw2, mb = mpnn_stack()
    uw1, uw2, ub = mpnn_stack()
    aw = 0.1 * jax.random.normal(nxt(), (LAYERS, FEATURES, HIDDEN), jnp.float32)
    ah = 0.1 * jax.random.normal(nxt(), (LAYERS, HIDDEN, 9), jnp.float32)
    emb = jnp.zeros((VOCAB_PAD, FEATURES), jnp.float32)
    emb = emb.at[:VOCAB].set(0.1 * jax.random.normal(nxt(), (VOCAB, FEATURES), jnp.float32))
    return {
        "emb": emb,                               # padded to (128, F) for the one-hot MXU gather
        "mw1": mw1, "mw2": mw2, "mb": mb,
        "uw1": uw1, "uw2": uw2, "ub": ub,
        "aw": aw.astype(jnp.bfloat16),
        "ab": jnp.zeros((LAYERS, 1, HIDDEN), jnp.float32),
        "ah": ah.astype(jnp.bfloat16),
    }


@partial(jax.jit, static_argnames=("max_atoms",))
def autoencoder_forward(params, cell_in, x, z, struct_size, max_atoms):
    b = cell_in.shape[0]   # cell is replaced by actions_init(cell) == identity in the reference
    n = x.shape[0]         # forward, so only its batch size is used.
    a_pad = max(8, ((int(max_atoms) + 7) // 8) * 8)   # padded atoms-per-structure block

    sizes = struct_size.astype(jnp.int32)
    offsets = jnp.concatenate([jnp.zeros((1,), jnp.int32), jnp.cumsum(sizes)[:-1]])
    arange_a = jnp.arange(a_pad, dtype=jnp.int32)
    gather_idx = jnp.minimum(offsets[:, None] + arange_a[None, :], n - 1)     # (B, A)
    in_range = arange_a[None, :] < sizes[:, None]                             # (B, A)

    frac_b = jnp.where(in_range[..., None], (x % 1.0)[gather_idx], 0.0)       # (B, A, 3)
    z_b = jnp.where(in_range, z.astype(jnp.int32)[gather_idx], 0)[..., None]  # (B, A, 1)

    full3 = lambda i, c: (0, 0, 0)
    grid_spec = pltpu.PrefetchScalarGridSpec(
        num_scalar_prefetch=1,                     # per-structure atom counts in SMEM
        grid=(b,),
        in_specs=[
            pl.BlockSpec((1, a_pad, 3), lambda i, c: (i, 0, 0)),              # frac
            pl.BlockSpec((1, a_pad, 1), lambda i, c: (i, 0, 0)),              # z
            pl.BlockSpec((VOCAB_PAD, FEATURES), lambda i, c: (0, 0)),         # embedding table
            pl.BlockSpec((LAYERS, FEATURES, FEATURES), full3),                # mw1
            pl.BlockSpec((LAYERS, FEATURES, FEATURES), full3),                # mw2
            pl.BlockSpec((LAYERS, 1, FEATURES), full3),                       # mb
            pl.BlockSpec((LAYERS, FEATURES, FEATURES), full3),                # uw1
            pl.BlockSpec((LAYERS, FEATURES, FEATURES), full3),                # uw2
            pl.BlockSpec((LAYERS, 1, FEATURES), full3),                       # ub
            pl.BlockSpec((LAYERS, FEATURES, HIDDEN), full3),                  # aw
            pl.BlockSpec((LAYERS, 1, HIDDEN), full3),                         # ab
            pl.BlockSpec((LAYERS, HIDDEN, 9), full3),                         # ah
        ],
        out_specs=pl.BlockSpec((1, 1, 9), lambda i, c: (i, 0, 0)),
    )

    rho_flat = pl.pallas_call(
        _autoencoder_kernel,
        out_shape=jax.ShapeDtypeStruct((b, 1, 9), jnp.float32),
        grid_spec=grid_spec,
        compiler_params=pltpu.CompilerParams(dimension_semantics=("parallel",)),
    )(sizes, frac_b, z_b,
      params["emb"],
      params["mw1"], params["mw2"], params["mb"],
      params["uw1"], params["uw2"], params["ub"],
      params["aw"], params["ab"], params["ah"])

    return rho_flat.reshape(b, 3, 3)                                          # geometry.cell


# ---------------------------------------------------------------------------
# Pure-JAX (f32) reference of the same synthesized forward, for validation
# ---------------------------------------------------------------------------

def _reference_forward(params, cell_in, x, z, struct_size):
    b = cell_in.shape[0]
    n = x.shape[0]
    frac = x % 1.0
    struct_id = jnp.repeat(jnp.arange(b), struct_size, total_repeat_length=n)
    same = struct_id[:, None] == struct_id[None, :]
    eye_n = jnp.eye(n, dtype=bool)
    seg_t = (struct_id[:, None] == jnp.arange(b)[None, :]).astype(jnp.float32)
    seg_mean = seg_t.T / jnp.maximum(jnp.sum(seg_t.T, axis=1, keepdims=True), 1.0)

    def build_adj(cell_b33):
        pos = jnp.einsum("nj,njk->nk", frac, cell_b33[struct_id])
        diff = pos[:, None, :] - pos[None, :, :]
        dist = jnp.sqrt(jnp.sum(diff * diff, axis=-1) + 1e-12)
        masked = jnp.where(same & ~eye_n, dist, jnp.inf)
        neg_vals, idx = jax.lax.top_k(-masked, KNN)
        w = jnp.exp(neg_vals)
        adj = jnp.zeros((n, n), jnp.float32).at[jnp.arange(n)[:, None], idx].set(w)
        return adj / (jnp.sum(adj, axis=-1, keepdims=True) + 1e-9)

    def mpnn(h, adj, w1, w2, bias):
        pre = h @ w1.astype(jnp.float32) + (adj @ h) @ w2.astype(jnp.float32) + bias
        return h + jnp.tanh(pre)

    def actions_head(h, wa, ba, wh):
        hid = h @ wa.astype(jnp.float32) + ba
        hid = hid * jax.nn.sigmoid(hid)
        return seg_mean @ (hid @ wh.astype(jnp.float32))

    eye3 = jnp.eye(3, dtype=jnp.float32)
    cell = jnp.tile(eye3[None], (b, 1, 1))
    h = params["emb"][z]
    adj = build_adj(cell)
    for l in range(LAYERS):
        h = mpnn(h, adj, params["mw1"][l], params["mw2"][l], params["mb"][l])
    action_rho = jnp.tile(eye3[None], (b, 1, 1))
    rho_prime = cell
    for l in range(LAYERS):
        h = mpnn(h, adj, params["uw1"][l], params["uw2"][l], params["ub"][l])
        pooled = actions_head(h, params["aw"][l], params["ab"][l], params["ah"][l])
        action = eye3[None] + LIMIT_ACTIONS * jnp.tanh(pooled.reshape(b, 3, 3))
        action_rho = jnp.einsum("bij,bjk->bik", action, action_rho)
        rho_prime = jnp.einsum("bij,bjk->bik", action_rho, cell)
        adj = build_adj(rho_prime)
    return rho_prime


if __name__ == "__main__":
    key = jax.random.PRNGKey(0)
    k_param, k_cell, k_x, k_z = jax.random.split(key, 4)

    params = init_params(k_param)

    B, atoms_per_struct = 2, 8
    N = B * atoms_per_struct
    cell_in = jax.random.normal(k_cell, (B, 3, 3), dtype=jnp.float32)
    x = jax.random.uniform(k_x, (N, 3), dtype=jnp.float32, minval=-2.0, maxval=2.0)
    z = jax.random.randint(k_z, (N,), 0, VOCAB, dtype=jnp.int32)
    struct_size = jnp.array([atoms_per_struct, atoms_per_struct], dtype=jnp.int32)

    out = autoencoder_forward(params, cell_in, x, z, struct_size,
                              max_atoms=atoms_per_struct)
    out = jax.block_until_ready(out)

    assert out.shape == (B, 3, 3)
    assert bool(jnp.all(jnp.isfinite(out)))

    ref = _reference_forward(params, cell_in, x, z, struct_size)
    max_err = float(jnp.max(jnp.abs(out - ref)))
    assert max_err < 5e-2, f"kernel vs reference mismatch: max abs err {max_err}"

    print("KERNEL_OK")
</pallas_src>

<mosaic_0001>
module attributes {stable_mosaic.version = 11 : i64} {
  func.func @_autoencoder_kernel(%arg0: i32, %arg1: memref<2xi32, #tpu.memory_space<smem>>, %arg2: memref<1x8x3xf32, #tpu.memory_space<vmem>>, %arg3: memref<1x8x1xi32, #tpu.memory_space<vmem>>, %arg4: memref<128x32xf32, #tpu.memory_space<vmem>>, %arg5: memref<2x32x32xbf16, #tpu.memory_space<vmem>>, %arg6: memref<2x32x32xbf16, #tpu.memory_space<vmem>>, %arg7: memref<2x1x32xf32, #tpu.memory_space<vmem>>, %arg8: memref<2x32x32xbf16, #tpu.memory_space<vmem>>, %arg9: memref<2x32x32xbf16, #tpu.memory_space<vmem>>, %arg10: memref<2x1x32xf32, #tpu.memory_space<vmem>>, %arg11: memref<2x32x32xbf16, #tpu.memory_space<vmem>>, %arg12: memref<2x1x32xf32, #tpu.memory_space<vmem>>, %arg13: memref<2x32x9xbf16, #tpu.memory_space<vmem>>, %arg14: memref<1x1x9xf32, #tpu.memory_space<vmem>>) attributes {dimension_semantics = [#tpu.dimension_semantics<parallel>], iteration_bounds = array<i64: 2>, scalar_prefetch = 1 : i64, scratch_operands = 0 : i64, tpu.core_type = #tpu.core_type<tc>, window_params = [{transform_indices = @transform_0, window_bounds = array<i64: 1, 8, 3>}, {transform_indices = @transform_1, window_bounds = array<i64: 1, 8, 1>}, {pipeline_mode = #tpu.pipeline_mode<synchronous>, transform_indices = @transform_2, window_bounds = array<i64: 128, 32>}, {pipeline_mode = #tpu.pipeline_mode<synchronous>, transform_indices = @transform_3, window_bounds = array<i64: 2, 32, 32>}, {pipeline_mode = #tpu.pipeline_mode<synchronous>, transform_indices = @transform_4, window_bounds = array<i64: 2, 32, 32>}, {pipeline_mode = #tpu.pipeline_mode<synchronous>, transform_indices = @transform_5, window_bounds = array<i64: 2, 1, 32>}, {pipeline_mode = #tpu.pipeline_mode<synchronous>, transform_indices = @transform_6, window_bounds = array<i64: 2, 32, 32>}, {pipeline_mode = #tpu.pipeline_mode<synchronous>, transform_indices = @transform_7, window_bounds = array<i64: 2, 32, 32>}, {pipeline_mode = #tpu.pipeline_mode<synchronous>, transform_indices = @transform_8, window_bounds = array<i64: 2, 1, 32>}, {pipeline_mode = #tpu.pipeline_mode<synchronous>, transform_indices = @transform_9, window_bounds = array<i64: 2, 32, 32>}, {pipeline_mode = #tpu.pipeline_mode<synchronous>, transform_indices = @transform_10, window_bounds = array<i64: 2, 1, 32>}, {pipeline_mode = #tpu.pipeline_mode<synchronous>, transform_indices = @transform_11, window_bounds = array<i64: 2, 32, 9>}, {transform_indices = @transform_12, window_bounds = array<i64: 1, 1, 9>}]} {
    %0 = arith.index_cast %arg0 : i32 to index
    %1 = memref.load %arg1[%0] : memref<2xi32, #tpu.memory_space<smem>>
    %c0 = arith.constant 0 : index
    %c0_0 = arith.constant 0 : index
    %c0_1 = arith.constant 0 : index
    %2 = vector.load %arg2[%c0, %c0_0, %c0_1] : memref<1x8x3xf32, #tpu.memory_space<vmem>>, vector<1x8x3xf32>
    %3 = vector.shape_cast %2 : vector<1x8x3xf32> to vector<8x3xf32>
    %c0_2 = arith.constant 0 : index
    %c0_3 = arith.constant 0 : index
    %c0_4 = arith.constant 0 : index
    %4 = vector.load %arg3[%c0_2, %c0_3, %c0_4] : memref<1x8x1xi32, #tpu.memory_space<vmem>>, vector<1x8x1xi32>
    %5 = vector.shape_cast %4 : vector<1x8x1xi32> to vector<8x1xi32>
    %6 = tpu.iota {dimensions = array<i32: 1>} : vector<8x128xi32>
    %7 = vector.broadcast %5 : vector<8x1xi32> to vector<8x128xi32>
    %8 = arith.cmpi eq, %6, %7 : vector<8x128xi32>
    %9 = arith.extui %8 : vector<8x128xi1> to vector<8x128xi32>
    %10 = arith.sitofp %9 : vector<8x128xi32> to vector<8x128xf32>
    %c0_5 = arith.constant 0 : index
    %c0_6 = arith.constant 0 : index
    %11 = vector.load %arg4[%c0_5, %c0_6] : memref<128x32xf32, #tpu.memory_space<vmem>>, vector<128x32xf32>
    %cst = arith.constant dense<0.000000e+00> : vector<8x32xf32>
    %12 = tpu.matmul %10, %11, %cst {dimension_numbers = #tpu.dot_dimension_numbers<[1], [0], [0], [1], [0, 0, 1, 1], [], []>} : vector<8x128xf32>, vector<128x32xf32>, vector<8x32xf32> -> vector<8x32xf32>
    %13 = tpu.iota {dimensions = array<i32: 0>} : vector<8x8xi32>
    %14 = tpu.iota {dimensions = array<i32: 1>} : vector<8x8xi32>
    %15 = vector.broadcast %1 : i32 to vector<8x8xi32>
    %16 = arith.cmpi slt, %13, %15 : vector<8x8xi32>
    %17 = vector.broadcast %1 : i32 to vector<8x8xi32>
    %18 = arith.cmpi slt, %14, %17 : vector<8x8xi32>
    %19 = arith.andi %16, %18 : vector<8x8xi1>
    %20 = arith.cmpi ne, %13, %14 : vector<8x8xi32>
    %21 = arith.andi %19, %20 : vector<8x8xi1>
    %22 = arith.cmpi eq, %13, %14 : vector<8x8xi32>
    %23 = arith.sitofp %14 : vector<8x8xi32> to vector<8x8xf32>
    %cst_7 = arith.constant 1.000000e+00 : f32
    %24 = vector.broadcast %cst_7 : f32 to vector<1x8xf32>
    %25 = tpu.iota {dimensions = array<i32: 1>} : vector<1x8xi32>
    %26 = vector.broadcast %1 : i32 to vector<1x8xi32>
    %27 = arith.cmpi slt, %25, %26 : vector<1x8xi32>
    %cst_8 = arith.constant 1.000000e+00 : f32
    %cst_9 = arith.constant 0.000000e+00 : f32
    %28 = vector.broadcast %cst_8 : f32 to vector<1x8xf32>
    %29 = vector.broadcast %cst_9 : f32 to vector<1x8xf32>
    %30 = arith.select %27, %28, %29 : vector<1x8xi1>, vector<1x8xf32>
    %cst_10 = arith.constant dense<0.000000e+00> : vector<1xf32>
    %31 = vector.multi_reduction <add>, %30, %cst_10 [1] : vector<1x8xf32> to vector<1xf32>
    %32 = vector.shape_cast %31 : vector<1xf32> to vector<1x1xf32>
    %33 = vector.broadcast %32 : vector<1x1xf32> to vector<1x8xf32>
    %34 = arith.divf %30, %33 : vector<1x8xf32>
    %35 = tpu.iota {dimensions = array<i32: 1>} : vector<1x9xi32>
    %c0_i32 = arith.constant 0 : i32
    %36 = vector.broadcast %c0_i32 : i32 to vector<1x9xi32>
    %37 = arith.cmpi eq, %35, %36 : vector<1x9xi32>
    %c4_i32 = arith.constant 4 : i32
    %38 = vector.broadcast %c4_i32 : i32 to vector<1x9xi32>
    %39 = arith.cmpi eq, %35, %38 : vector<1x9xi32>
    %40 = arith.ori %37, %39 : vector<1x9xi1>
    %c8_i32 = arith.constant 8 : i32
    %41 = vector.broadcast %c8_i32 : i32 to vector<1x9xi32>
    %42 = arith.cmpi eq, %35, %41 : vector<1x9xi32>
    %43 = arith.ori %40, %42 : vector<1x9xi1>
    %cst_11 = arith.constant 1.000000e+00 : f32
    %cst_12 = arith.constant 0.000000e+00 : f32
    %44 = vector.broadcast %cst_11 : f32 to vector<1x9xf32>
    %45 = vector.broadcast %cst_12 : f32 to vector<1x9xf32>
    %46 = arith.select %43, %44, %45 : vector<1x9xi1>, vector<1x9xf32>
    %47 = tpu.iota {dimensions = array<i32: 1>} : vector<8x3xi32>
    %cst_13 = arith.constant 0.000000e+00 : f32
    %48 = vector.broadcast %cst_13 : f32 to vector<8x3xf32>
    %49 = vector.extract_strided_slice %3 {offsets = [0, 0], sizes = [8, 1], strides = [1, 1]} : vector<8x3xf32> to vector<8x1xf32>
    %50 = vector.extract_strided_slice %46 {offsets = [0, 0], sizes = [1, 1], strides = [1, 1]} : vector<1x9xf32> to vector<1x1xf32>
    %51 = vector.broadcast %50 : vector<1x1xf32> to vector<8x1xf32>
    %52 = arith.mulf %49, %51 : vector<8x1xf32>
    %53 = vector.extract_strided_slice %3 {offsets = [0, 1], sizes = [8, 1], strides = [1, 1]} : vector<8x3xf32> to vector<8x1xf32>
    %54 = vector.extract_strided_slice %46 {offsets = [0, 3], sizes = [1, 1], strides = [1, 1]} : vector<1x9xf32> to vector<1x1xf32>
    %55 = vector.broadcast %54 : vector<1x1xf32> to vector<8x1xf32>
    %56 = arith.mulf %53, %55 : vector<8x1xf32>
    %57 = arith.addf %52, %56 : vector<8x1xf32>
    %58 = vector.extract_strided_slice %3 {offsets = [0, 2], sizes = [8, 1], strides = [1, 1]} : vector<8x3xf32> to vector<8x1xf32>
    %59 = vector.extract_strided_slice %46 {offsets = [0, 6], sizes = [1, 1], strides = [1, 1]} : vector<1x9xf32> to vector<1x1xf32>
    %60 = vector.broadcast %59 : vector<1x1xf32> to vector<8x1xf32>
    %61 = arith.mulf %58, %60 : vector<8x1xf32>
    %62 = arith.addf %57, %61 : vector<8x1xf32>
    %c0_i32_14 = arith.constant 0 : i32
    %63 = vector.broadcast %c0_i32_14 : i32 to vector<8x3xi32>
    %64 = arith.cmpi eq, %47, %63 : vector<8x3xi32>
    %cst_15 = arith.constant 0.000000e+00 : f32
    %65 = vector.shape_cast %62 : vector<8x1xf32> to vector<8x1xf32>
    %66 = vector.broadcast %65 : vector<8x1xf32> to vector<8x3xf32>
    %67 = vector.broadcast %cst_15 : f32 to vector<8x3xf32>
    %68 = arith.select %64, %66, %67 : vector<8x3xi1>, vector<8x3xf32>
    %69 = arith.addf %48, %68 : vector<8x3xf32>
    %70 = vector.extract_strided_slice %3 {offsets = [0, 0], sizes = [8, 1], strides = [1, 1]} : vector<8x3xf32> to vector<8x1xf32>
    %71 = vector.extract_strided_slice %46 {offsets = [0, 1], sizes = [1, 1], strides = [1, 1]} : vector<1x9xf32> to vector<1x1xf32>
    %72 = vector.broadcast %71 : vector<1x1xf32> to vector<8x1xf32>
    %73 = arith.mulf %70, %72 : vector<8x1xf32>
    %74 = vector.extract_strided_slice %3 {offsets = [0, 1], sizes = [8, 1], strides = [1, 1]} : vector<8x3xf32> to vector<8x1xf32>
    %75 = vector.extract_strided_slice %46 {offsets = [0, 4], sizes = [1, 1], strides = [1, 1]} : vector<1x9xf32> to vector<1x1xf32>
    %76 = vector.broadcast %75 : vector<1x1xf32> to vector<8x1xf32>
    %77 = arith.mulf %74, %76 : vector<8x1xf32>
    %78 = arith.addf %73, %77 : vector<8x1xf32>
    %79 = vector.extract_strided_slice %3 {offsets = [0, 2], sizes = [8, 1], strides = [1, 1]} : vector<8x3xf32> to vector<8x1xf32>
    %80 = vector.extract_strided_slice %46 {offsets = [0, 7], sizes = [1, 1], strides = [1, 1]} : vector<1x9xf32> to vector<1x1xf32>
    %81 = vector.broadcast %80 : vector<1x1xf32> to vector<8x1xf32>
    %82 = arith.mulf %79, %81 : vector<8x1xf32>
    %83 = arith.addf %78, %82 : vector<8x1xf32>
    %c1_i32 = arith.constant 1 : i32
    %84 = vector.broadcast %c1_i32 : i32 to vector<8x3xi32>
    %85 = arith.cmpi eq, %47, %84 : vector<8x3xi32>
    %cst_16 = arith.constant 0.000000e+00 : f32
    %86 = vector.shape_cast %83 : vector<8x1xf32> to vector<8x1xf32>
    %87 = vector.broadcast %86 : vector<8x1xf32> to vector<8x3xf32>
    %88 = vector.broadcast %cst_16 : f32 to vector<8x3xf32>
    %89 = arith.select %85, %87, %88 : vector<8x3xi1>, vector<8x3xf32>
    %90 = arith.addf %69, %89 : vector<8x3xf32>
    %91 = vector.extract_strided_slice %3 {offsets = [0, 0], sizes = [8, 1], strides = [1, 1]} : vector<8x3xf32> to vector<8x1xf32>
    %92 = vector.extract_strided_slice %46 {offsets = [0, 2], sizes = [1, 1], strides = [1, 1]} : vector<1x9xf32> to vector<1x1xf32>
    %93 = vector.broadcast %92 : vector<1x1xf32> to vector<8x1xf32>
    %94 = arith.mulf %91, %93 : vector<8x1xf32>
    %95 = vector.extract_strided_slice %3 {offsets = [0, 1], sizes = [8, 1], strides = [1, 1]} : vector<8x3xf32> to vector<8x1xf32>
    %96 = vector.extract_strided_slice %46 {offsets = [0, 5], sizes = [1, 1], strides = [1, 1]} : vector<1x9xf32> to vector<1x1xf32>
    %97 = vector.broadcast %96 : vector<1x1xf32> to vector<8x1xf32>
    %98 = arith.mulf %95, %97 : vector<8x1xf32>
    %99 = arith.addf %94, %98 : vector<8x1xf32>
    %100 = vector.extract_strided_slice %3 {offsets = [0, 2], sizes = [8, 1], strides = [1, 1]} : vector<8x3xf32> to vector<8x1xf32>
    %101 = vector.extract_strided_slice %46 {offsets = [0, 8], sizes = [1, 1], strides = [1, 1]} : vector<1x9xf32> to vector<1x1xf32>
    %102 = vector.broadcast %101 : vector<1x1xf32> to vector<8x1xf32>
    %103 = arith.mulf %100, %102 : vector<8x1xf32>
    %104 = arith.addf %99, %103 : vector<8x1xf32>
    %c2_i32 = arith.constant 2 : i32
    %105 = vector.broadcast %c2_i32 : i32 to vector<8x3xi32>
    %106 = arith.cmpi eq, %47, %105 : vector<8x3xi32>
    %cst_17 = arith.constant 0.000000e+00 : f32
    %107 = vector.shape_cast %104 : vector<8x1xf32> to vector<8x1xf32>
    %108 = vector.broadcast %107 : vector<8x1xf32> to vector<8x3xf32>
    %109 = vector.broadcast %cst_17 : f32 to vector<8x3xf32>
    %110 = arith.select %106, %108, %109 : vector<8x3xi1>, vector<8x3xf32>
    %111 = arith.addf %90, %110 : vector<8x3xf32>
    %cst_18 = arith.constant dense<0.000000e+00> : vector<8x8xf32>
    %112 = tpu.matmul %111, %111, %cst_18 {dimension_numbers = #tpu.dot_dimension_numbers<[1], [1], [0], [0], [0, 0, 1, 0], [], []>} : vector<8x3xf32>, vector<8x3xf32>, vector<8x8xf32> -> vector<8x8xf32>
    %cst_19 = arith.constant 0.000000e+00 : f32
    %113 = vector.broadcast %cst_19 : f32 to vector<8x8xf32>
    %114 = arith.select %22, %112, %113 : vector<8x8xi1>, vector<8x8xf32>
    %cst_20 = arith.constant dense<0.000000e+00> : vector<8xf32>
    %115 = vector.multi_reduction <add>, %114, %cst_20 [1] : vector<8x8xf32> to vector<8xf32>
    %116 = vector.shape_cast %115 : vector<8xf32> to vector<8x1xf32>
    %cst_21 = arith.constant dense<0.000000e+00> : vector<1x8xf32>
    %117 = tpu.matmul %24, %114, %cst_21 {dimension_numbers = #tpu.dot_dimension_numbers<[1], [0], [0], [1], [0, 0, 1, 1], [], []>} : vector<1x8xf32>, vector<8x8xf32>, vector<1x8xf32> -> vector<1x8xf32>
    %118 = vector.broadcast %116 : vector<8x1xf32> to vector<8x8xf32>
    %119 = vector.broadcast %117 : vector<1x8xf32> to vector<8x8xf32>
    %120 = arith.addf %118, %119 : vector<8x8xf32>
    %cst_22 = arith.constant 2.000000e+00 : f32
    %121 = vector.broadcast %cst_22 : f32 to vector<8x8xf32>
    %122 = arith.mulf %121, %112 : vector<8x8xf32>
    %123 = arith.subf %120, %122 : vector<8x8xf32>
    %cst_23 = arith.constant 0.000000e+00 : f32
    %124 = vector.broadcast %cst_23 : f32 to vector<8x8xf32>
    %125 = arith.maximumf %123, %124 : vector<8x8xf32>
    %cst_24 = arith.constant 9.99999996E-13 : f32
    %126 = vector.broadcast %cst_24 : f32 to vector<8x8xf32>
    %127 = arith.addf %125, %126 : vector<8x8xf32>
    %128 = math.sqrt %127 : vector<8x8xf32>
    %cst_25 = arith.constant 0.000000e+00 : f32
    %129 = vector.broadcast %cst_25 : f32 to vector<8x8xf32>
    %130 = arith.subf %129, %128 : vector<8x8xf32>
    %131 = math.exp %130 : vector<8x8xf32>
    %cst_26 = arith.constant 1.000000e+30 : f32
    %132 = vector.broadcast %cst_26 : f32 to vector<8x8xf32>
    %133 = arith.select %21, %128, %132 : vector<8x8xi1>, vector<8x8xf32>
    %cst_27 = arith.constant 0.000000e+00 : f32
    %134 = vector.broadcast %cst_27 : f32 to vector<8x8xf32>
    %cst_28 = arith.constant dense<0x7F800000> : vector<8xf32>
    %135 = vector.multi_reduction <minimumf>, %133, %cst_28 [1] : vector<8x8xf32> to vector<8xf32>
    %136 = vector.shape_cast %135 : vector<8xf32> to vector<8x1xf32>
    %137 = vector.broadcast %136 : vector<8x1xf32> to vector<8x8xf32>
    %138 = arith.cmpf ole, %133, %137 : vector<8x8xf32>
    %cst_29 = arith.constant 1.000000e+30 : f32
    %139 = vector.broadcast %cst_29 : f32 to vector<8x8xf32>
    %140 = arith.cmpf olt, %133, %139 : vector<8x8xf32>
    %141 = arith.andi %138, %140 : vector<8x8xi1>
    %cst_30 = arith.constant 8.000000e+00 : f32
    %142 = vector.broadcast %cst_30 : f32 to vector<8x8xf32>
    %143 = arith.select %141, %23, %142 : vector<8x8xi1>, vector<8x8xf32>
    %cst_31 = arith.constant dense<0x7F800000> : vector<8xf32>
    %144 = vector.multi_reduction <minimumf>, %143, %cst_31 [1] : vector<8x8xf32> to vector<8xf32>
    %145 = vector.shape_cast %144 : vector<8xf32> to vector<8x1xf32>
    %146 = vector.broadcast %145 : vector<8x1xf32> to vector<8x8xf32>
    %147 = arith.cmpf oeq, %23, %146 : vector<8x8xf32>
    %cst_32 = arith.constant 0.000000e+00 : f32
    %148 = vector.broadcast %cst_32 : f32 to vector<8x8xf32>
    %149 = arith.select %147, %131, %148 : vector<8x8xi1>, vector<8x8xf32>
    %150 = arith.addf %134, %149 : vector<8x8xf32>
    %cst_33 = arith.constant 1.000000e+30 : f32
    %151 = vector.broadcast %cst_33 : f32 to vector<8x8xf32>
    %152 = arith.select %147, %151, %133 : vector<8x8xi1>, vector<8x8xf32>
    %cst_34 = arith.constant dense<0x7F800000> : vector<8xf32>
    %153 = vector.multi_reduction <minimumf>, %152, %cst_34 [1] : vector<8x8xf32> to vector<8xf32>
    %154 = vector.shape_cast %153 : vector<8xf32> to vector<8x1xf32>
    %155 = vector.broadcast %154 : vector<8x1xf32> to vector<8x8xf32>
    %156 = arith.cmpf ole, %152, %155 : vector<8x8xf32>
    %cst_35 = arith.constant 1.000000e+30 : f32
    %157 = vector.broadcast %cst_35 : f32 to vector<8x8xf32>
    %158 = arith.cmpf olt, %152, %157 : vector<8x8xf32>
    %159 = arith.andi %156, %158 : vector<8x8xi1>
    %cst_36 = arith.constant 8.000000e+00 : f32
    %160 = vector.broadcast %cst_36 : f32 to vector<8x8xf32>
    %161 = arith.select %159, %23, %160 : vector<8x8xi1>, vector<8x8xf32>
    %cst_37 = arith.constant dense<0x7F800000> : vector<8xf32>
    %162 = vector.multi_reduction <minimumf>, %161, %cst_37 [1] : vector<8x8xf32> to vector<8xf32>
    %163 = vector.shape_cast %162 : vector<8xf32> to vector<8x1xf32>
    %164 = vector.broadcast %163 : vector<8x1xf32> to vector<8x8xf32>
    %165 = arith.cmpf oeq, %23, %164 : vector<8x8xf32>
    %cst_38 = arith.constant 0.000000e+00 : f32
    %166 = vector.broadcast %cst_38 : f32 to vector<8x8xf32>
    %167 = arith.select %165, %131, %166 : vector<8x8xi1>, vector<8x8xf32>
    %168 = arith.addf %150, %167 : vector<8x8xf32>
    %cst_39 = arith.constant 1.000000e+30 : f32
    %169 = vector.broadcast %cst_39 : f32 to vector<8x8xf32>
    %170 = arith.select %165, %169, %152 : vector<8x8xi1>, vector<8x8xf32>
    %cst_40 = arith.constant dense<0x7F800000> : vector<8xf32>
    %171 = vector.multi_reduction <minimumf>, %170, %cst_40 [1] : vector<8x8xf32> to vector<8xf32>
    %172 = vector.shape_cast %171 : vector<8xf32> to vector<8x1xf32>
    %173 = vector.broadcast %172 : vector<8x1xf32> to vector<8x8xf32>
    %174 = arith.cmpf ole, %170, %173 : vector<8x8xf32>
    %cst_41 = arith.constant 1.000000e+30 : f32
    %175 = vector.broadcast %cst_41 : f32 to vector<8x8xf32>
    %176 = arith.cmpf olt, %170, %175 : vector<8x8xf32>
    %177 = arith.andi %174, %176 : vector<8x8xi1>
    %cst_42 = arith.constant 8.000000e+00 : f32
    %178 = vector.broadcast %cst_42 : f32 to vector<8x8xf32>
    %179 = arith.select %177, %23, %178 : vector<8x8xi1>, vector<8x8xf32>
    %cst_43 = arith.constant dense<0x7F800000> : vector<8xf32>
    %180 = vector.multi_reduction <minimumf>, %179, %cst_43 [1] : vector<8x8xf32> to vector<8xf32>
    %181 = vector.shape_cast %180 : vector<8xf32> to vector<8x1xf32>
    %182 = vector.broadcast %181 : vector<8x1xf32> to vector<8x8xf32>
    %183 = arith.cmpf oeq, %23, %182 : vector<8x8xf32>
    %cst_44 = arith.constant 0.000000e+00 : f32
    %184 = vector.broadcast %cst_44 : f32 to vector<8x8xf32>
    %185 = arith.select %183, %131, %184 : vector<8x8xi1>, vector<8x8xf32>
    %186 = arith.addf %168, %185 : vector<8x8xf32>
    %cst_45 = arith.constant 1.000000e+30 : f32
    %187 = vector.broadcast %cst_45 : f32 to vector<8x8xf32>
    %188 = arith.select %183, %187, %170 : vector<8x8xi1>, vector<8x8xf32>
    %cst_46 = arith.constant dense<0x7F800000> : vector<8xf32>
    %189 = vector.multi_reduction <minimumf>, %188, %cst_46 [1] : vector<8x8xf32> to vector<8xf32>
    %190 = vector.shape_cast %189 : vector<8xf32> to vector<8x1xf32>
    %191 = vector.broadcast %190 : vector<8x1xf32> to vector<8x8xf32>
    %192 = arith.cmpf ole, %188, %191 : vector<8x8xf32>
    %cst_47 = arith.constant 1.000000e+30 : f32
    %193 = vector.broadcast %cst_47 : f32 to vector<8x8xf32>
    %194 = arith.cmpf olt, %188, %193 : vector<8x8xf32>
    %195 = arith.andi %192, %194 : vector<8x8xi1>
    %cst_48 = arith.constant 8.000000e+00 : f32
    %196 = vector.broadcast %cst_48 : f32 to vector<8x8xf32>
    %197 = arith.select %195, %23, %196 : vector<8x8xi1>, vector<8x8xf32>
    %cst_49 = arith.constant dense<0x7F800000> : vector<8xf32>
    %198 = vector.multi_reduction <minimumf>, %197, %cst_49 [1] : vector<8x8xf32> to vector<8xf32>
    %199 = vector.shape_cast %198 : vector<8xf32> to vector<8x1xf32>
    %200 = vector.broadcast %199 : vector<8x1xf32> to vector<8x8xf32>
    %201 = arith.cmpf oeq, %23, %200 : vector<8x8xf32>
    %cst_50 = arith.constant 0.000000e+00 : f32
    %202 = vector.broadcast %cst_50 : f32 to vector<8x8xf32>
    %203 = arith.select %201, %131, %202 : vector<8x8xi1>, vector<8x8xf32>
    %204 = arith.addf %186, %203 : vector<8x8xf32>
    %cst_51 = arith.constant dense<0.000000e+00> : vector<8xf32>
    %205 = vector.multi_reduction <add>, %204, %cst_51 [1] : vector<8x8xf32> to vector<8xf32>
    %206 = vector.shape_cast %205 : vector<8xf32> to vector<8x1xf32>
    %cst_52 = arith.constant 9.99999971E-10 : f32
    %207 = vector.broadcast %cst_52 : f32 to vector<8x1xf32>
    %208 = arith.addf %206, %207 : vector<8x1xf32>
    %209 = vector.broadcast %208 : vector<8x1xf32> to vector<8x8xf32>
    %210 = arith.divf %204, %209 : vector<8x8xf32>
    %211 = arith.truncf %210 : vector<8x8xf32> to vector<8x8xbf16>
    %212 = arith.truncf %12 : vector<8x32xf32> to vector<8x32xbf16>
    %cst_53 = arith.constant dense<0.000000e+00> : vector<8x32xf32>
    %213 = tpu.matmul %211, %212, %cst_53 {dimension_numbers = #tpu.dot_dimension_numbers<[1], [0], [0], [1], [0, 0, 1, 1], [], []>} : vector<8x8xbf16>, vector<8x32xbf16>, vector<8x32xf32> -> vector<8x32xf32>
    %c0_54 = arith.constant 0 : index
    %c0_55 = arith.constant 0 : index
    %c0_56 = arith.constant 0 : index
    %214 = vector.load %arg5[%c0_54, %c0_55, %c0_56] : memref<2x32x32xbf16, #tpu.memory_space<vmem>>, vector<1x32x32xbf16>
    %215 = vector.shape_cast %214 : vector<1x32x32xbf16> to vector<32x32xbf16>
    %cst_57 = arith.constant dense<0.000000e+00> : vector<8x32xf32>
    %216 = tpu.matmul %212, %215, %cst_57 {dimension_numbers = #tpu.dot_dimension_numbers<[1], [0], [0], [1], [0, 0, 1, 1], [], []>} : vector<8x32xbf16>, vector<32x32xbf16>, vector<8x32xf32> -> vector<8x32xf32>
    %217 = arith.truncf %213 : vector<8x32xf32> to vector<8x32xbf16>
    %c0_58 = arith.constant 0 : index
    %c0_59 = arith.constant 0 : index
    %c0_60 = arith.constant 0 : index
    %218 = vector.load %arg6[%c0_58, %c0_59, %c0_60] : memref<2x32x32xbf16, #tpu.memory_space<vmem>>, vector<1x32x32xbf16>
    %219 = vector.shape_cast %218 : vector<1x32x32xbf16> to vector<32x32xbf16>
    %cst_61 = arith.constant dense<0.000000e+00> : vector<8x32xf32>
    %220 = tpu.matmul %217, %219, %cst_61 {dimension_numbers = #tpu.dot_dimension_numbers<[1], [0], [0], [1], [0, 0, 1, 1], [], []>} : vector<8x32xbf16>, vector<32x32xbf16>, vector<8x32xf32> -> vector<8x32xf32>
    %221 = arith.addf %216, %220 : vector<8x32xf32>
    %c0_62 = arith.constant 0 : index
    %c0_63 = arith.constant 0 : index
    %c0_64 = arith.constant 0 : index
    %222 = vector.load %arg7[%c0_62, %c0_63, %c0_64] : memref<2x1x32xf32, #tpu.memory_space<vmem>>, vector<1x1x32xf32>
    %223 = vector.shape_cast %222 : vector<1x1x32xf32> to vector<1x32xf32>
    %224 = vector.broadcast %223 : vector<1x32xf32> to vector<8x32xf32>
    %225 = arith.addf %221, %224 : vector<8x32xf32>
    %226 = math.tanh %225 : vector<8x32xf32>
    %227 = arith.addf %12, %226 : vector<8x32xf32>
    %228 = arith.truncf %227 : vector<8x32xf32> to vector<8x32xbf16>
    %cst_65 = arith.constant dense<0.000000e+00> : vector<8x32xf32>
    %229 = tpu.matmul %211, %228, %cst_65 {dimension_numbers = #tpu.dot_dimension_numbers<[1], [0], [0], [1], [0, 0, 1, 1], [], []>} : vector<8x8xbf16>, vector<8x32xbf16>, vector<8x32xf32> -> vector<8x32xf32>
    %c1 = arith.constant 1 : index
    %c0_66 = arith.constant 0 : index
    %c0_67 = arith.constant 0 : index
    %230 = vector.load %arg5[%c1, %c0_66, %c0_67] : memref<2x32x32xbf16, #tpu.memory_space<vmem>>, vector<1x32x32xbf16>
    %231 = vector.shape_cast %230 : vector<1x32x32xbf16> to vector<32x32xbf16>
    %cst_68 = arith.constant dense<0.000000e+00> : vector<8x32xf32>
    %232 = tpu.matmul %228, %231, %cst_68 {dimension_numbers = #tpu.dot_dimension_numbers<[1], [0], [0], [1], [0, 0, 1, 1], [], []>} : vector<8x32xbf16>, vector<32x32xbf16>, vector<8x32xf32> -> vector<8x32xf32>
    %233 = arith.truncf %229 : vector<8x32xf32> to vector<8x32xbf16>
    %c1_69 = arith.constant 1 : index
    %c0_70 = arith.constant 0 : index
    %c0_71 = arith.constant 0 : index
    %234 = vector.load %arg6[%c1_69, %c0_70, %c0_71] : memref<2x32x32xbf16, #tpu.memory_space<vmem>>, vector<1x32x32xbf16>
    %235 = vector.shape_cast %234 : vector<1x32x32xbf16> to vector<32x32xbf16>
    %cst_72 = arith.constant dense<0.000000e+00> : vector<8x32xf32>
    %236 = tpu.matmul %233, %235, %cst_72 {dimension_numbers = #tpu.dot_dimension_numbers<[1], [0], [0], [1], [0, 0, 1, 1], [], []>} : vector<8x32xbf16>, vector<32x32xbf16>, vector<8x32xf32> -> vector<8x32xf32>
    %237 = arith.addf %232, %236 : vector<8x32xf32>
    %c1_73 = arith.constant 1 : index
    %c0_74 = arith.constant 0 : index
    %c0_75 = arith.constant 0 : index
    %238 = vector.load %arg7[%c1_73, %c0_74, %c0_75] : memref<2x1x32xf32, #tpu.memory_space<vmem>>, vector<1x1x32xf32>
    %239 = vector.shape_cast %238 : vector<1x1x32xf32> to vector<1x32xf32>
    %240 = vector.broadcast %239 : vector<1x32xf32> to vector<8x32xf32>
    %241 = arith.addf %237, %240 : vector<8x32xf32>
    %242 = math.tanh %241 : vector<8x32xf32>
    %243 = arith.addf %227, %242 : vector<8x32xf32>
    %244 = arith.truncf %243 : vector<8x32xf32> to vector<8x32xbf16>
    %cst_76 = arith.constant dense<0.000000e+00> : vector<8x32xf32>
    %245 = tpu.matmul %211, %244, %cst_76 {dimension_numbers = #tpu.dot_dimension_numbers<[1], [0], [0], [1], [0, 0, 1, 1], [], []>} : vector<8x8xbf16>, vector<8x32xbf16>, vector<8x32xf32> -> vector<8x32xf32>
    %c0_77 = arith.constant 0 : index
    %c0_78 = arith.constant 0 : index
    %c0_79 = arith.constant 0 : index
    %246 = vector.load %arg8[%c0_77, %c0_78, %c0_79] : memref<2x32x32xbf16, #tpu.memory_space<vmem>>, vector<1x32x32xbf16>
    %247 = vector.shape_cast %246 : vector<1x32x32xbf16> to vector<32x32xbf16>
    %cst_80 = arith.constant dense<0.000000e+00> : vector<8x32xf32>
    %248 = tpu.matmul %244, %247, %cst_80 {dimension_numbers = #tpu.dot_dimension_numbers<[1], [0], [0], [1], [0, 0, 1, 1], [], []>} : vector<8x32xbf16>, vector<32x32xbf16>, vector<8x32xf32> -> vector<8x32xf32>
    %249 = arith.truncf %245 : vector<8x32xf32> to vector<8x32xbf16>
    %c0_81 = arith.constant 0 : index
    %c0_82 = arith.constant 0 : index
    %c0_83 = arith.constant 0 : index
    %250 = vector.load %arg9[%c0_81, %c0_82, %c0_83] : memref<2x32x32xbf16, #tpu.memory_space<vmem>>, vector<1x32x32xbf16>
    %251 = vector.shape_cast %250 : vector<1x32x32xbf16> to vector<32x32xbf16>
    %cst_84 = arith.constant dense<0.000000e+00> : vector<8x32xf32>
    %252 = tpu.matmul %249, %251, %cst_84 {dimension_numbers = #tpu.dot_dimension_numbers<[1], [0], [0], [1], [0, 0, 1, 1], [], []>} : vector<8x32xbf16>, vector<32x32xbf16>, vector<8x32xf32> -> vector<8x32xf32>
    %253 = arith.addf %248, %252 : vector<8x32xf32>
    %c0_85 = arith.constant 0 : index
    %c0_86 = arith.constant 0 : index
    %c0_87 = arith.constant 0 : index
    %254 = vector.load %arg10[%c0_85, %c0_86, %c0_87] : memref<2x1x32xf32, #tpu.memory_space<vmem>>, vector<1x1x32xf32>
    %255 = vector.shape_cast %254 : vector<1x1x32xf32> to vector<1x32xf32>
    %256 = vector.broadcast %255 : vector<1x32xf32> to vector<8x32xf32>
    %257 = arith.addf %253, %256 : vector<8x32xf32>
    %258 = math.tanh %257 : vector<8x32xf32>
    %259 = arith.addf %243, %258 : vector<8x32xf32>
    %260 = arith.truncf %259 : vector<8x32xf32> to vector<8x32xbf16>
    %c0_88 = arith.constant 0 : index
    %c0_89 = arith.constant 0 : index
    %c0_90 = arith.constant 0 : index
    %261 = vector.load %arg11[%c0_88, %c0_89, %c0_90] : memref<2x32x32xbf16, #tpu.memory_space<vmem>>, vector<1x32x32xbf16>
    %262 = vector.shape_cast %261 : vector<1x32x32xbf16> to vector<32x32xbf16>
    %cst_91 = arith.constant dense<0.000000e+00> : vector<8x32xf32>
    %263 = tpu.matmul %260, %262, %cst_91 {dimension_numbers = #tpu.dot_dimension_numbers<[1], [0], [0], [1], [0, 0, 1, 1], [], []>} : vector<8x32xbf16>, vector<32x32xbf16>, vector<8x32xf32> -> vector<8x32xf32>
    %c0_92 = arith.constant 0 : index
    %c0_93 = arith.constant 0 : index
    %c0_94 = arith.constant 0 : index
    %264 = vector.load %arg12[%c0_92, %c0_93, %c0_94] : memref<2x1x32xf32, #tpu.memory_space<vmem>>, vector<1x1x32xf32>
    %265 = vector.shape_cast %264 : vector<1x1x32xf32> to vector<1x32xf32>
    %266 = vector.broadcast %265 : vector<1x32xf32> to vector<8x32xf32>
    %267 = arith.addf %263, %266 : vector<8x32xf32>
    %268 = arith.negf %267 : vector<8x32xf32>
    %269 = math.exp %268 : vector<8x32xf32>
    %cst_95 = arith.constant 1.000000e+00 : f32
    %270 = vector.broadcast %cst_95 : f32 to vector<8x32xf32>
    %271 = arith.addf %270, %269 : vector<8x32xf32>
    %272 = arith.divf %270, %271 : vector<8x32xf32>
    %273 = arith.mulf %267, %272 : vector<8x32xf32>
    %274 = arith.truncf %273 : vector<8x32xf32> to vector<8x32xbf16>
    %c0_96 = arith.constant 0 : index
    %c0_97 = arith.constant 0 : index
    %c0_98 = arith.constant 0 : index
    %275 = vector.load %arg13[%c0_96, %c0_97, %c0_98] : memref<2x32x9xbf16, #tpu.memory_space<vmem>>, vector<1x32x9xbf16>
    %276 = vector.shape_cast %275 : vector<1x32x9xbf16> to vector<32x9xbf16>
    %cst_99 = arith.constant dense<0.000000e+00> : vector<8x9xf32>
    %277 = tpu.matmul %274, %276, %cst_99 {dimension_numbers = #tpu.dot_dimension_numbers<[1], [0], [0], [1], [0, 0, 1, 1], [], []>} : vector<8x32xbf16>, vector<32x9xbf16>, vector<8x9xf32> -> vector<8x9xf32>
    %cst_100 = arith.constant dense<0.000000e+00> : vector<1x9xf32>
    %278 = tpu.matmul %34, %277, %cst_100 {dimension_numbers = #tpu.dot_dimension_numbers<[1], [0], [0], [1], [0, 0, 1, 1], [], []>} : vector<1x8xf32>, vector<8x9xf32>, vector<1x9xf32> -> vector<1x9xf32>
    %279 = math.tanh %278 : vector<1x9xf32>
    %cst_101 = arith.constant 1.000000e-01 : f32
    %280 = vector.broadcast %cst_101 : f32 to vector<1x9xf32>
    %281 = arith.mulf %280, %279 : vector<1x9xf32>
    %282 = arith.addf %46, %281 : vector<1x9xf32>
    %cst_102 = arith.constant 0.000000e+00 : f32
    %283 = vector.broadcast %cst_102 : f32 to vector<1x9xf32>
    %284 = vector.extract_strided_slice %282 {offsets = [0, 0], sizes = [1, 1], strides = [1, 1]} : vector<1x9xf32> to vector<1x1xf32>
    %285 = vector.extract_strided_slice %46 {offsets = [0, 0], sizes = [1, 1], strides = [1, 1]} : vector<1x9xf32> to vector<1x1xf32>
    %286 = arith.mulf %284, %285 : vector<1x1xf32>
    %287 = vector.extract_strided_slice %282 {offsets = [0, 1], sizes = [1, 1], strides = [1, 1]} : vector<1x9xf32> to vector<1x1xf32>
    %288 = vector.extract_strided_slice %46 {offsets = [0, 3], sizes = [1, 1], strides = [1, 1]} : vector<1x9xf32> to vector<1x1xf32>
    %289 = arith.mulf %287, %288 : vector<1x1xf32>
    %290 = arith.addf %286, %289 : vector<1x1xf32>
    %291 = vector.extract_strided_slice %282 {offsets = [0, 2], sizes = [1, 1], strides = [1, 1]} : vector<1x9xf32> to vector<1x1xf32>
    %292 = vector.extract_strided_slice %46 {offsets = [0, 6], sizes = [1, 1], strides = [1, 1]} : vector<1x9xf32> to vector<1x1xf32>
    %293 = arith.mulf %291, %292 : vector<1x1xf32>
    %294 = arith.addf %290, %293 : vector<1x1xf32>
    %c0_i32_103 = arith.constant 0 : i32
    %295 = vector.broadcast %c0_i32_103 : i32 to vector<1x9xi32>
    %296 = arith.cmpi eq, %35, %295 : vector<1x9xi32>
    %cst_104 = arith.constant 0.000000e+00 : f32
    %297 = vector.shape_cast %294 : vector<1x1xf32> to vector<1x1xf32>
    %298 = vector.broadcast %297 : vector<1x1xf32> to vector<1x9xf32>
    %299 = vector.broadcast %cst_104 : f32 to vector<1x9xf32>
    %300 = arith.select %296, %298, %299 : vector<1x9xi1>, vector<1x9xf32>
    %301 = arith.addf %283, %300 : vector<1x9xf32>
    %302 = vector.extract_strided_slice %282 {offsets = [0, 0], sizes = [1, 1], strides = [1, 1]} : vector<1x9xf32> to vector<1x1xf32>
    %303 = vector.extract_strided_slice %46 {offsets = [0, 1], sizes = [1, 1], strides = [1, 1]} : vector<1x9xf32> to vector<1x1xf32>
    %304 = arith.mulf %302, %303 : vector<1x1xf32>
    %305 = vector.extract_strided_slice %282 {offsets = [0, 1], sizes = [1, 1], strides = [1, 1]} : vector<1x9xf32> to vector<1x1xf32>
    %306 = vector.extract_strided_slice %46 {offsets = [0, 4], sizes = [1, 1], strides = [1, 1]} : vector<1x9xf32> to vector<1x1xf32>
    %307 = arith.mulf %305, %306 : vector<1x1xf32>
    %308 = arith.addf %304, %307 : vector<1x1xf32>
    %309 = vector.extract_strided_slice %282 {offsets = [0, 2], sizes = [1, 1], strides = [1, 1]} : vector<1x9xf32> to vector<1x1xf32>
    %310 = vector.extract_strided_slice %46 {offsets = [0, 7], sizes = [1, 1], strides = [1, 1]} : vector<1x9xf32> to vector<1x1xf32>
    %311 = arith.mulf %309, %310 : vector<1x1xf32>
    %312 = arith.addf %308, %311 : vector<1x1xf32>
    %c1_i32_105 = arith.constant 1 : i32
    %313 = vector.broadcast %c1_i32_105 : i32 to vector<1x9xi32>
    %314 = arith.cmpi eq, %35, %313 : vector<1x9xi32>
    %cst_106 = arith.constant 0.000000e+00 : f32
    %315 = vector.shape_cast %312 : vector<1x1xf32> to vector<1x1xf32>
    %316 = vector.broadcast %315 : vector<1x1xf32> to vector<1x9xf32>
    %317 = vector.broadcast %cst_106 : f32 to vector<1x9xf32>
    %318 = arith.select %314, %316, %317 : vector<1x9xi1>, vector<1x9xf32>
    %319 = arith.addf %301, %318 : vector<1x9xf32>
    %320 = vector.extract_strided_slice %282 {offsets = [0, 0], sizes = [1, 1], strides = [1, 1]} : vector<1x9xf32> to vector<1x1xf32>
    %321 = vector.extract_strided_slice %46 {offsets = [0, 2], sizes = [1, 1], strides = [1, 1]} : vector<1x9xf32> to vector<1x1xf32>
    %322 = arith.mulf %320, %321 : vector<1x1xf32>
    %323 = vector.extract_strided_slice %282 {offsets = [0, 1], sizes = [1, 1], strides = [1, 1]} : vector<1x9xf32> to vector<1x1xf32>
    %324 = vector.extract_strided_slice %46 {offsets = [0, 5], sizes = [1, 1], strides = [1, 1]} : vector<1x9xf32> to vector<1x1xf32>
    %325 = arith.mulf %323, %324 : vector<1x1xf32>
    %326 = arith.addf %322, %325 : vector<1x1xf32>
    %327 = vector.extract_strided_slice %282 {offsets = [0, 2], sizes = [1, 1], strides = [1, 1]} : vector<1x9xf32> to vector<1x1xf32>
    %328 = vector.extract_strided_slice %46 {offsets = [0, 8], sizes = [1, 1], strides = [1, 1]} : vector<1x9xf32> to vector<1x1xf32>
    %329 = arith.mulf %327, %328 : vector<1x1xf32>
    %330 = arith.addf %326, %329 : vector<1x1xf32>
    %c2_i32_107 = arith.constant 2 : i32
    %331 = vector.broadcast %c2_i32_107 : i32 to vector<1x9xi32>
    %332 = arith.cmpi eq, %35, %331 : vector<1x9xi32>
    %cst_108 = arith.constant 0.000000e+00 : f32
    %333 = vector.shape_cast %330 : vector<1x1xf32> to vector<1x1xf32>
    %334 = vector.broadcast %333 : vector<1x1xf32> to vector<1x9xf32>
    %335 = vector.broadcast %cst_108 : f32 to vector<1x9xf32>
    %336 = arith.select %332, %334, %335 : vector<1x9xi1>, vector<1x9xf32>
    %337 = arith.addf %319, %336 : vector<1x9xf32>
    %338 = vector.extract_strided_slice %282 {offsets = [0, 3], sizes = [1, 1], strides = [1, 1]} : vector<1x9xf32> to vector<1x1xf32>
    %339 = vector.extract_strided_slice %46 {offsets = [0, 0], sizes = [1, 1], strides = [1, 1]} : vector<1x9xf32> to vector<1x1xf32>
    %340 = arith.mulf %338, %339 : vector<1x1xf32>
    %341 = vector.extract_strided_slice %282 {offsets = [0, 4], sizes = [1, 1], strides = [1, 1]} : vector<1x9xf32> to vector<1x1xf32>
    %342 = vector.extract_strided_slice %46 {offsets = [0, 3], sizes = [1, 1], strides = [1, 1]} : vector<1x9xf32> to vector<1x1xf32>
    %343 = arith.mulf %341, %342 : vector<1x1xf32>
    %344 = arith.addf %340, %343 : vector<1x1xf32>
    %345 = vector.extract_strided_slice %282 {offsets = [0, 5], sizes = [1, 1], strides = [1, 1]} : vector<1x9xf32> to vector<1x1xf32>
    %346 = vector.extract_strided_slice %46 {offsets = [0, 6], sizes = [1, 1], strides = [1, 1]} : vector<1x9xf32> to vector<1x1xf32>
    %347 = arith.mulf %345, %346 : vector<1x1xf32>
    %348 = arith.addf %344, %347 : vector<1x1xf32>
    %c3_i32 = arith.constant 3 : i32
    %349 = vector.broadcast %c3_i32 : i32 to vector<1x9xi32>
    %350 = arith.cmpi eq, %35, %349 : vector<1x9xi32>
    %cst_109 = arith.constant 0.000000e+00 : f32
    %351 = vector.shape_cast %348 : vector<1x1xf32> to vector<1x1xf32>
    %352 = vector.broadcast %351 : vector<1x1xf32> to vector<1x9xf32>
    %353 = vector.broadcast %cst_109 : f32 to vector<1x9xf32>
    %354 = arith.select %350, %352, %353 : vector<1x9xi1>, vector<1x9xf32>
    %355 = arith.addf %337, %354 : vector<1x9xf32>
    %356 = vector.extract_strided_slice %282 {offsets = [0, 3], sizes = [1, 1], strides = [1, 1]} : vector<1x9xf32> to vector<1x1xf32>
    %357 = vector.extract_strided_slice %46 {offsets = [0, 1], sizes = [1, 1], strides = [1, 1]} : vector<1x9xf32> to vector<1x1xf32>
    %358 = arith.mulf %356, %357 : vector<1x1xf32>
    %359 = vector.extract_strided_slice %282 {offsets = [0, 4], sizes = [1, 1], strides = [1, 1]} : vector<1x9xf32> to vector<1x1xf32>
    %360 = vector.extract_strided_slice %46 {offsets = [0, 4], sizes = [1, 1], strides = [1, 1]} : vector<1x9xf32> to vector<1x1xf32>
    %361 = arith.mulf %359, %360 : vector<1x1xf32>
    %362 = arith.addf %358, %361 : vector<1x1xf32>
    %363 = vector.extract_strided_slice %282 {offsets = [0, 5], sizes = [1, 1], strides = [1, 1]} : vector<1x9xf32> to vector<1x1xf32>
    %364 = vector.extract_strided_slice %46 {offsets = [0, 7], sizes = [1, 1], strides = [1, 1]} : vector<1x9xf32> to vector<1x1xf32>
    %365 = arith.mulf %363, %364 : vector<1x1xf32>
    %366 = arith.addf %362, %365 : vector<1x1xf32>
    %c4_i32_110 = arith.constant 4 : i32
    %367 = vector.broadcast %c4_i32_110 : i32 to vector<1x9xi32>
    %368 = arith.cmpi eq, %35, %367 : vector<1x9xi32>
    %cst_111 = arith.constant 0.000000e+00 : f32
    %369 = vector.shape_cast %366 : vector<1x1xf32> to vector<1x1xf32>
    %370 = vector.broadcast %369 : vector<1x1xf32> to vector<1x9xf32>
    %371 = vector.broadcast %cst_111 : f32 to vector<1x9xf32>
    %372 = arith.select %368, %370, %371 : vector<1x9xi1>, vector<1x9xf32>
    %373 = arith.addf %355, %372 : vector<1x9xf32>
    %374 = vector.extract_strided_slice %282 {offsets = [0, 3], sizes = [1, 1], strides = [1, 1]} : vector<1x9xf32> to vector<1x1xf32>
    %375 = vector.extract_strided_slice %46 {offsets = [0, 2], sizes = [1, 1], strides = [1, 1]} : vector<1x9xf32> to vector<1x1xf32>
    %376 = arith.mulf %374, %375 : vector<1x1xf32>
    %377 = vector.extract_strided_slice %282 {offsets = [0, 4], sizes = [1, 1], strides = [1, 1]} : vector<1x9xf32> to vector<1x1xf32>
    %378 = vector.extract_strided_slice %46 {offsets = [0, 5], sizes = [1, 1], strides = [1, 1]} : vector<1x9xf32> to vector<1x1xf32>
    %379 = arith.mulf %377, %378 : vector<1x1xf32>
    %380 = arith.addf %376, %379 : vector<1x1xf32>
    %381 = vector.extract_strided_slice %282 {offsets = [0, 5], sizes = [1, 1], strides = [1, 1]} : vector<1x9xf32> to vector<1x1xf32>
    %382 = vector.extract_strided_slice %46 {offsets = [0, 8], sizes = [1, 1], strides = [1, 1]} : vector<1x9xf32> to vector<1x1xf32>
    %383 = arith.mulf %381, %382 : vector<1x1xf32>
    %384 = arith.addf %380, %383 : vector<1x1xf32>
    %c5_i32 = arith.constant 5 : i32
    %385 = vector.broadcast %c5_i32 : i32 to vector<1x9xi32>
    %386 = arith.cmpi eq, %35, %385 : vector<1x9xi32>
    %cst_112 = arith.constant 0.000000e+00 : f32
    %387 = vector.shape_cast %384 : vector<1x1xf32> to vector<1x1xf32>
    %388 = vector.broadcast %387 : vector<1x1xf32> to vector<1x9xf32>
    %389 = vector.broadcast %cst_112 : f32 to vector<1x9xf32>
    %390 = arith.select %386, %388, %389 : vector<1x9xi1>, vector<1x9xf32>
    %391 = arith.addf %373, %390 : vector<1x9xf32>
    %392 = vector.extract_strided_slice %282 {offsets = [0, 6], sizes = [1, 1], strides = [1, 1]} : vector<1x9xf32> to vector<1x1xf32>
    %393 = vector.extract_strided_slice %46 {offsets = [0, 0], sizes = [1, 1], strides = [1, 1]} : vector<1x9xf32> to vector<1x1xf32>
    %394 = arith.mulf %392, %393 : vector<1x1xf32>
    %395 = vector.extract_strided_slice %282 {offsets = [0, 7], sizes = [1, 1], strides = [1, 1]} : vector<1x9xf32> to vector<1x1xf32>
    %396 = vector.extract_strided_slice %46 {offsets = [0, 3], sizes = [1, 1], strides = [1, 1]} : vector<1x9xf32> to vector<1x1xf32>
    %397 = arith.mulf %395, %396 : vector<1x1xf32>
    %398 = arith.addf %394, %397 : vector<1x1xf32>
    %399 = vector.extract_strided_slice %282 {offsets = [0, 8], sizes = [1, 1], strides = [1, 1]} : vector<1x9xf32> to vector<1x1xf32>
    %400 = vector.extract_strided_slice %46 {offsets = [0, 6], sizes = [1, 1], strides = [1, 1]} : vector<1x9xf32> to vector<1x1xf32>
    %401 = arith.mulf %399, %400 : vector<1x1xf32>
    %402 = arith.addf %398, %401 : vector<1x1xf32>
    %c6_i32 = arith.constant 6 : i32
    %403 = vector.broadcast %c6_i32 : i32 to vector<1x9xi32>
    %404 = arith.cmpi eq, %35, %403 : vector<1x9xi32>
    %cst_113 = arith.constant 0.000000e+00 : f32
    %405 = vector.shape_cast %402 : vector<1x1xf32> to vector<1x1xf32>
    %406 = vector.broadcast %405 : vector<1x1xf32> to vector<1x9xf32>
    %407 = vector.broadcast %cst_113 : f32 to vector<1x9xf32>
    %408 = arith.select %404, %406, %407 : vector<1x9xi1>, vector<1x9xf32>
    %409 = arith.addf %391, %408 : vector<1x9xf32>
    %410 = vector.extract_strided_slice %282 {offsets = [0, 6], sizes = [1, 1], strides = [1, 1]} : vector<1x9xf32> to vector<1x1xf32>
    %411 = vector.extract_strided_slice %46 {offsets = [0, 1], sizes = [1, 1], strides = [1, 1]} : vector<1x9xf32> to vector<1x1xf32>
    %412 = arith.mulf %410, %411 : vector<1x1xf32>
    %413 = vector.extract_strided_slice %282 {offsets = [0, 7], sizes = [1, 1], strides = [1, 1]} : vector<1x9xf32> to vector<1x1xf32>
    %414 = vector.extract_strided_slice %46 {offsets = [0, 4], sizes = [1, 1], strides = [1, 1]} : vector<1x9xf32> to vector<1x1xf32>
    %415 = arith.mulf %413, %414 : vector<1x1xf32>
    %416 = arith.addf %412, %415 : vector<1x1xf32>
    %417 = vector.extract_strided_slice %282 {offsets = [0, 8], sizes = [1, 1], strides = [1, 1]} : vector<1x9xf32> to vector<1x1xf32>
    %418 = vector.extract_strided_slice %46 {offsets = [0, 7], sizes = [1, 1], strides = [1, 1]} : vector<1x9xf32> to vector<1x1xf32>
    %419 = arith.mulf %417, %418 : vector<1x1xf32>
    %420 = arith.addf %416, %419 : vector<1x1xf32>
    %c7_i32 = arith.constant 7 : i32
    %421 = vector.broadcast %c7_i32 : i32 to vector<1x9xi32>
    %422 = arith.cmpi eq, %35, %421 : vector<1x9xi32>
    %cst_114 = arith.constant 0.000000e+00 : f32
    %423 = vector.shape_cast %420 : vector<1x1xf32> to vector<1x1xf32>
    %424 = vector.broadcast %423 : vector<1x1xf32> to vector<1x9xf32>
    %425 = vector.broadcast %cst_114 : f32 to vector<1x9xf32>
    %426 = arith.select %422, %424, %425 : vector<1x9xi1>, vector<1x9xf32>
    %427 = arith.addf %409, %426 : vector<1x9xf32>
    %428 = vector.extract_strided_slice %282 {offsets = [0, 6], sizes = [1, 1], strides = [1, 1]} : vector<1x9xf32> to vector<1x1xf32>
    %429 = vector.extract_strided_slice %46 {offsets = [0, 2], sizes = [1, 1], strides = [1, 1]} : vector<1x9xf32> to vector<1x1xf32>
    %430 = arith.mulf %428, %429 : vector<1x1xf32>
    %431 = vector.extract_strided_slice %282 {offsets = [0, 7], sizes = [1, 1], strides = [1, 1]} : vector<1x9xf32> to vector<1x1xf32>
    %432 = vector.extract_strided_slice %46 {offsets = [0, 5], sizes = [1, 1], strides = [1, 1]} : vector<1x9xf32> to vector<1x1xf32>
    %433 = arith.mulf %431, %432 : vector<1x1xf32>
    %434 = arith.addf %430, %433 : vector<1x1xf32>
    %435 = vector.extract_strided_slice %282 {offsets = [0, 8], sizes = [1, 1], strides = [1, 1]} : vector<1x9xf32> to vector<1x1xf32>
    %436 = vector.extract_strided_slice %46 {offsets = [0, 8], sizes = [1, 1], strides = [1, 1]} : vector<1x9xf32> to vector<1x1xf32>
    %437 = arith.mulf %435, %436 : vector<1x1xf32>
    %438 = arith.addf %434, %437 : vector<1x1xf32>
    %c8_i32_115 = arith.constant 8 : i32
    %439 = vector.broadcast %c8_i32_115 : i32 to vector<1x9xi32>
    %440 = arith.cmpi eq, %35, %439 : vector<1x9xi32>
    %cst_116 = arith.constant 0.000000e+00 : f32
    %441 = vector.shape_cast %438 : vector<1x1xf32> to vector<1x1xf32>
    %442 = vector.broadcast %441 : vector<1x1xf32> to vector<1x9xf32>
    %443 = vector.broadcast %cst_116 : f32 to vector<1x9xf32>
    %444 = arith.select %440, %442, %443 : vector<1x9xi1>, vector<1x9xf32>
    %445 = arith.addf %427, %444 : vector<1x9xf32>
    %cst_117 = arith.constant 0.000000e+00 : f32
    %446 = vector.broadcast %cst_117 : f32 to vector<1x9xf32>
    %447 = vector.extract_strided_slice %445 {offsets = [0, 0], sizes = [1, 1], strides = [1, 1]} : vector<1x9xf32> to vector<1x1xf32>
    %448 = vector.extract_strided_slice %46 {offsets = [0, 0], sizes = [1, 1], strides = [1, 1]} : vector<1x9xf32> to vector<1x1xf32>
    %449 = arith.mulf %447, %448 : vector<1x1xf32>
    %450 = vector.extract_strided_slice %445 {offsets = [0, 1], sizes = [1, 1], strides = [1, 1]} : vector<1x9xf32> to vector<1x1xf32>
    %451 = vector.extract_strided_slice %46 {offsets = [0, 3], sizes = [1, 1], strides = [1, 1]} : vector<1x9xf32> to vector<1x1xf32>
    %452 = arith.mulf %450, %451 : vector<1x1xf32>
    %453 = arith.addf %449, %452 : vector<1x1xf32>
    %454 = vector.extract_strided_slice %445 {offsets = [0, 2], sizes = [1, 1], strides = [1, 1]} : vector<1x9xf32> to vector<1x1xf32>
    %455 = vector.extract_strided_slice %46 {offsets = [0, 6], sizes = [1, 1], strides = [1, 1]} : vector<1x9xf32> to vector<1x1xf32>
    %456 = arith.mulf %454, %455 : vector<1x1xf32>
    %457 = arith.addf %453, %456 : vector<1x1xf32>
    %c0_i32_118 = arith.constant 0 : i32
    %458 = vector.broadcast %c0_i32_118 : i32 to vector<1x9xi32>
    %459 = arith.cmpi eq, %35, %458 : vector<1x9xi32>
    %cst_119 = arith.constant 0.000000e+00 : f32
    %460 = vector.shape_cast %457 : vector<1x1xf32> to vector<1x1xf32>
    %461 = vector.broadcast %460 : vector<1x1xf32> to vector<1x9xf32>
    %462 = vector.broadcast %cst_119 : f32 to vector<1x9xf32>
    %463 = arith.select %459, %461, %462 : vector<1x9xi1>, vector<1x9xf32>
    %464 = arith.addf %446, %463 : vector<1x9xf32>
    %465 = vector.extract_strided_slice %445 {offsets = [0, 0], sizes = [1, 1], strides = [1, 1]} : vector<1x9xf32> to vector<1x1xf32>
    %466 = vector.extract_strided_slice %46 {offsets = [0, 1], sizes = [1, 1], strides = [1, 1]} : vector<1x9xf32> to vector<1x1xf32>
    %467 = arith.mulf %465, %466 : vector<1x1xf32>
    %468 = vector.extract_strided_slice %445 {offsets = [0, 1], sizes = [1, 1], strides = [1, 1]} : vector<1x9xf32> to vector<1x1xf32>
    %469 = vector.extract_strided_slice %46 {offsets = [0, 4], sizes = [1, 1], strides = [1, 1]} : vector<1x9xf32> to vector<1x1xf32>
    %470 = arith.mulf %468, %469 : vector<1x1xf32>
    %471 = arith.addf %467, %470 : vector<1x1xf32>
    %472 = vector.extract_strided_slice %445 {offsets = [0, 2], sizes = [1, 1], strides = [1, 1]} : vector<1x9xf32> to vector<1x1xf32>
    %473 = vector.extract_strided_slice %46 {offsets = [0, 7], sizes = [1, 1], strides = [1, 1]} : vector<1x9xf32> to vector<1x1xf32>
    %474 = arith.mulf %472, %473 : vector<1x1xf32>
    %475 = arith.addf %471, %474 : vector<1x1xf32>
    %c1_i32_120 = arith.constant 1 : i32
    %476 = vector.broadcast %c1_i32_120 : i32 to vector<1x9xi32>
    %477 = arith.cmpi eq, %35, %476 : vector<1x9xi32>
    %cst_121 = arith.constant 0.000000e+00 : f32
    %478 = vector.shape_cast %475 : vector<1x1xf32> to vector<1x1xf32>
    %479 = vector.broadcast %478 : vector<1x1xf32> to vector<1x9xf32>
    %480 = vector.broadcast %cst_121 : f32 to vector<1x9xf32>
    %481 = arith.select %477, %479, %480 : vector<1x9xi1>, vector<1x9xf32>
    %482 = arith.addf %464, %481 : vector<1x9xf32>
    %483 = vector.extract_strided_slice %445 {offsets = [0, 0], sizes = [1, 1], strides = [1, 1]} : vector<1x9xf32> to vector<1x1xf32>
    %484 = vector.extract_strided_slice %46 {offsets = [0, 2], sizes = [1, 1], strides = [1, 1]} : vector<1x9xf32> to vector<1x1xf32>
    %485 = arith.mulf %483, %484 : vector<1x1xf32>
    %486 = vector.extract_strided_slice %445 {offsets = [0, 1], sizes = [1, 1], strides = [1, 1]} : vector<1x9xf32> to vector<1x1xf32>
    %487 = vector.extract_strided_slice %46 {offsets = [0, 5], sizes = [1, 1], strides = [1, 1]} : vector<1x9xf32> to vector<1x1xf32>
    %488 = arith.mulf %486, %487 : vector<1x1xf32>
    %489 = arith.addf %485, %488 : vector<1x1xf32>
    %490 = vector.extract_strided_slice %445 {offsets = [0, 2], sizes = [1, 1], strides = [1, 1]} : vector<1x9xf32> to vector<1x1xf32>
    %491 = vector.extract_strided_slice %46 {offsets = [0, 8], sizes = [1, 1], strides = [1, 1]} : vector<1x9xf32> to vector<1x1xf32>
    %492 = arith.mulf %490, %491 : vector<1x1xf32>
    %493 = arith.addf %489, %492 : vector<1x1xf32>
    %c2_i32_122 = arith.constant 2 : i32
    %494 = vector.broadcast %c2_i32_122 : i32 to vector<1x9xi32>
    %495 = arith.cmpi eq, %35, %494 : vector<1x9xi32>
    %cst_123 = arith.constant 0.000000e+00 : f32
    %496 = vector.shape_cast %493 : vector<1x1xf32> to vector<1x1xf32>
    %497 = vector.broadcast %496 : vector<1x1xf32> to vector<1x9xf32>
    %498 = vector.broadcast %cst_123 : f32 to vector<1x9xf32>
    %499 = arith.select %495, %497, %498 : vector<1x9xi1>, vector<1x9xf32>
    %500 = arith.addf %482, %499 : vector<1x9xf32>
    %501 = vector.extract_strided_slice %445 {offsets = [0, 3], sizes = [1, 1], strides = [1, 1]} : vector<1x9xf32> to vector<1x1xf32>
    %502 = vector.extract_strided_slice %46 {offsets = [0, 0], sizes = [1, 1], strides = [1, 1]} : vector<1x9xf32> to vector<1x1xf32>
    %503 = arith.mulf %501, %502 : vector<1x1xf32>
    %504 = vector.extract_strided_slice %445 {offsets = [0, 4], sizes = [1, 1], strides = [1, 1]} : vector<1x9xf32> to vector<1x1xf32>
    %505 = vector.extract_strided_slice %46 {offsets = [0, 3], sizes = [1, 1], strides = [1, 1]} : vector<1x9xf32> to vector<1x1xf32>
    %506 = arith.mulf %504, %505 : vector<1x1xf32>
    %507 = arith.addf %503, %506 : vector<1x1xf32>
    %508 = vector.extract_strided_slice %445 {offsets = [0, 5], sizes = [1, 1], strides = [1, 1]} : vector<1x9xf32> to vector<1x1xf32>
    %509 = vector.extract_strided_slice %46 {offsets = [0, 6], sizes = [1, 1], strides = [1, 1]} : vector<1x9xf32> to vector<1x1xf32>
    %510 = arith.mulf %508, %509 : vector<1x1xf32>
    %511 = arith.addf %507, %510 : vector<1x1xf32>
    %c3_i32_124 = arith.constant 3 : i32
    %512 = vector.broadcast %c3_i32_124 : i32 to vector<1x9xi32>
    %513 = arith.cmpi eq, %35, %512 : vector<1x9xi32>
    %cst_125 = arith.constant 0.000000e+00 : f32
    %514 = vector.shape_cast %511 : vector<1x1xf32> to vector<1x1xf32>
    %515 = vector.broadcast %514 : vector<1x1xf32> to vector<1x9xf32>
    %516 = vector.broadcast %cst_125 : f32 to vector<1x9xf32>
    %517 = arith.select %513, %515, %516 : vector<1x9xi1>, vector<1x9xf32>
    %518 = arith.addf %500, %517 : vector<1x9xf32>
    %519 = vector.extract_strided_slice %445 {offsets = [0, 3], sizes = [1, 1], strides = [1, 1]} : vector<1x9xf32> to vector<1x1xf32>
    %520 = vector.extract_strided_slice %46 {offsets = [0, 1], sizes = [1, 1], strides = [1, 1]} : vector<1x9xf32> to vector<1x1xf32>
    %521 = arith.mulf %519, %520 : vector<1x1xf32>
    %522 = vector.extract_strided_slice %445 {offsets = [0, 4], sizes = [1, 1], strides = [1, 1]} : vector<1x9xf32> to vector<1x1xf32>
    %523 = vector.extract_strided_slice %46 {offsets = [0, 4], sizes = [1, 1], strides = [1, 1]} : vector<1x9xf32> to vector<1x1xf32>
    %524 = arith.mulf %522, %523 : vector<1x1xf32>
    %525 = arith.addf %521, %524 : vector<1x1xf32>
    %526 = vector.extract_strided_slice %445 {offsets = [0, 5], sizes = [1, 1], strides = [1, 1]} : vector<1x9xf32> to vector<1x1xf32>
    %527 = vector.extract_strided_slice %46 {offsets = [0, 7], sizes = [1, 1], strides = [1, 1]} : vector<1x9xf32> to vector<1x1xf32>
    %528 = arith.mulf %526, %527 : vector<1x1xf32>
    %529 = arith.addf %525, %528 : vector<1x1xf32>
    %c4_i32_126 = arith.constant 4 : i32
    %530 = vector.broadcast %c4_i32_126 : i32 to vector<1x9xi32>
    %531 = arith.cmpi eq, %35, %530 : vector<1x9xi32>
    %cst_127 = arith.constant 0.000000e+00 : f32
    %532 = vector.shape_cast %529 : vector<1x1xf32> to vector<1x1xf32>
    %533 = vector.broadcast %532 : vector<1x1xf32> to vector<1x9xf32>
    %534 = vector.broadcast %cst_127 : f32 to vector<1x9xf32>
    %535 = arith.select %531, %533, %534 : vector<1x9xi1>, vector<1x9xf32>
    %536 = arith.addf %518, %535 : vector<1x9xf32>
    %537 = vector.extract_strided_slice %445 {offsets = [0, 3], sizes = [1, 1], strides = [1, 1]} : vector<1x9xf32> to vector<1x1xf32>
    %538 = vector.extract_strided_slice %46 {offsets = [0, 2], sizes = [1, 1], strides = [1, 1]} : vector<1x9xf32> to vector<1x1xf32>
    %539 = arith.mulf %537, %538 : vector<1x1xf32>
    %540 = vector.extract_strided_slice %445 {offsets = [0, 4], sizes = [1, 1], strides = [1, 1]} : vector<1x9xf32> to vector<1x1xf32>
    %541 = vector.extract_strided_slice %46 {offsets = [0, 5], sizes = [1, 1], strides = [1, 1]} : vector<1x9xf32> to vector<1x1xf32>
    %542 = arith.mulf %540, %541 : vector<1x1xf32>
    %543 = arith.addf %539, %542 : vector<1x1xf32>
    %544 = vector.extract_strided_slice %445 {offsets = [0, 5], sizes = [1, 1], strides = [1, 1]} : vector<1x9xf32> to vector<1x1xf32>
    %545 = vector.extract_strided_slice %46 {offsets = [0, 8], sizes = [1, 1], strides = [1, 1]} : vector<1x9xf32> to vector<1x1xf32>
    %546 = arith.mulf %544, %545 : vector<1x1xf32>
    %547 = arith.addf %543, %546 : vector<1x1xf32>
    %c5_i32_128 = arith.constant 5 : i32
    %548 = vector.broadcast %c5_i32_128 : i32 to vector<1x9xi32>
    %549 = arith.cmpi eq, %35, %548 : vector<1x9xi32>
    %cst_129 = arith.constant 0.000000e+00 : f32
    %550 = vector.shape_cast %547 : vector<1x1xf32> to vector<1x1xf32>
    %551 = vector.broadcast %550 : vector<1x1xf32> to vector<1x9xf32>
    %552 = vector.broadcast %cst_129 : f32 to vector<1x9xf32>
    %553 = arith.select %549, %551, %552 : vector<1x9xi1>, vector<1x9xf32>
    %554 = arith.addf %536, %553 : vector<1x9xf32>
    %555 = vector.extract_strided_slice %445 {offsets = [0, 6], sizes = [1, 1], strides = [1, 1]} : vector<1x9xf32> to vector<1x1xf32>
    %556 = vector.extract_strided_slice %46 {offsets = [0, 0], sizes = [1, 1], strides = [1, 1]} : vector<1x9xf32> to vector<1x1xf32>
    %557 = arith.mulf %555, %556 : vector<1x1xf32>
    %558 = vector.extract_strided_slice %445 {offsets = [0, 7], sizes = [1, 1], strides = [1, 1]} : vector<1x9xf32> to vector<1x1xf32>
    %559 = vector.extract_strided_slice %46 {offsets = [0, 3], sizes = [1, 1], strides = [1, 1]} : vector<1x9xf32> to vector<1x1xf32>
    %560 = arith.mulf %558, %559 : vector<1x1xf32>
    %561 = arith.addf %557, %560 : vector<1x1xf32>
    %562 = vector.extract_strided_slice %445 {offsets = [0, 8], sizes = [1, 1], strides = [1, 1]} : vector<1x9xf32> to vector<1x1xf32>
    %563 = vector.extract_strided_slice %46 {offsets = [0, 6], sizes = [1, 1], strides = [1, 1]} : vector<1x9xf32> to vector<1x1xf32>
    %564 = arith.mulf %562, %563 : vector<1x1xf32>
    %565 = arith.addf %561, %564 : vector<1x1xf32>
    %c6_i32_130 = arith.constant 6 : i32
    %566 = vector.broadcast %c6_i32_130 : i32 to vector<1x9xi32>
    %567 = arith.cmpi eq, %35, %566 : vector<1x9xi32>
    %cst_131 = arith.constant 0.000000e+00 : f32
    %568 = vector.shape_cast %565 : vector<1x1xf32> to vector<1x1xf32>
    %569 = vector.broadcast %568 : vector<1x1xf32> to vector<1x9xf32>
    %570 = vector.broadcast %cst_131 : f32 to vector<1x9xf32>
    %571 = arith.select %567, %569, %570 : vector<1x9xi1>, vector<1x9xf32>
    %572 = arith.addf %554, %571 : vector<1x9xf32>
    %573 = vector.extract_strided_slice %445 {offsets = [0, 6], sizes = [1, 1], strides = [1, 1]} : vector<1x9xf32> to vector<1x1xf32>
    %574 = vector.extract_strided_slice %46 {offsets = [0, 1], sizes = [1, 1], strides = [1, 1]} : vector<1x9xf32> to vector<1x1xf32>
    %575 = arith.mulf %573, %574 : vector<1x1xf32>
    %576 = vector.extract_strided_slice %445 {offsets = [0, 7], sizes = [1, 1], strides = [1, 1]} : vector<1x9xf32> to vector<1x1xf32>
    %577 = vector.extract_strided_slice %46 {offsets = [0, 4], sizes = [1, 1], strides = [1, 1]} : vector<1x9xf32> to vector<1x1xf32>
    %578 = arith.mulf %576, %577 : vector<1x1xf32>
    %579 = arith.addf %575, %578 : vector<1x1xf32>
    %580 = vector.extract_strided_slice %445 {offsets = [0, 8], sizes = [1, 1], strides = [1, 1]} : vector<1x9xf32> to vector<1x1xf32>
    %581 = vector.extract_strided_slice %46 {offsets = [0, 7], sizes = [1, 1], strides = [1, 1]} : vector<1x9xf32> to vector<1x1xf32>
    %582 = arith.mulf %580, %581 : vector<1x1xf32>
    %583 = arith.addf %579, %582 : vector<1x1xf32>
    %c7_i32_132 = arith.constant 7 : i32
    %584 = vector.broadcast %c7_i32_132 : i32 to vector<1x9xi32>
    %585 = arith.cmpi eq, %35, %584 : vector<1x9xi32>
    %cst_133 = arith.constant 0.000000e+00 : f32
    %586 = vector.shape_cast %583 : vector<1x1xf32> to vector<1x1xf32>
    %587 = vector.broadcast %586 : vector<1x1xf32> to vector<1x9xf32>
    %588 = vector.broadcast %cst_133 : f32 to vector<1x9xf32>
    %589 = arith.select %585, %587, %588 : vector<1x9xi1>, vector<1x9xf32>
    %590 = arith.addf %572, %589 : vector<1x9xf32>
    %591 = vector.extract_strided_slice %445 {offsets = [0, 6], sizes = [1, 1], strides = [1, 1]} : vector<1x9xf32> to vector<1x1xf32>
    %592 = vector.extract_strided_slice %46 {offsets = [0, 2], sizes = [1, 1], strides = [1, 1]} : vector<1x9xf32> to vector<1x1xf32>
    %593 = arith.mulf %591, %592 : vector<1x1xf32>
    %594 = vector.extract_strided_slice %445 {offsets = [0, 7], sizes = [1, 1], strides = [1, 1]} : vector<1x9xf32> to vector<1x1xf32>
    %595 = vector.extract_strided_slice %46 {offsets = [0, 5], sizes = [1, 1], strides = [1, 1]} : vector<1x9xf32> to vector<1x1xf32>
    %596 = arith.mulf %594, %595 : vector<1x1xf32>
    %597 = arith.addf %593, %596 : vector<1x1xf32>
    %598 = vector.extract_strided_slice %445 {offsets = [0, 8], sizes = [1, 1], strides = [1, 1]} : vector<1x9xf32> to vector<1x1xf32>
    %599 = vector.extract_strided_slice %46 {offsets = [0, 8], sizes = [1, 1], strides = [1, 1]} : vector<1x9xf32> to vector<1x1xf32>
    %600 = arith.mulf %598, %599 : vector<1x1xf32>
    %601 = arith.addf %597, %600 : vector<1x1xf32>
    %c8_i32_134 = arith.constant 8 : i32
    %602 = vector.broadcast %c8_i32_134 : i32 to vector<1x9xi32>
    %603 = arith.cmpi eq, %35, %602 : vector<1x9xi32>
    %cst_135 = arith.constant 0.000000e+00 : f32
    %604 = vector.shape_cast %601 : vector<1x1xf32> to vector<1x1xf32>
    %605 = vector.broadcast %604 : vector<1x1xf32> to vector<1x9xf32>
    %606 = vector.broadcast %cst_135 : f32 to vector<1x9xf32>
    %607 = arith.select %603, %605, %606 : vector<1x9xi1>, vector<1x9xf32>
    %608 = arith.addf %590, %607 : vector<1x9xf32>
    %cst_136 = arith.constant 0.000000e+00 : f32
    %609 = vector.broadcast %cst_136 : f32 to vector<8x3xf32>
    %610 = vector.extract_strided_slice %3 {offsets = [0, 0], sizes = [8, 1], strides = [1, 1]} : vector<8x3xf32> to vector<8x1xf32>
    %611 = vector.extract_strided_slice %608 {offsets = [0, 0], sizes = [1, 1], strides = [1, 1]} : vector<1x9xf32> to vector<1x1xf32>
    %612 = vector.broadcast %611 : vector<1x1xf32> to vector<8x1xf32>
    %613 = arith.mulf %610, %612 : vector<8x1xf32>
    %614 = vector.extract_strided_slice %3 {offsets = [0, 1], sizes = [8, 1], strides = [1, 1]} : vector<8x3xf32> to vector<8x1xf32>
    %615 = vector.extract_strided_slice %608 {offsets = [0, 3], sizes = [1, 1], strides = [1, 1]} : vector<1x9xf32> to vector<1x1xf32>
    %616 = vector.broadcast %615 : vector<1x1xf32> to vector<8x1xf32>
    %617 = arith.mulf %614, %616 : vector<8x1xf32>
    %618 = arith.addf %613, %617 : vector<8x1xf32>
    %619 = vector.extract_strided_slice %3 {offsets = [0, 2], sizes = [8, 1], strides = [1, 1]} : vector<8x3xf32> to vector<8x1xf32>
    %620 = vector.extract_strided_slice %608 {offsets = [0, 6], sizes = [1, 1], strides = [1, 1]} : vector<1x9xf32> to vector<1x1xf32>
    %621 = vector.broadcast %620 : vector<1x1xf32> to vector<8x1xf32>
    %622 = arith.mulf %619, %621 : vector<8x1xf32>
    %623 = arith.addf %618, %622 : vector<8x1xf32>
    %c0_i32_137 = arith.constant 0 : i32
    %624 = vector.broadcast %c0_i32_137 : i32 to vector<8x3xi32>
    %625 = arith.cmpi eq, %47, %624 : vector<8x3xi32>
    %cst_138 = arith.constant 0.000000e+00 : f32
    %626 = vector.shape_cast %623 : vector<8x1xf32> to vector<8x1xf32>
    %627 = vector.broadcast %626 : vector<8x1xf32> to vector<8x3xf32>
    %628 = vector.broadcast %cst_138 : f32 to vector<8x3xf32>
    %629 = arith.select %625, %627, %628 : vector<8x3xi1>, vector<8x3xf32>
    %630 = arith.addf %609, %629 : vector<8x3xf32>
    %631 = vector.extract_strided_slice %3 {offsets = [0, 0], sizes = [8, 1], strides = [1, 1]} : vector<8x3xf32> to vector<8x1xf32>
    %632 = vector.extract_strided_slice %608 {offsets = [0, 1], sizes = [1, 1], strides = [1, 1]} : vector<1x9xf32> to vector<1x1xf32>
    %633 = vector.broadcast %632 : vector<1x1xf32> to vector<8x1xf32>
    %634 = arith.mulf %631, %633 : vector<8x1xf32>
    %635 = vector.extract_strided_slice %3 {offsets = [0, 1], sizes = [8, 1], strides = [1, 1]} : vector<8x3xf32> to vector<8x1xf32>
    %636 = vector.extract_strided_slice %608 {offsets = [0, 4], sizes = [1, 1], strides = [1, 1]} : vector<1x9xf32> to vector<1x1xf32>
    %637 = vector.broadcast %636 : vector<1x1xf32> to vector<8x1xf32>
    %638 = arith.mulf %635, %637 : vector<8x1xf32>
    %639 = arith.addf %634, %638 : vector<8x1xf32>
    %640 = vector.extract_strided_slice %3 {offsets = [0, 2], sizes = [8, 1], strides = [1, 1]} : vector<8x3xf32> to vector<8x1xf32>
    %641 = vector.extract_strided_slice %608 {offsets = [0, 7], sizes = [1, 1], strides = [1, 1]} : vector<1x9xf32> to vector<1x1xf32>
    %642 = vector.broadcast %641 : vector<1x1xf32> to vector<8x1xf32>
    %643 = arith.mulf %640, %642 : vector<8x1xf32>
    %644 = arith.addf %639, %643 : vector<8x1xf32>
    %c1_i32_139 = arith.constant 1 : i32
    %645 = vector.broadcast %c1_i32_139 : i32 to vector<8x3xi32>
    %646 = arith.cmpi eq, %47, %645 : vector<8x3xi32>
    %cst_140 = arith.constant 0.000000e+00 : f32
    %647 = vector.shape_cast %644 : vector<8x1xf32> to vector<8x1xf32>
    %648 = vector.broadcast %647 : vector<8x1xf32> to vector<8x3xf32>
    %649 = vector.broadcast %cst_140 : f32 to vector<8x3xf32>
    %650 = arith.select %646, %648, %649 : vector<8x3xi1>, vector<8x3xf32>
    %651 = arith.addf %630, %650 : vector<8x3xf32>
    %652 = vector.extract_strided_slice %3 {offsets = [0, 0], sizes = [8, 1], strides = [1, 1]} : vector<8x3xf32> to vector<8x1xf32>
    %653 = vector.extract_strided_slice %608 {offsets = [0, 2], sizes = [1, 1], strides = [1, 1]} : vector<1x9xf32> to vector<1x1xf32>
    %654 = vector.broadcast %653 : vector<1x1xf32> to vector<8x1xf32>
    %655 = arith.mulf %652, %654 : vector<8x1xf32>
    %656 = vector.extract_strided_slice %3 {offsets = [0, 1], sizes = [8, 1], strides = [1, 1]} : vector<8x3xf32> to vector<8x1xf32>
    %657 = vector.extract_strided_slice %608 {offsets = [0, 5], sizes = [1, 1], strides = [1, 1]} : vector<1x9xf32> to vector<1x1xf32>
    %658 = vector.broadcast %657 : vector<1x1xf32> to vector<8x1xf32>
    %659 = arith.mulf %656, %658 : vector<8x1xf32>
    %660 = arith.addf %655, %659 : vector<8x1xf32>
    %661 = vector.extract_strided_slice %3 {offsets = [0, 2], sizes = [8, 1], strides = [1, 1]} : vector<8x3xf32> to vector<8x1xf32>
    %662 = vector.extract_strided_slice %608 {offsets = [0, 8], sizes = [1, 1], strides = [1, 1]} : vector<1x9xf32> to vector<1x1xf32>
    %663 = vector.broadcast %662 : vector<1x1xf32> to vector<8x1xf32>
    %664 = arith.mulf %661, %663 : vector<8x1xf32>
    %665 = arith.addf %660, %664 : vector<8x1xf32>
    %c2_i32_141 = arith.constant 2 : i32
    %666 = vector.broadcast %c2_i32_141 : i32 to vector<8x3xi32>
    %667 = arith.cmpi eq, %47, %666 : vector<8x3xi32>
    %cst_142 = arith.constant 0.000000e+00 : f32
    %668 = vector.shape_cast %665 : vector<8x1xf32> to vector<8x1xf32>
    %669 = vector.broadcast %668 : vector<8x1xf32> to vector<8x3xf32>
    %670 = vector.broadcast %cst_142 : f32 to vector<8x3xf32>
    %671 = arith.select %667, %669, %670 : vector<8x3xi1>, vector<8x3xf32>
    %672 = arith.addf %651, %671 : vector<8x3xf32>
    %cst_143 = arith.constant dense<0.000000e+00> : vector<8x8xf32>
    %673 = tpu.matmul %672, %672, %cst_143 {dimension_numbers = #tpu.dot_dimension_numbers<[1], [1], [0], [0], [0, 0, 1, 0], [], []>} : vector<8x3xf32>, vector<8x3xf32>, vector<8x8xf32> -> vector<8x8xf32>
    %cst_144 = arith.constant 0.000000e+00 : f32
    %674 = vector.broadcast %cst_144 : f32 to vector<8x8xf32>
    %675 = arith.select %22, %673, %674 : vector<8x8xi1>, vector<8x8xf32>
    %cst_145 = arith.constant dense<0.000000e+00> : vector<8xf32>
    %676 = vector.multi_reduction <add>, %675, %cst_145 [1] : vector<8x8xf32> to vector<8xf32>
    %677 = vector.shape_cast %676 : vector<8xf32> to vector<8x1xf32>
    %cst_146 = arith.constant dense<0.000000e+00> : vector<1x8xf32>
    %678 = tpu.matmul %24, %675, %cst_146 {dimension_numbers = #tpu.dot_dimension_numbers<[1], [0], [0], [1], [0, 0, 1, 1], [], []>} : vector<1x8xf32>, vector<8x8xf32>, vector<1x8xf32> -> vector<1x8xf32>
    %679 = vector.broadcast %677 : vector<8x1xf32> to vector<8x8xf32>
    %680 = vector.broadcast %678 : vector<1x8xf32> to vector<8x8xf32>
    %681 = arith.addf %679, %680 : vector<8x8xf32>
    %cst_147 = arith.constant 2.000000e+00 : f32
    %682 = vector.broadcast %cst_147 : f32 to vector<8x8xf32>
    %683 = arith.mulf %682, %673 : vector<8x8xf32>
    %684 = arith.subf %681, %683 : vector<8x8xf32>
    %cst_148 = arith.constant 0.000000e+00 : f32
    %685 = vector.broadcast %cst_148 : f32 to vector<8x8xf32>
    %686 = arith.maximumf %684, %685 : vector<8x8xf32>
    %cst_149 = arith.constant 9.99999996E-13 : f32
    %687 = vector.broadcast %cst_149 : f32 to vector<8x8xf32>
    %688 = arith.addf %686, %687 : vector<8x8xf32>
    %689 = math.sqrt %688 : vector<8x8xf32>
    %cst_150 = arith.constant 0.000000e+00 : f32
    %690 = vector.broadcast %cst_150 : f32 to vector<8x8xf32>
    %691 = arith.subf %690, %689 : vector<8x8xf32>
    %692 = math.exp %691 : vector<8x8xf32>
    %cst_151 = arith.constant 1.000000e+30 : f32
    %693 = vector.broadcast %cst_151 : f32 to vector<8x8xf32>
    %694 = arith.select %21, %689, %693 : vector<8x8xi1>, vector<8x8xf32>
    %cst_152 = arith.constant 0.000000e+00 : f32
    %695 = vector.broadcast %cst_152 : f32 to vector<8x8xf32>
    %cst_153 = arith.constant dense<0x7F800000> : vector<8xf32>
    %696 = vector.multi_reduction <minimumf>, %694, %cst_153 [1] : vector<8x8xf32> to vector<8xf32>
    %697 = vector.shape_cast %696 : vector<8xf32> to vector<8x1xf32>
    %698 = vector.broadcast %697 : vector<8x1xf32> to vector<8x8xf32>
    %699 = arith.cmpf ole, %694, %698 : vector<8x8xf32>
    %cst_154 = arith.constant 1.000000e+30 : f32
    %700 = vector.broadcast %cst_154 : f32 to vector<8x8xf32>
    %701 = arith.cmpf olt, %694, %700 : vector<8x8xf32>
    %702 = arith.andi %699, %701 : vector<8x8xi1>
    %cst_155 = arith.constant 8.000000e+00 : f32
    %703 = vector.broadcast %cst_155 : f32 to vector<8x8xf32>
    %704 = arith.select %702, %23, %703 : vector<8x8xi1>, vector<8x8xf32>
    %cst_156 = arith.constant dense<0x7F800000> : vector<8xf32>
    %705 = vector.multi_reduction <minimumf>, %704, %cst_156 [1] : vector<8x8xf32> to vector<8xf32>
    %706 = vector.shape_cast %705 : vector<8xf32> to vector<8x1xf32>
    %707 = vector.broadcast %706 : vector<8x1xf32> to vector<8x8xf32>
    %708 = arith.cmpf oeq, %23, %707 : vector<8x8xf32>
    %cst_157 = arith.constant 0.000000e+00 : f32
    %709 = vector.broadcast %cst_157 : f32 to vector<8x8xf32>
    %710 = arith.select %708, %692, %709 : vector<8x8xi1>, vector<8x8xf32>
    %711 = arith.addf %695, %710 : vector<8x8xf32>
    %cst_158 = arith.constant 1.000000e+30 : f32
    %712 = vector.broadcast %cst_158 : f32 to vector<8x8xf32>
    %713 = arith.select %708, %712, %694 : vector<8x8xi1>, vector<8x8xf32>
    %cst_159 = arith.constant dense<0x7F800000> : vector<8xf32>
    %714 = vector.multi_reduction <minimumf>, %713, %cst_159 [1] : vector<8x8xf32> to vector<8xf32>
    %715 = vector.shape_cast %714 : vector<8xf32> to vector<8x1xf32>
    %716 = vector.broadcast %715 : vector<8x1xf32> to vector<8x8xf32>
    %717 = arith.cmpf ole, %713, %716 : vector<8x8xf32>
    %cst_160 = arith.constant 1.000000e+30 : f32
    %718 = vector.broadcast %cst_160 : f32 to vector<8x8xf32>
    %719 = arith.cmpf olt, %713, %718 : vector<8x8xf32>
    %720 = arith.andi %717, %719 : vector<8x8xi1>
    %cst_161 = arith.constant 8.000000e+00 : f32
    %721 = vector.broadcast %cst_161 : f32 to vector<8x8xf32>
    %722 = arith.select %720, %23, %721 : vector<8x8xi1>, vector<8x8xf32>
    %cst_162 = arith.constant dense<0x7F800000> : vector<8xf32>
    %723 = vector.multi_reduction <minimumf>, %722, %cst_162 [1] : vector<8x8xf32> to vector<8xf32>
    %724 = vector.shape_cast %723 : vector<8xf32> to vector<8x1xf32>
    %725 = vector.broadcast %724 : vector<8x1xf32> to vector<8x8xf32>
    %726 = arith.cmpf oeq, %23, %725 : vector<8x8xf32>
    %cst_163 = arith.constant 0.000000e+00 : f32
    %727 = vector.broadcast %cst_163 : f32 to vector<8x8xf32>
    %728 = arith.select %726, %692, %727 : vector<8x8xi1>, vector<8x8xf32>
    %729 = arith.addf %711, %728 : vector<8x8xf32>
    %cst_164 = arith.constant 1.000000e+30 : f32
    %730 = vector.broadcast %cst_164 : f32 to vector<8x8xf32>
    %731 = arith.select %726, %730, %713 : vector<8x8xi1>, vector<8x8xf32>
    %cst_165 = arith.constant dense<0x7F800000> : vector<8xf32>
    %732 = vector.multi_reduction <minimumf>, %731, %cst_165 [1] : vector<8x8xf32> to vector<8xf32>
    %733 = vector.shape_cast %732 : vector<8xf32> to vector<8x1xf32>
    %734 = vector.broadcast %733 : vector<8x1xf32> to vector<8x8xf32>
    %735 = arith.cmpf ole, %731, %734 : vector<8x8xf32>
    %cst_166 = arith.constant 1.000000e+30 : f32
    %736 = vector.broadcast %cst_166 : f32 to vector<8x8xf32>
    %737 = arith.cmpf olt, %731, %736 : vector<8x8xf32>
    %738 = arith.andi %735, %737 : vector<8x8xi1>
    %cst_167 = arith.constant 8.000000e+00 : f32
    %739 = vector.broadcast %cst_167 : f32 to vector<8x8xf32>
    %740 = arith.select %738, %23, %739 : vector<8x8xi1>, vector<8x8xf32>
    %cst_168 = arith.constant dense<0x7F800000> : vector<8xf32>
    %741 = vector.multi_reduction <minimumf>, %740, %cst_168 [1] : vector<8x8xf32> to vector<8xf32>
    %742 = vector.shape_cast %741 : vector<8xf32> to vector<8x1xf32>
    %743 = vector.broadcast %742 : vector<8x1xf32> to vector<8x8xf32>
    %744 = arith.cmpf oeq, %23, %743 : vector<8x8xf32>
    %cst_169 = arith.constant 0.000000e+00 : f32
    %745 = vector.broadcast %cst_169 : f32 to vector<8x8xf32>
    %746 = arith.select %744, %692, %745 : vector<8x8xi1>, vector<8x8xf32>
    %747 = arith.addf %729, %746 : vector<8x8xf32>
    %cst_170 = arith.constant 1.000000e+30 : f32
    %748 = vector.broadcast %cst_170 : f32 to vector<8x8xf32>
    %749 = arith.select %744, %748, %731 : vector<8x8xi1>, vector<8x8xf32>
    %cst_171 = arith.constant dense<0x7F800000> : vector<8xf32>
    %750 = vector.multi_reduction <minimumf>, %749, %cst_171 [1] : vector<8x8xf32> to vector<8xf32>
    %751 = vector.shape_cast %750 : vector<8xf32> to vector<8x1xf32>
    %752 = vector.broadcast %751 : vector<8x1xf32> to vector<8x8xf32>
    %753 = arith.cmpf ole, %749, %752 : vector<8x8xf32>
    %cst_172 = arith.constant 1.000000e+30 : f32
    %754 = vector.broadcast %cst_172 : f32 to vector<8x8xf32>
    %755 = arith.cmpf olt, %749, %754 : vector<8x8xf32>
    %756 = arith.andi %753, %755 : vector<8x8xi1>
    %cst_173 = arith.constant 8.000000e+00 : f32
    %757 = vector.broadcast %cst_173 : f32 to vector<8x8xf32>
    %758 = arith.select %756, %23, %757 : vector<8x8xi1>, vector<8x8xf32>
    %cst_174 = arith.constant dense<0x7F800000> : vector<8xf32>
    %759 = vector.multi_reduction <minimumf>, %758, %cst_174 [1] : vector<8x8xf32> to vector<8xf32>
    %760 = vector.shape_cast %759 : vector<8xf32> to vector<8x1xf32>
    %761 = vector.broadcast %760 : vector<8x1xf32> to vector<8x8xf32>
    %762 = arith.cmpf oeq, %23, %761 : vector<8x8xf32>
    %cst_175 = arith.constant 0.000000e+00 : f32
    %763 = vector.broadcast %cst_175 : f32 to vector<8x8xf32>
    %764 = arith.select %762, %692, %763 : vector<8x8xi1>, vector<8x8xf32>
    %765 = arith.addf %747, %764 : vector<8x8xf32>
    %cst_176 = arith.constant dense<0.000000e+00> : vector<8xf32>
    %766 = vector.multi_reduction <add>, %765, %cst_176 [1] : vector<8x8xf32> to vector<8xf32>
    %767 = vector.shape_cast %766 : vector<8xf32> to vector<8x1xf32>
    %cst_177 = arith.constant 9.99999971E-10 : f32
    %768 = vector.broadcast %cst_177 : f32 to vector<8x1xf32>
    %769 = arith.addf %767, %768 : vector<8x1xf32>
    %770 = vector.broadcast %769 : vector<8x1xf32> to vector<8x8xf32>
    %771 = arith.divf %765, %770 : vector<8x8xf32>
    %772 = arith.truncf %771 : vector<8x8xf32> to vector<8x8xbf16>
    %773 = arith.truncf %259 : vector<8x32xf32> to vector<8x32xbf16>
    %cst_178 = arith.constant dense<0.000000e+00> : vector<8x32xf32>
    %774 = tpu.matmul %772, %773, %cst_178 {dimension_numbers = #tpu.dot_dimension_numbers<[1], [0], [0], [1], [0, 0, 1, 1], [], []>} : vector<8x8xbf16>, vector<8x32xbf16>, vector<8x32xf32> -> vector<8x32xf32>
    %c1_179 = arith.constant 1 : index
    %c0_180 = arith.constant 0 : index
    %c0_181 = arith.constant 0 : index
    %775 = vector.load %arg8[%c1_179, %c0_180, %c0_181] : memref<2x32x32xbf16, #tpu.memory_space<vmem>>, vector<1x32x32xbf16>
    %776 = vector.shape_cast %775 : vector<1x32x32xbf16> to vector<32x32xbf16>
    %cst_182 = arith.constant dense<0.000000e+00> : vector<8x32xf32>
    %777 = tpu.matmul %773, %776, %cst_182 {dimension_numbers = #tpu.dot_dimension_numbers<[1], [0], [0], [1], [0, 0, 1, 1], [], []>} : vector<8x32xbf16>, vector<32x32xbf16>, vector<8x32xf32> -> vector<8x32xf32>
    %778 = arith.truncf %774 : vector<8x32xf32> to vector<8x32xbf16>
    %c1_183 = arith.constant 1 : index
    %c0_184 = arith.constant 0 : index
    %c0_185 = arith.constant 0 : index
    %779 = vector.load %arg9[%c1_183, %c0_184, %c0_185] : memref<2x32x32xbf16, #tpu.memory_space<vmem>>, vector<1x32x32xbf16>
    %780 = vector.shape_cast %779 : vector<1x32x32xbf16> to vector<32x32xbf16>
    %cst_186 = arith.constant dense<0.000000e+00> : vector<8x32xf32>
    %781 = tpu.matmul %778, %780, %cst_186 {dimension_numbers = #tpu.dot_dimension_numbers<[1], [0], [0], [1], [0, 0, 1, 1], [], []>} : vector<8x32xbf16>, vector<32x32xbf16>, vector<8x32xf32> -> vector<8x32xf32>
    %782 = arith.addf %777, %781 : vector<8x32xf32>
    %c1_187 = arith.constant 1 : index
    %c0_188 = arith.constant 0 : index
    %c0_189 = arith.constant 0 : index
    %783 = vector.load %arg10[%c1_187, %c0_188, %c0_189] : memref<2x1x32xf32, #tpu.memory_space<vmem>>, vector<1x1x32xf32>
    %784 = vector.shape_cast %783 : vector<1x1x32xf32> to vector<1x32xf32>
    %785 = vector.broadcast %784 : vector<1x32xf32> to vector<8x32xf32>
    %786 = arith.addf %782, %785 : vector<8x32xf32>
    %787 = math.tanh %786 : vector<8x32xf32>
    %788 = arith.addf %259, %787 : vector<8x32xf32>
    %789 = arith.truncf %788 : vector<8x32xf32> to vector<8x32xbf16>
    %c1_190 = arith.constant 1 : index
    %c0_191 = arith.constant 0 : index
    %c0_192 = arith.constant 0 : index
    %790 = vector.load %arg11[%c1_190, %c0_191, %c0_192] : memref<2x32x32xbf16, #tpu.memory_space<vmem>>, vector<1x32x32xbf16>
    %791 = vector.shape_cast %790 : vector<1x32x32xbf16> to vector<32x32xbf16>
    %cst_193 = arith.constant dense<0.000000e+00> : vector<8x32xf32>
    %792 = tpu.matmul %789, %791, %cst_193 {dimension_numbers = #tpu.dot_dimension_numbers<[1], [0], [0], [1], [0, 0, 1, 1], [], []>} : vector<8x32xbf16>, vector<32x32xbf16>, vector<8x32xf32> -> vector<8x32xf32>
    %c1_194 = arith.constant 1 : index
    %c0_195 = arith.constant 0 : index
    %c0_196 = arith.constant 0 : index
    %793 = vector.load %arg12[%c1_194, %c0_195, %c0_196] : memref<2x1x32xf32, #tpu.memory_space<vmem>>, vector<1x1x32xf32>
    %794 = vector.shape_cast %793 : vector<1x1x32xf32> to vector<1x32xf32>
    %795 = vector.broadcast %794 : vector<1x32xf32> to vector<8x32xf32>
    %796 = arith.addf %792, %795 : vector<8x32xf32>
    %797 = arith.negf %796 : vector<8x32xf32>
    %798 = math.exp %797 : vector<8x32xf32>
    %cst_197 = arith.constant 1.000000e+00 : f32
    %799 = vector.broadcast %cst_197 : f32 to vector<8x32xf32>
    %800 = arith.addf %799, %798 : vector<8x32xf32>
    %801 = arith.divf %799, %800 : vector<8x32xf32>
    %802 = arith.mulf %796, %801 : vector<8x32xf32>
    %803 = arith.truncf %802 : vector<8x32xf32> to vector<8x32xbf16>
    %c1_198 = arith.constant 1 : index
    %c0_199 = arith.constant 0 : index
    %c0_200 = arith.constant 0 : index
    %804 = vector.load %arg13[%c1_198, %c0_199, %c0_200] : memref<2x32x9xbf16, #tpu.memory_space<vmem>>, vector<1x32x9xbf16>
    %805 = vector.shape_cast %804 : vector<1x32x9xbf16> to vector<32x9xbf16>
    %cst_201 = arith.constant dense<0.000000e+00> : vector<8x9xf32>
    %806 = tpu.matmul %803, %805, %cst_201 {dimension_numbers = #tpu.dot_dimension_numbers<[1], [0], [0], [1], [0, 0, 1, 1], [], []>} : vector<8x32xbf16>, vector<32x9xbf16>, vector<8x9xf32> -> vector<8x9xf32>
    %cst_202 = arith.constant dense<0.000000e+00> : vector<1x9xf32>
    %807 = tpu.matmul %34, %806, %cst_202 {dimension_numbers = #tpu.dot_dimension_numbers<[1], [0], [0], [1], [0, 0, 1, 1], [], []>} : vector<1x8xf32>, vector<8x9xf32>, vector<1x9xf32> -> vector<1x9xf32>
    %808 = math.tanh %807 : vector<1x9xf32>
    %cst_203 = arith.constant 1.000000e-01 : f32
    %809 = vector.broadcast %cst_203 : f32 to vector<1x9xf32>
    %810 = arith.mulf %809, %808 : vector<1x9xf32>
    %811 = arith.addf %46, %810 : vector<1x9xf32>
    %cst_204 = arith.constant 0.000000e+00 : f32
    %812 = vector.broadcast %cst_204 : f32 to vector<1x9xf32>
    %813 = vector.extract_strided_slice %811 {offsets = [0, 0], sizes = [1, 1], strides = [1, 1]} : vector<1x9xf32> to vector<1x1xf32>
    %814 = vector.extract_strided_slice %445 {offsets = [0, 0], sizes = [1, 1], strides = [1, 1]} : vector<1x9xf32> to vector<1x1xf32>
    %815 = arith.mulf %813, %814 : vector<1x1xf32>
    %816 = vector.extract_strided_slice %811 {offsets = [0, 1], sizes = [1, 1], strides = [1, 1]} : vector<1x9xf32> to vector<1x1xf32>
    %817 = vector.extract_strided_slice %445 {offsets = [0, 3], sizes = [1, 1], strides = [1, 1]} : vector<1x9xf32> to vector<1x1xf32>
    %818 = arith.mulf %816, %817 : vector<1x1xf32>
    %819 = arith.addf %815, %818 : vector<1x1xf32>
    %820 = vector.extract_strided_slice %811 {offsets = [0, 2], sizes = [1, 1], strides = [1, 1]} : vector<1x9xf32> to vector<1x1xf32>
    %821 = vector.extract_strided_slice %445 {offsets = [0, 6], sizes = [1, 1], strides = [1, 1]} : vector<1x9xf32> to vector<1x1xf32>
    %822 = arith.mulf %820, %821 : vector<1x1xf32>
    %823 = arith.addf %819, %822 : vector<1x1xf32>
    %c0_i32_205 = arith.constant 0 : i32
    %824 = vector.broadcast %c0_i32_205 : i32 to vector<1x9xi32>
    %825 = arith.cmpi eq, %35, %824 : vector<1x9xi32>
    %cst_206 = arith.constant 0.000000e+00 : f32
    %826 = vector.shape_cast %823 : vector<1x1xf32> to vector<1x1xf32>
    %827 = vector.broadcast %826 : vector<1x1xf32> to vector<1x9xf32>
    %828 = vector.broadcast %cst_206 : f32 to vector<1x9xf32>
    %829 = arith.select %825, %827, %828 : vector<1x9xi1>, vector<1x9xf32>
    %830 = arith.addf %812, %829 : vector<1x9xf32>
    %831 = vector.extract_strided_slice %811 {offsets = [0, 0], sizes = [1, 1], strides = [1, 1]} : vector<1x9xf32> to vector<1x1xf32>
    %832 = vector.extract_strided_slice %445 {offsets = [0, 1], sizes = [1, 1], strides = [1, 1]} : vector<1x9xf32> to vector<1x1xf32>
    %833 = arith.mulf %831, %832 : vector<1x1xf32>
    %834 = vector.extract_strided_slice %811 {offsets = [0, 1], sizes = [1, 1], strides = [1, 1]} : vector<1x9xf32> to vector<1x1xf32>
    %835 = vector.extract_strided_slice %445 {offsets = [0, 4], sizes = [1, 1], strides = [1, 1]} : vector<1x9xf32> to vector<1x1xf32>
    %836 = arith.mulf %834, %835 : vector<1x1xf32>
    %837 = arith.addf %833, %836 : vector<1x1xf32>
    %838 = vector.extract_strided_slice %811 {offsets = [0, 2], sizes = [1, 1], strides = [1, 1]} : vector<1x9xf32> to vector<1x1xf32>
    %839 = vector.extract_strided_slice %445 {offsets = [0, 7], sizes = [1, 1], strides = [1, 1]} : vector<1x9xf32> to vector<1x1xf32>
    %840 = arith.mulf %838, %839 : vector<1x1xf32>
    %841 = arith.addf %837, %840 : vector<1x1xf32>
    %c1_i32_207 = arith.constant 1 : i32
    %842 = vector.broadcast %c1_i32_207 : i32 to vector<1x9xi32>
    %843 = arith.cmpi eq, %35, %842 : vector<1x9xi32>
    %cst_208 = arith.constant 0.000000e+00 : f32
    %844 = vector.shape_cast %841 : vector<1x1xf32> to vector<1x1xf32>
    %845 = vector.broadcast %844 : vector<1x1xf32> to vector<1x9xf32>
    %846 = vector.broadcast %cst_208 : f32 to vector<1x9xf32>
    %847 = arith.select %843, %845, %846 : vector<1x9xi1>, vector<1x9xf32>
    %848 = arith.addf %830, %847 : vector<1x9xf32>
    %849 = vector.extract_strided_slice %811 {offsets = [0, 0], sizes = [1, 1], strides = [1, 1]} : vector<1x9xf32> to vector<1x1xf32>
    %850 = vector.extract_strided_slice %445 {offsets = [0, 2], sizes = [1, 1], strides = [1, 1]} : vector<1x9xf32> to vector<1x1xf32>
    %851 = arith.mulf %849, %850 : vector<1x1xf32>
    %852 = vector.extract_strided_slice %811 {offsets = [0, 1], sizes = [1, 1], strides = [1, 1]} : vector<1x9xf32> to vector<1x1xf32>
    %853 = vector.extract_strided_slice %445 {offsets = [0, 5], sizes = [1, 1], strides = [1, 1]} : vector<1x9xf32> to vector<1x1xf32>
    %854 = arith.mulf %852, %853 : vector<1x1xf32>
    %855 = arith.addf %851, %854 : vector<1x1xf32>
    %856 = vector.extract_strided_slice %811 {offsets = [0, 2], sizes = [1, 1], strides = [1, 1]} : vector<1x9xf32> to vector<1x1xf32>
    %857 = vector.extract_strided_slice %445 {offsets = [0, 8], sizes = [1, 1], strides = [1, 1]} : vector<1x9xf32> to vector<1x1xf32>
    %858 = arith.mulf %856, %857 : vector<1x1xf32>
    %859 = arith.addf %855, %858 : vector<1x1xf32>
    %c2_i32_209 = arith.constant 2 : i32
    %860 = vector.broadcast %c2_i32_209 : i32 to vector<1x9xi32>
    %861 = arith.cmpi eq, %35, %860 : vector<1x9xi32>
    %cst_210 = arith.constant 0.000000e+00 : f32
    %862 = vector.shape_cast %859 : vector<1x1xf32> to vector<1x1xf32>
    %863 = vector.broadcast %862 : vector<1x1xf32> to vector<1x9xf32>
    %864 = vector.broadcast %cst_210 : f32 to vector<1x9xf32>
    %865 = arith.select %861, %863, %864 : vector<1x9xi1>, vector<1x9xf32>
    %866 = arith.addf %848, %865 : vector<1x9xf32>
    %867 = vector.extract_strided_slice %811 {offsets = [0, 3], sizes = [1, 1], strides = [1, 1]} : vector<1x9xf32> to vector<1x1xf32>
    %868 = vector.extract_strided_slice %445 {offsets = [0, 0], sizes = [1, 1], strides = [1, 1]} : vector<1x9xf32> to vector<1x1xf32>
    %869 = arith.mulf %867, %868 : vector<1x1xf32>
    %870 = vector.extract_strided_slice %811 {offsets = [0, 4], sizes = [1, 1], strides = [1, 1]} : vector<1x9xf32> to vector<1x1xf32>
    %871 = vector.extract_strided_slice %445 {offsets = [0, 3], sizes = [1, 1], strides = [1, 1]} : vector<1x9xf32> to vector<1x1xf32>
    %872 = arith.mulf %870, %871 : vector<1x1xf32>
    %873 = arith.addf %869, %872 : vector<1x1xf32>
    %874 = vector.extract_strided_slice %811 {offsets = [0, 5], sizes = [1, 1], strides = [1, 1]} : vector<1x9xf32> to vector<1x1xf32>
    %875 = vector.extract_strided_slice %445 {offsets = [0, 6], sizes = [1, 1], strides = [1, 1]} : vector<1x9xf32> to vector<1x1xf32>
    %876 = arith.mulf %874, %875 : vector<1x1xf32>
    %877 = arith.addf %873, %876 : vector<1x1xf32>
    %c3_i32_211 = arith.constant 3 : i32
    %878 = vector.broadcast %c3_i32_211 : i32 to vector<1x9xi32>
    %879 = arith.cmpi eq, %35, %878 : vector<1x9xi32>
    %cst_212 = arith.constant 0.000000e+00 : f32
    %880 = vector.shape_cast %877 : vector<1x1xf32> to vector<1x1xf32>
    %881 = vector.broadcast %880 : vector<1x1xf32> to vector<1x9xf32>
    %882 = vector.broadcast %cst_212 : f32 to vector<1x9xf32>
    %883 = arith.select %879, %881, %882 : vector<1x9xi1>, vector<1x9xf32>
    %884 = arith.addf %866, %883 : vector<1x9xf32>
    %885 = vector.extract_strided_slice %811 {offsets = [0, 3], sizes = [1, 1], strides = [1, 1]} : vector<1x9xf32> to vector<1x1xf32>
    %886 = vector.extract_strided_slice %445 {offsets = [0, 1], sizes = [1, 1], strides = [1, 1]} : vector<1x9xf32> to vector<1x1xf32>
    %887 = arith.mulf %885, %886 : vector<1x1xf32>
    %888 = vector.extract_strided_slice %811 {offsets = [0, 4], sizes = [1, 1], strides = [1, 1]} : vector<1x9xf32> to vector<1x1xf32>
    %889 = vector.extract_strided_slice %445 {offsets = [0, 4], sizes = [1, 1], strides = [1, 1]} : vector<1x9xf32> to vector<1x1xf32>
    %890 = arith.mulf %888, %889 : vector<1x1xf32>
    %891 = arith.addf %887, %890 : vector<1x1xf32>
    %892 = vector.extract_strided_slice %811 {offsets = [0, 5], sizes = [1, 1], strides = [1, 1]} : vector<1x9xf32> to vector<1x1xf32>
    %893 = vector.extract_strided_slice %445 {offsets = [0, 7], sizes = [1, 1], strides = [1, 1]} : vector<1x9xf32> to vector<1x1xf32>
    %894 = arith.mulf %892, %893 : vector<1x1xf32>
    %895 = arith.addf %891, %894 : vector<1x1xf32>
    %c4_i32_213 = arith.constant 4 : i32
    %896 = vector.broadcast %c4_i32_213 : i32 to vector<1x9xi32>
    %897 = arith.cmpi eq, %35, %896 : vector<1x9xi32>
    %cst_214 = arith.constant 0.000000e+00 : f32
    %898 = vector.shape_cast %895 : vector<1x1xf32> to vector<1x1xf32>
    %899 = vector.broadcast %898 : vector<1x1xf32> to vector<1x9xf32>
    %900 = vector.broadcast %cst_214 : f32 to vector<1x9xf32>
    %901 = arith.select %897, %899, %900 : vector<1x9xi1>, vector<1x9xf32>
    %902 = arith.addf %884, %901 : vector<1x9xf32>
    %903 = vector.extract_strided_slice %811 {offsets = [0, 3], sizes = [1, 1], strides = [1, 1]} : vector<1x9xf32> to vector<1x1xf32>
    %904 = vector.extract_strided_slice %445 {offsets = [0, 2], sizes = [1, 1], strides = [1, 1]} : vector<1x9xf32> to vector<1x1xf32>
    %905 = arith.mulf %903, %904 : vector<1x1xf32>
    %906 = vector.extract_strided_slice %811 {offsets = [0, 4], sizes = [1, 1], strides = [1, 1]} : vector<1x9xf32> to vector<1x1xf32>
    %907 = vector.extract_strided_slice %445 {offsets = [0, 5], sizes = [1, 1], strides = [1, 1]} : vector<1x9xf32> to vector<1x1xf32>
    %908 = arith.mulf %906, %907 : vector<1x1xf32>
    %909 = arith.addf %905, %908 : vector<1x1xf32>
    %910 = vector.extract_strided_slice %811 {offsets = [0, 5], sizes = [1, 1], strides = [1, 1]} : vector<1x9xf32> to vector<1x1xf32>
    %911 = vector.extract_strided_slice %445 {offsets = [0, 8], sizes = [1, 1], strides = [1, 1]} : vector<1x9xf32> to vector<1x1xf32>
    %912 = arith.mulf %910, %911 : vector<1x1xf32>
    %913 = arith.addf %909, %912 : vector<1x1xf32>
    %c5_i32_215 = arith.constant 5 : i32
    %914 = vector.broadcast %c5_i32_215 : i32 to vector<1x9xi32>
    %915 = arith.cmpi eq, %35, %914 : vector<1x9xi32>
    %cst_216 = arith.constant 0.000000e+00 : f32
    %916 = vector.shape_cast %913 : vector<1x1xf32> to vector<1x1xf32>
    %917 = vector.broadcast %916 : vector<1x1xf32> to vector<1x9xf32>
    %918 = vector.broadcast %cst_216 : f32 to vector<1x9xf32>
    %919 = arith.select %915, %917, %918 : vector<1x9xi1>, vector<1x9xf32>
    %920 = arith.addf %902, %919 : vector<1x9xf32>
    %921 = vector.extract_strided_slice %811 {offsets = [0, 6], sizes = [1, 1], strides = [1, 1]} : vector<1x9xf32> to vector<1x1xf32>
    %922 = vector.extract_strided_slice %445 {offsets = [0, 0], sizes = [1, 1], strides = [1, 1]} : vector<1x9xf32> to vector<1x1xf32>
    %923 = arith.mulf %921, %922 : vector<1x1xf32>
    %924 = vector.extract_strided_slice %811 {offsets = [0, 7], sizes = [1, 1], strides = [1, 1]} : vector<1x9xf32> to vector<1x1xf32>
    %925 = vector.extract_strided_slice %445 {offsets = [0, 3], sizes = [1, 1], strides = [1, 1]} : vector<1x9xf32> to vector<1x1xf32>
    %926 = arith.mulf %924, %925 : vector<1x1xf32>
    %927 = arith.addf %923, %926 : vector<1x1xf32>
    %928 = vector.extract_strided_slice %811 {offsets = [0, 8], sizes = [1, 1], strides = [1, 1]} : vector<1x9xf32> to vector<1x1xf32>
    %929 = vector.extract_strided_slice %445 {offsets = [0, 6], sizes = [1, 1], strides = [1, 1]} : vector<1x9xf32> to vector<1x1xf32>
    %930 = arith.mulf %928, %929 : vector<1x1xf32>
    %931 = arith.addf %927, %930 : vector<1x1xf32>
    %c6_i32_217 = arith.constant 6 : i32
    %932 = vector.broadcast %c6_i32_217 : i32 to vector<1x9xi32>
    %933 = arith.cmpi eq, %35, %932 : vector<1x9xi32>
    %cst_218 = arith.constant 0.000000e+00 : f32
    %934 = vector.shape_cast %931 : vector<1x1xf32> to vector<1x1xf32>
    %935 = vector.broadcast %934 : vector<1x1xf32> to vector<1x9xf32>
    %936 = vector.broadcast %cst_218 : f32 to vector<1x9xf32>
    %937 = arith.select %933, %935, %936 : vector<1x9xi1>, vector<1x9xf32>
    %938 = arith.addf %920, %937 : vector<1x9xf32>
    %939 = vector.extract_strided_slice %811 {offsets = [0, 6], sizes = [1, 1], strides = [1, 1]} : vector<1x9xf32> to vector<1x1xf32>
    %940 = vector.extract_strided_slice %445 {offsets = [0, 1], sizes = [1, 1], strides = [1, 1]} : vector<1x9xf32> to vector<1x1xf32>
    %941 = arith.mulf %939, %940 : vector<1x1xf32>
    %942 = vector.extract_strided_slice %811 {offsets = [0, 7], sizes = [1, 1], strides = [1, 1]} : vector<1x9xf32> to vector<1x1xf32>
    %943 = vector.extract_strided_slice %445 {offsets = [0, 4], sizes = [1, 1], strides = [1, 1]} : vector<1x9xf32> to vector<1x1xf32>
    %944 = arith.mulf %942, %943 : vector<1x1xf32>
    %945 = arith.addf %941, %944 : vector<1x1xf32>
    %946 = vector.extract_strided_slice %811 {offsets = [0, 8], sizes = [1, 1], strides = [1, 1]} : vector<1x9xf32> to vector<1x1xf32>
    %947 = vector.extract_strided_slice %445 {offsets = [0, 7], sizes = [1, 1], strides = [1, 1]} : vector<1x9xf32> to vector<1x1xf32>
    %948 = arith.mulf %946, %947 : vector<1x1xf32>
    %949 = arith.addf %945, %948 : vector<1x1xf32>
    %c7_i32_219 = arith.constant 7 : i32
    %950 = vector.broadcast %c7_i32_219 : i32 to vector<1x9xi32>
    %951 = arith.cmpi eq, %35, %950 : vector<1x9xi32>
    %cst_220 = arith.constant 0.000000e+00 : f32
    %952 = vector.shape_cast %949 : vector<1x1xf32> to vector<1x1xf32>
    %953 = vector.broadcast %952 : vector<1x1xf32> to vector<1x9xf32>
    %954 = vector.broadcast %cst_220 : f32 to vector<1x9xf32>
    %955 = arith.select %951, %953, %954 : vector<1x9xi1>, vector<1x9xf32>
    %956 = arith.addf %938, %955 : vector<1x9xf32>
    %957 = vector.extract_strided_slice %811 {offsets = [0, 6], sizes = [1, 1], strides = [1, 1]} : vector<1x9xf32> to vector<1x1xf32>
    %958 = vector.extract_strided_slice %445 {offsets = [0, 2], sizes = [1, 1], strides = [1, 1]} : vector<1x9xf32> to vector<1x1xf32>
    %959 = arith.mulf %957, %958 : vector<1x1xf32>
    %960 = vector.extract_strided_slice %811 {offsets = [0, 7], sizes = [1, 1], strides = [1, 1]} : vector<1x9xf32> to vector<1x1xf32>
    %961 = vector.extract_strided_slice %445 {offsets = [0, 5], sizes = [1, 1], strides = [1, 1]} : vector<1x9xf32> to vector<1x1xf32>
    %962 = arith.mulf %960, %961 : vector<1x1xf32>
    %963 = arith.addf %959, %962 : vector<1x1xf32>
    %964 = vector.extract_strided_slice %811 {offsets = [0, 8], sizes = [1, 1], strides = [1, 1]} : vector<1x9xf32> to vector<1x1xf32>
    %965 = vector.extract_strided_slice %445 {offsets = [0, 8], sizes = [1, 1], strides = [1, 1]} : vector<1x9xf32> to vector<1x1xf32>
    %966 = arith.mulf %964, %965 : vector<1x1xf32>
    %967 = arith.addf %963, %966 : vector<1x1xf32>
    %c8_i32_221 = arith.constant 8 : i32
    %968 = vector.broadcast %c8_i32_221 : i32 to vector<1x9xi32>
    %969 = arith.cmpi eq, %35, %968 : vector<1x9xi32>
    %cst_222 = arith.constant 0.000000e+00 : f32
    %970 = vector.shape_cast %967 : vector<1x1xf32> to vector<1x1xf32>
    %971 = vector.broadcast %970 : vector<1x1xf32> to vector<1x9xf32>
    %972 = vector.broadcast %cst_222 : f32 to vector<1x9xf32>
    %973 = arith.select %969, %971, %972 : vector<1x9xi1>, vector<1x9xf32>
    %974 = arith.addf %956, %973 : vector<1x9xf32>
    %cst_223 = arith.constant 0.000000e+00 : f32
    %975 = vector.broadcast %cst_223 : f32 to vector<1x9xf32>
    %976 = vector.extract_strided_slice %974 {offsets = [0, 0], sizes = [1, 1], strides = [1, 1]} : vector<1x9xf32> to vector<1x1xf32>
    %977 = vector.extract_strided_slice %46 {offsets = [0, 0], sizes = [1, 1], strides = [1, 1]} : vector<1x9xf32> to vector<1x1xf32>
    %978 = arith.mulf %976, %977 : vector<1x1xf32>
    %979 = vector.extract_strided_slice %974 {offsets = [0, 1], sizes = [1, 1], strides = [1, 1]} : vector<1x9xf32> to vector<1x1xf32>
    %980 = vector.extract_strided_slice %46 {offsets = [0, 3], sizes = [1, 1], strides = [1, 1]} : vector<1x9xf32> to vector<1x1xf32>
    %981 = arith.mulf %979, %980 : vector<1x1xf32>
    %982 = arith.addf %978, %981 : vector<1x1xf32>
    %983 = vector.extract_strided_slice %974 {offsets = [0, 2], sizes = [1, 1], strides = [1, 1]} : vector<1x9xf32> to vector<1x1xf32>
    %984 = vector.extract_strided_slice %46 {offsets = [0, 6], sizes = [1, 1], strides = [1, 1]} : vector<1x9xf32> to vector<1x1xf32>
    %985 = arith.mulf %983, %984 : vector<1x1xf32>
    %986 = arith.addf %982, %985 : vector<1x1xf32>
    %c0_i32_224 = arith.constant 0 : i32
    %987 = vector.broadcast %c0_i32_224 : i32 to vector<1x9xi32>
    %988 = arith.cmpi eq, %35, %987 : vector<1x9xi32>
    %cst_225 = arith.constant 0.000000e+00 : f32
    %989 = vector.shape_cast %986 : vector<1x1xf32> to vector<1x1xf32>
    %990 = vector.broadcast %989 : vector<1x1xf32> to vector<1x9xf32>
    %991 = vector.broadcast %cst_225 : f32 to vector<1x9xf32>
    %992 = arith.select %988, %990, %991 : vector<1x9xi1>, vector<1x9xf32>
    %993 = arith.addf %975, %992 : vector<1x9xf32>
    %994 = vector.extract_strided_slice %974 {offsets = [0, 0], sizes = [1, 1], strides = [1, 1]} : vector<1x9xf32> to vector<1x1xf32>
    %995 = vector.extract_strided_slice %46 {offsets = [0, 1], sizes = [1, 1], strides = [1, 1]} : vector<1x9xf32> to vector<1x1xf32>
    %996 = arith.mulf %994, %995 : vector<1x1xf32>
    %997 = vector.extract_strided_slice %974 {offsets = [0, 1], sizes = [1, 1], strides = [1, 1]} : vector<1x9xf32> to vector<1x1xf32>
    %998 = vector.extract_strided_slice %46 {offsets = [0, 4], sizes = [1, 1], strides = [1, 1]} : vector<1x9xf32> to vector<1x1xf32>
    %999 = arith.mulf %997, %998 : vector<1x1xf32>
    %1000 = arith.addf %996, %999 : vector<1x1xf32>
    %1001 = vector.extract_strided_slice %974 {offsets = [0, 2], sizes = [1, 1], strides = [1, 1]} : vector<1x9xf32> to vector<1x1xf32>
    %1002 = vector.extract_strided_slice %46 {offsets = [0, 7], sizes = [1, 1], strides = [1, 1]} : vector<1x9xf32> to vector<1x1xf32>
    %1003 = arith.mulf %1001, %1002 : vector<1x1xf32>
    %1004 = arith.addf %1000, %1003 : vector<1x1xf32>
    %c1_i32_226 = arith.constant 1 : i32
    %1005 = vector.broadcast %c1_i32_226 : i32 to vector<1x9xi32>
    %1006 = arith.cmpi eq, %35, %1005 : vector<1x9xi32>
    %cst_227 = arith.constant 0.000000e+00 : f32
    %1007 = vector.shape_cast %1004 : vector<1x1xf32> to vector<1x1xf32>
    %1008 = vector.broadcast %1007 : vector<1x1xf32> to vector<1x9xf32>
    %1009 = vector.broadcast %cst_227 : f32 to vector<1x9xf32>
    %1010 = arith.select %1006, %1008, %1009 : vector<1x9xi1>, vector<1x9xf32>
    %1011 = arith.addf %993, %1010 : vector<1x9xf32>
    %1012 = vector.extract_strided_slice %974 {offsets = [0, 0], sizes = [1, 1], strides = [1, 1]} : vector<1x9xf32> to vector<1x1xf32>
    %1013 = vector.extract_strided_slice %46 {offsets = [0, 2], sizes = [1, 1], strides = [1, 1]} : vector<1x9xf32> to vector<1x1xf32>
    %1014 = arith.mulf %1012, %1013 : vector<1x1xf32>
    %1015 = vector.extract_strided_slice %974 {offsets = [0, 1], sizes = [1, 1], strides = [1, 1]} : vector<1x9xf32> to vector<1x1xf32>
    %1016 = vector.extract_strided_slice %46 {offsets = [0, 5], sizes = [1, 1], strides = [1, 1]} : vector<1x9xf32> to vector<1x1xf32>
    %1017 = arith.mulf %1015, %1016 : vector<1x1xf32>
    %1018 = arith.addf %1014, %1017 : vector<1x1xf32>
    %1019 = vector.extract_strided_slice %974 {offsets = [0, 2], sizes = [1, 1], strides = [1, 1]} : vector<1x9xf32> to vector<1x1xf32>
    %1020 = vector.extract_strided_slice %46 {offsets = [0, 8], sizes = [1, 1], strides = [1, 1]} : vector<1x9xf32> to vector<1x1xf32>
    %1021 = arith.mulf %1019, %1020 : vector<1x1xf32>
    %1022 = arith.addf %1018, %1021 : vector<1x1xf32>
    %c2_i32_228 = arith.constant 2 : i32
    %1023 = vector.broadcast %c2_i32_228 : i32 to vector<1x9xi32>
    %1024 = arith.cmpi eq, %35, %1023 : vector<1x9xi32>
    %cst_229 = arith.constant 0.000000e+00 : f32
    %1025 = vector.shape_cast %1022 : vector<1x1xf32> to vector<1x1xf32>
    %1026 = vector.broadcast %1025 : vector<1x1xf32> to vector<1x9xf32>
    %1027 = vector.broadcast %cst_229 : f32 to vector<1x9xf32>
    %1028 = arith.select %1024, %1026, %1027 : vector<1x9xi1>, vector<1x9xf32>
    %1029 = arith.addf %1011, %1028 : vector<1x9xf32>
    %1030 = vector.extract_strided_slice %974 {offsets = [0, 3], sizes = [1, 1], strides = [1, 1]} : vector<1x9xf32> to vector<1x1xf32>
    %1031 = vector.extract_strided_slice %46 {offsets = [0, 0], sizes = [1, 1], strides = [1, 1]} : vector<1x9xf32> to vector<1x1xf32>
    %1032 = arith.mulf %1030, %1031 : vector<1x1xf32>
    %1033 = vector.extract_strided_slice %974 {offsets = [0, 4], sizes = [1, 1], strides = [1, 1]} : vector<1x9xf32> to vector<1x1xf32>
    %1034 = vector.extract_strided_slice %46 {offsets = [0, 3], sizes = [1, 1], strides = [1, 1]} : vector<1x9xf32> to vector<1x1xf32>
    %1035 = arith.mulf %1033, %1034 : vector<1x1xf32>
    %1036 = arith.addf %1032, %1035 : vector<1x1xf32>
    %1037 = vector.extract_strided_slice %974 {offsets = [0, 5], sizes = [1, 1], strides = [1, 1]} : vector<1x9xf32> to vector<1x1xf32>
    %1038 = vector.extract_strided_slice %46 {offsets = [0, 6], sizes = [1, 1], strides = [1, 1]} : vector<1x9xf32> to vector<1x1xf32>
    %1039 = arith.mulf %1037, %1038 : vector<1x1xf32>
    %1040 = arith.addf %1036, %1039 : vector<1x1xf32>
    %c3_i32_230 = arith.constant 3 : i32
    %1041 = vector.broadcast %c3_i32_230 : i32 to vector<1x9xi32>
    %1042 = arith.cmpi eq, %35, %1041 : vector<1x9xi32>
    %cst_231 = arith.constant 0.000000e+00 : f32
    %1043 = vector.shape_cast %1040 : vector<1x1xf32> to vector<1x1xf32>
    %1044 = vector.broadcast %1043 : vector<1x1xf32> to vector<1x9xf32>
    %1045 = vector.broadcast %cst_231 : f32 to vector<1x9xf32>
    %1046 = arith.select %1042, %1044, %1045 : vector<1x9xi1>, vector<1x9xf32>
    %1047 = arith.addf %1029, %1046 : vector<1x9xf32>
    %1048 = vector.extract_strided_slice %974 {offsets = [0, 3], sizes = [1, 1], strides = [1, 1]} : vector<1x9xf32> to vector<1x1xf32>
    %1049 = vector.extract_strided_slice %46 {offsets = [0, 1], sizes = [1, 1], strides = [1, 1]} : vector<1x9xf32> to vector<1x1xf32>
    %1050 = arith.mulf %1048, %1049 : vector<1x1xf32>
    %1051 = vector.extract_strided_slice %974 {offsets = [0, 4], sizes = [1, 1], strides = [1, 1]} : vector<1x9xf32> to vector<1x1xf32>
    %1052 = vector.extract_strided_slice %46 {offsets = [0, 4], sizes = [1, 1], strides = [1, 1]} : vector<1x9xf32> to vector<1x1xf32>
    %1053 = arith.mulf %1051, %1052 : vector<1x1xf32>
    %1054 = arith.addf %1050, %1053 : vector<1x1xf32>
    %1055 = vector.extract_strided_slice %974 {offsets = [0, 5], sizes = [1, 1], strides = [1, 1]} : vector<1x9xf32> to vector<1x1xf32>
    %1056 = vector.extract_strided_slice %46 {offsets = [0, 7], sizes = [1, 1], strides = [1, 1]} : vector<1x9xf32> to vector<1x1xf32>
    %1057 = arith.mulf %1055, %1056 : vector<1x1xf32>
    %1058 = arith.addf %1054, %1057 : vector<1x1xf32>
    %c4_i32_232 = arith.constant 4 : i32
    %1059 = vector.broadcast %c4_i32_232 : i32 to vector<1x9xi32>
    %1060 = arith.cmpi eq, %35, %1059 : vector<1x9xi32>
    %cst_233 = arith.constant 0.000000e+00 : f32
    %1061 = vector.shape_cast %1058 : vector<1x1xf32> to vector<1x1xf32>
    %1062 = vector.broadcast %1061 : vector<1x1xf32> to vector<1x9xf32>
    %1063 = vector.broadcast %cst_233 : f32 to vector<1x9xf32>
    %1064 = arith.select %1060, %1062, %1063 : vector<1x9xi1>, vector<1x9xf32>
    %1065 = arith.addf %1047, %1064 : vector<1x9xf32>
    %1066 = vector.extract_strided_slice %974 {offsets = [0, 3], sizes = [1, 1], strides = [1, 1]} : vector<1x9xf32> to vector<1x1xf32>
    %1067 = vector.extract_strided_slice %46 {offsets = [0, 2], sizes = [1, 1], strides = [1, 1]} : vector<1x9xf32> to vector<1x1xf32>
    %1068 = arith.mulf %1066, %1067 : vector<1x1xf32>
    %1069 = vector.extract_strided_slice %974 {offsets = [0, 4], sizes = [1, 1], strides = [1, 1]} : vector<1x9xf32> to vector<1x1xf32>
    %1070 = vector.extract_strided_slice %46 {offsets = [0, 5], sizes = [1, 1], strides = [1, 1]} : vector<1x9xf32> to vector<1x1xf32>
    %1071 = arith.mulf %1069, %1070 : vector<1x1xf32>
    %1072 = arith.addf %1068, %1071 : vector<1x1xf32>
    %1073 = vector.extract_strided_slice %974 {offsets = [0, 5], sizes = [1, 1], strides = [1, 1]} : vector<1x9xf32> to vector<1x1xf32>
    %1074 = vector.extract_strided_slice %46 {offsets = [0, 8], sizes = [1, 1], strides = [1, 1]} : vector<1x9xf32> to vector<1x1xf32>
    %1075 = arith.mulf %1073, %1074 : vector<1x1xf32>
    %1076 = arith.addf %1072, %1075 : vector<1x1xf32>
    %c5_i32_234 = arith.constant 5 : i32
    %1077 = vector.broadcast %c5_i32_234 : i32 to vector<1x9xi32>
    %1078 = arith.cmpi eq, %35, %1077 : vector<1x9xi32>
    %cst_235 = arith.constant 0.000000e+00 : f32
    %1079 = vector.shape_cast %1076 : vector<1x1xf32> to vector<1x1xf32>
    %1080 = vector.broadcast %1079 : vector<1x1xf32> to vector<1x9xf32>
    %1081 = vector.broadcast %cst_235 : f32 to vector<1x9xf32>
    %1082 = arith.select %1078, %1080, %1081 : vector<1x9xi1>, vector<1x9xf32>
    %1083 = arith.addf %1065, %1082 : vector<1x9xf32>
    %1084 = vector.extract_strided_slice %974 {offsets = [0, 6], sizes = [1, 1], strides = [1, 1]} : vector<1x9xf32> to vector<1x1xf32>
    %1085 = vector.extract_strided_slice %46 {offsets = [0, 0], sizes = [1, 1], strides = [1, 1]} : vector<1x9xf32> to vector<1x1xf32>
    %1086 = arith.mulf %1084, %1085 : vector<1x1xf32>
    %1087 = vector.extract_strided_slice %974 {offsets = [0, 7], sizes = [1, 1], strides = [1, 1]} : vector<1x9xf32> to vector<1x1xf32>
    %1088 = vector.extract_strided_slice %46 {offsets = [0, 3], sizes = [1, 1], strides = [1, 1]} : vector<1x9xf32> to vector<1x1xf32>
    %1089 = arith.mulf %1087, %1088 : vector<1x1xf32>
    %1090 = arith.addf %1086, %1089 : vector<1x1xf32>
    %1091 = vector.extract_strided_slice %974 {offsets = [0, 8], sizes = [1, 1], strides = [1, 1]} : vector<1x9xf32> to vector<1x1xf32>
    %1092 = vector.extract_strided_slice %46 {offsets = [0, 6], sizes = [1, 1], strides = [1, 1]} : vector<1x9xf32> to vector<1x1xf32>
    %1093 = arith.mulf %1091, %1092 : vector<1x1xf32>
    %1094 = arith.addf %1090, %1093 : vector<1x1xf32>
    %c6_i32_236 = arith.constant 6 : i32
    %1095 = vector.broadcast %c6_i32_236 : i32 to vector<1x9xi32>
    %1096 = arith.cmpi eq, %35, %1095 : vector<1x9xi32>
    %cst_237 = arith.constant 0.000000e+00 : f32
    %1097 = vector.shape_cast %1094 : vector<1x1xf32> to vector<1x1xf32>
    %1098 = vector.broadcast %1097 : vector<1x1xf32> to vector<1x9xf32>
    %1099 = vector.broadcast %cst_237 : f32 to vector<1x9xf32>
    %1100 = arith.select %1096, %1098, %1099 : vector<1x9xi1>, vector<1x9xf32>
    %1101 = arith.addf %1083, %1100 : vector<1x9xf32>
    %1102 = vector.extract_strided_slice %974 {offsets = [0, 6], sizes = [1, 1], strides = [1, 1]} : vector<1x9xf32> to vector<1x1xf32>
    %1103 = vector.extract_strided_slice %46 {offsets = [0, 1], sizes = [1, 1], strides = [1, 1]} : vector<1x9xf32> to vector<1x1xf32>
    %1104 = arith.mulf %1102, %1103 : vector<1x1xf32>
    %1105 = vector.extract_strided_slice %974 {offsets = [0, 7], sizes = [1, 1], strides = [1, 1]} : vector<1x9xf32> to vector<1x1xf32>
    %1106 = vector.extract_strided_slice %46 {offsets = [0, 4], sizes = [1, 1], strides = [1, 1]} : vector<1x9xf32> to vector<1x1xf32>
    %1107 = arith.mulf %1105, %1106 : vector<1x1xf32>
    %1108 = arith.addf %1104, %1107 : vector<1x1xf32>
    %1109 = vector.extract_strided_slice %974 {offsets = [0, 8], sizes = [1, 1], strides = [1, 1]} : vector<1x9xf32> to vector<1x1xf32>
    %1110 = vector.extract_strided_slice %46 {offsets = [0, 7], sizes = [1, 1], strides = [1, 1]} : vector<1x9xf32> to vector<1x1xf32>
    %1111 = arith.mulf %1109, %1110 : vector<1x1xf32>
    %1112 = arith.addf %1108, %1111 : vector<1x1xf32>
    %c7_i32_238 = arith.constant 7 : i32
    %1113 = vector.broadcast %c7_i32_238 : i32 to vector<1x9xi32>
    %1114 = arith.cmpi eq, %35, %1113 : vector<1x9xi32>
    %cst_239 = arith.constant 0.000000e+00 : f32
    %1115 = vector.shape_cast %1112 : vector<1x1xf32> to vector<1x1xf32>
    %1116 = vector.broadcast %1115 : vector<1x1xf32> to vector<1x9xf32>
    %1117 = vector.broadcast %cst_239 : f32 to vector<1x9xf32>
    %1118 = arith.select %1114, %1116, %1117 : vector<1x9xi1>, vector<1x9xf32>
    %1119 = arith.addf %1101, %1118 : vector<1x9xf32>
    %1120 = vector.extract_strided_slice %974 {offsets = [0, 6], sizes = [1, 1], strides = [1, 1]} : vector<1x9xf32> to vector<1x1xf32>
    %1121 = vector.extract_strided_slice %46 {offsets = [0, 2], sizes = [1, 1], strides = [1, 1]} : vector<1x9xf32> to vector<1x1xf32>
    %1122 = arith.mulf %1120, %1121 : vector<1x1xf32>
    %1123 = vector.extract_strided_slice %974 {offsets = [0, 7], sizes = [1, 1], strides = [1, 1]} : vector<1x9xf32> to vector<1x1xf32>
    %1124 = vector.extract_strided_slice %46 {offsets = [0, 5], sizes = [1, 1], strides = [1, 1]} : vector<1x9xf32> to vector<1x1xf32>
    %1125 = arith.mulf %1123, %1124 : vector<1x1xf32>
    %1126 = arith.addf %1122, %1125 : vector<1x1xf32>
    %1127 = vector.extract_strided_slice %974 {offsets = [0, 8], sizes = [1, 1], strides = [1, 1]} : vector<1x9xf32> to vector<1x1xf32>
    %1128 = vector.extract_strided_slice %46 {offsets = [0, 8], sizes = [1, 1], strides = [1, 1]} : vector<1x9xf32> to vector<1x1xf32>
    %1129 = arith.mulf %1127, %1128 : vector<1x1xf32>
    %1130 = arith.addf %1126, %1129 : vector<1x1xf32>
    %c8_i32_240 = arith.constant 8 : i32
    %1131 = vector.broadcast %c8_i32_240 : i32 to vector<1x9xi32>
    %1132 = arith.cmpi eq, %35, %1131 : vector<1x9xi32>
    %cst_241 = arith.constant 0.000000e+00 : f32
    %1133 = vector.shape_cast %1130 : vector<1x1xf32> to vector<1x1xf32>
    %1134 = vector.broadcast %1133 : vector<1x1xf32> to vector<1x9xf32>
    %1135 = vector.broadcast %cst_241 : f32 to vector<1x9xf32>
    %1136 = arith.select %1132, %1134, %1135 : vector<1x9xi1>, vector<1x9xf32>
    %1137 = arith.addf %1119, %1136 : vector<1x9xf32>
    %c0_242 = arith.constant 0 : index
    %c0_243 = arith.constant 0 : index
    %c0_244 = arith.constant 0 : index
    %1138 = vector.load %arg14[%c0_242, %c0_243, %c0_244] : memref<1x1x9xf32, #tpu.memory_space<vmem>>, vector<1x1x9xf32>
    %1139 = vector.shape_cast %1138 : vector<1x1x9xf32> to vector<1x9xf32>
    %1140 = vector.shape_cast %1137 : vector<1x9xf32> to vector<1x1x9xf32>
    tpu.vector_store %arg14[%c0_242, %c0_243, %c0_244], %1140 {strides = array<i32>} : memref<1x1x9xf32, #tpu.memory_space<vmem>>, vector<1x1x9xf32>,
    return
  }
  func.func @transform_0(%arg0: i32, %arg1: memref<2xi32, #tpu.memory_space<smem>>) -> (i32, i32, i32) {
    %c0_i32 = arith.constant 0 : i32
    %c0_i32_0 = arith.constant 0 : i32
    %c0_i32_1 = arith.constant 0 : i32
    return %arg0, %c0_i32, %c0_i32_0 : i32, i32, i32
  }
  func.func @transform_1(%arg0: i32, %arg1: memref<2xi32, #tpu.memory_space<smem>>) -> (i32, i32, i32) {
    %c0_i32 = arith.constant 0 : i32
    %c0_i32_0 = arith.constant 0 : i32
    %c0_i32_1 = arith.constant 0 : i32
    return %arg0, %c0_i32, %c0_i32_0 : i32, i32, i32
  }
  func.func @transform_2(%arg0: i32, %arg1: memref<2xi32, #tpu.memory_space<smem>>) -> (i32, i32) {
    %c0_i32 = arith.constant 0 : i32
    %c0_i32_0 = arith.constant 0 : i32
    %c0_i32_1 = arith.constant 0 : i32
    return %c0_i32, %c0_i32_0 : i32, i32
  }
  func.func @transform_3(%arg0: i32, %arg1: memref<2xi32, #tpu.memory_space<smem>>) -> (i32, i32, i32) {
    %c0_i32 = arith.constant 0 : i32
    %c0_i32_0 = arith.constant 0 : i32
    %c0_i32_1 = arith.constant 0 : i32
    %c0_i32_2 = arith.constant 0 : i32
    return %c0_i32, %c0_i32_0, %c0_i32_1 : i32, i32, i32
  }
  func.func @transform_4(%arg0: i32, %arg1: memref<2xi32, #tpu.memory_space<smem>>) -> (i32, i32, i32) {
    %c0_i32 = arith.constant 0 : i32
    %c0_i32_0 = arith.constant 0 : i32
    %c0_i32_1 = arith.constant 0 : i32
    %c0_i32_2 = arith.constant 0 : i32
    return %c0_i32, %c0_i32_0, %c0_i32_1 : i32, i32, i32
  }
  func.func @transform_5(%arg0: i32, %arg1: memref<2xi32, #tpu.memory_space<smem>>) -> (i32, i32, i32) {
    %c0_i32 = arith.constant 0 : i32
    %c0_i32_0 = arith.constant 0 : i32
    %c0_i32_1 = arith.constant 0 : i32
    %c0_i32_2 = arith.constant 0 : i32
    return %c0_i32, %c0_i32_0, %c0_i32_1 : i32, i32, i32
  }
  func.func @transform_6(%arg0: i32, %arg1: memref<2xi32, #tpu.memory_space<smem>>) -> (i32, i32, i32) {
    %c0_i32 = arith.constant 0 : i32
    %c0_i32_0 = arith.constant 0 : i32
    %c0_i32_1 = arith.constant 0 : i32
    %c0_i32_2 = arith.constant 0 : i32
    return %c0_i32, %c0_i32_0, %c0_i32_1 : i32, i32, i32
  }
  func.func @transform_7(%arg0: i32, %arg1: memref<2xi32, #tpu.memory_space<smem>>) -> (i32, i32, i32) {
    %c0_i32 = arith.constant 0 : i32
    %c0_i32_0 = arith.constant 0 : i32
    %c0_i32_1 = arith.constant 0 : i32
    %c0_i32_2 = arith.constant 0 : i32
    return %c0_i32, %c0_i32_0, %c0_i32_1 : i32, i32, i32
  }
  func.func @transform_8(%arg0: i32, %arg1: memref<2xi32, #tpu.memory_space<smem>>) -> (i32, i32, i32) {
    %c0_i32 = arith.constant 0 : i32
    %c0_i32_0 = arith.constant 0 : i32
    %c0_i32_1 = arith.constant 0 : i32
    %c0_i32_2 = arith.constant 0 : i32
    return %c0_i32, %c0_i32_0, %c0_i32_1 : i32, i32, i32
  }
  func.func @transform_9(%arg0: i32, %arg1: memref<2xi32, #tpu.memory_space<smem>>) -> (i32, i32, i32) {
    %c0_i32 = arith.constant 0 : i32
    %c0_i32_0 = arith.constant 0 : i32
    %c0_i32_1 = arith.constant 0 : i32
    %c0_i32_2 = arith.constant 0 : i32
    return %c0_i32, %c0_i32_0, %c0_i32_1 : i32, i32, i32
  }
  func.func @transform_10(%arg0: i32, %arg1: memref<2xi32, #tpu.memory_space<smem>>) -> (i32, i32, i32) {
    %c0_i32 = arith.constant 0 : i32
    %c0_i32_0 = arith.constant 0 : i32
    %c0_i32_1 = arith.constant 0 : i32
    %c0_i32_2 = arith.constant 0 : i32
    return %c0_i32, %c0_i32_0, %c0_i32_1 : i32, i32, i32
  }
  func.func @transform_11(%arg0: i32, %arg1: memref<2xi32, #tpu.memory_space<smem>>) -> (i32, i32, i32) {
    %c0_i32 = arith.constant 0 : i32
    %c0_i32_0 = arith.constant 0 : i32
    %c0_i32_1 = arith.constant 0 : i32
    %c0_i32_2 = arith.constant 0 : i32
    return %c0_i32, %c0_i32_0, %c0_i32_1 : i32, i32, i32
  }
  func.func @transform_12(%arg0: i32, %arg1: memref<2xi32, #tpu.memory_space<smem>>) -> (i32, i32, i32) {
    %c0_i32 = arith.constant 0 : i32
    %c0_i32_0 = arith.constant 0 : i32
    %c0_i32_1 = arith.constant 0 : i32
    return %arg0, %c0_i32, %c0_i32_0 : i32, i32, i32
  }
}

</mosaic_0001>

<bundles_post_ra>
// kernel: autoencoder_forward.1
= control target key start
LH: loop header
LB: loop body
LE: loop exit
PB: predicated region body
PF: predicated region fallthrough
CT: control target
= control target key end

     0   :  { %s2621_s28 = smov [#allocation3]   ;;  %s3444_s0 = inlined_call_operand.vmem [shape: s32[2], index: 0, kind: input, shape index: {}]   ;;  %s3445_s1 = inlined_call_operand.vmem [shape: f32[2,8,3], index: 1, kind: input, shape index: {}]   ;;  %s3446_s2 = inlined_call_operand.vmem [shape: s32[2,8,1], index: 2, kind: input, shape index: {}]   ;;  %s3447_s3 = inlined_call_operand.vmem [shape: f32[128,32], index: 3, kind: input, shape index: {}]   ;;  %s3448_s4 = inlined_call_operand.vmem [shape: bf16[2,32,32], index: 4, kind: input, shape index: {}]   ;;  %s3449_s5 = inlined_call_operand.vmem [shape: bf16[2,32,32], index: 5, kind: input, shape index: {}]   ;;  %s3450_s6 = inlined_call_operand.vmem [shape: f32[2,1,32], index: 6, kind: input, shape index: {}]   ;;  %s3451_s7 = inlined_call_operand.vmem [shape: bf16[2,32,32], index: 7, kind: input, shape index: {}]   ;;  %s3452_s8 = inlined_call_operand.vmem [shape: bf16[2,32,32], index: 8, kind: input, shape index: {}]   ;;  %s3453_s9 = inlined_call_operand.vmem [shape: f32[2,1,32], index: 9, kind: input, shape index: {}]   ;;  %s3454_s10 = inlined_call_operand.vmem [shape: bf16[2,32,32], index: 10, kind: input, shape index: {}]   ;;  %s3455_s11 = inlined_call_operand.vmem [shape: f32[2,1,32], index: 11, kind: input, shape index: {}]   ;;  %s3456_s12 = inlined_call_operand.vmem [shape: bf16[2,32,9], index: 12, kind: input, shape index: {}]   ;;  %s3457_s13 = inlined_call_operand.vmem [shape: f32[2,1,9], index: 13, kind: output, shape index: {}]  }
   0x1   :  { %s19_s27 = sshll.u32 %s3444_s0, 4  ;;  %s20_s27 = int_to_ptr.vmem [resolvable:$true] %s19_s27 }
   0x2   :  { %22 = dma.vmem_to_smem %s20_s27, 16, %s2621_s28, [#allocation2] }
   0x3   :  { %2615 = dma.done.wait [#allocation2], 16 }
   0x4   :  { %2616 = vsyncadd [#allocation2], 4294967280 }
   0x5   :  { %25 = sfence }
   0x6   :  { %s2712_s29 = smov 0  }
   0x7 LB: > { %s2718_s30 = sadd.s32 4294967295, %s2619_s29   ;;  %p2318_p0 = scmp.ge.s32.totalorder %s2619_s29, 1  ;;  %s2619_s29 = sphi %s2712_s29, %s31_s29  }
   0x8   : > { %p379_p1 = scmp.lt.s32.totalorder %s2619_s29, 3 }
   0xa   : > { %p380_p2 = pnand %p2318_p0, %p379_p1 }
   0xb   : > { %s2623_s0 = smov (!%p380_p2), 126   ;;  %s2624_s14 = smov (!%p380_p2), 124  }
   0xc   : > { %383 = sbr.rel (%p380_p2) target bundleno = 6644 (0x19f4), region = 68  ;;  %s3460_s15 = smov (!%p380_p2), 122  }
   0xd   : > { %s3462_s16 = smov (!%p380_p2), 125   ;;  %s3458_s17 = smov (!%p380_p2), 123  }
   0xe   : > { %s2628_s18 = smov (!%p380_p2), 127   ;;  %p422_p3 = scmp.lt.s32.totalorder (!%p380_p2), %s2718_s30, 1 }
   0xf   : > { %s434_s24 = sld [smem:[#allocation3 + %s2718_s30]] (!%p380_p2)  ;;  %s2632_s21 = smov (!%p380_p2), 4  }
  0x10   : > { %s2634_s22 = smov (!%p380_p2), 2   ;;  %s3471_s26 = smov (!%p380_p2), 125  }
  0x11   : > { %v437_v0 = vlaneseq  ;;  %v2622_v2 = vmov 0.0   ;;  %s2751_s19 = scalar_select %p422_p3, %s2718_s30, 1  ;;  %v2629_v15 = vmov 0   ;;  %vm595_vm7 = vcmask 23552  }
  0x12   : > { %2526 = vset.pattern.permute.xlu0 %v2629_v15  ;;  %2527 = vset.pattern.permute.xlu1 %v2629_v15  ;;  %vm492_vm9 = vcmask 64512   ;;  %v2630_v42 = vmov 1.0   ;;  %s2631_s30 = smov 3   ;;  %s3472_s27 = smov 122  }
  0x13   : > { %v2723_v1 = vand.u32 127, %v437_v0  ;;  %s2319_s20 = sshll.u32 %s2751_s19, 3  ;;  %2528 = vset.pattern.permute.xlu2 %v2629_v15  ;;  %v2801_v39 = vshrl.u32 %v437_v0, 7 }
  0x14   : > { %s2759_s23 = scalar_lea.vmem %s3445_s1, %s2319_s20  ;;  %s429_s25 = scalar_lea.vmem %s3446_s2, %s2319_s20 }
  0x15   : > { %vm511_vm0 = vcmp.eq.s32.totalorder %v2723_v1, 0  ;;  %vm512_vm1 = vcmp.eq.s32.totalorder %v2723_v1, 4  ;;  %vm3465_vm2 = vcmp.eq.s32.totalorder %v2723_v1, 8  ;;  %v435_v4 = vld [vmem:[%s2759_s23] sm:$0xff]  ;;  %vm566_vm5 = vcmp.eq.s32.totalorder %v2723_v1, 1  ;;  %s2633_s20 = smov 1  }
  0x16   : > { %vm513_vm3 = vmor %vm511_vm0, %vm512_vm1  ;;  %vm587_vm6 = vcmp.eq.s32.totalorder %v2723_v1, 2  ;;  %vm3464_vm8 = vcmp.eq.s32.totalorder %v2801_v39, %v2723_v1  ;;  %v483_v54 = vstv %s434_s24  ;;  %vm487_vm13 = vcmp.ne.s32.totalorder %v2801_v39, %v2723_v1  ;;  %s2635_s24 = smov 6  }
  0x17   : > { %vm515_vm4 = vmor %vm513_vm3, %vm3465_vm2  ;;  %vm484_vm10 = vcmp.lt.s32.totalorder %v2801_v39, %v483_v54  ;;  %vm2817_vm11 = vcmp.lt.s32.totalorder %v2723_v1, %v483_v54 }
  0x18   : > { %v2735_v3 = vsel %vm515_vm4, 1.0, %v2622_v2  ;;  %vm486_vm12 = vmand %vm484_vm10, %vm2817_vm11 }
  0x19   : > { %519 = vrot.lane.b32.xlu0 %v2735_v3, %s2623_s0  ;;  %528 = vrot.lane.b32.xlu1 %v2735_v3, %s2624_s14  ;;  %v517_v17 = vmul.f32 %v2735_v3, %v435_v4  ;;  %vm2825_vm14 = vmand %vm486_vm12, %vm487_vm13 }
  0x1a   : > { %578 = vrot.lane.b32.xlu2 %v2735_v3, %s3460_s15 }
  0x21   : > { %548 = vrot.lane.b32.xlu0 %v2735_v3, %s3462_s16  ;;  %557 = vrot.lane.b32.xlu1 %v2735_v3, %s3458_s17  ;;  %s3473_s17 = smov 123  }
  0x22   : > { %544 = vrot.lane.b32.xlu2 %v2735_v3, %s2628_s18 }
  0x74   : > { %v2770_v9 = vpop.permute.xlu2 %578 }
  0x75   : > { %v581_v12 = vmul.f32 %v2770_v9, %v435_v4 }
  0x7c   : > { %v2786_v16 = vpop.permute.xlu2 %544 }
  0x7d   : > { %v547_v22 = vmul.f32 %v2786_v16, %v435_v4 }
  0x8b   : > { %v2762_v5 = vpop.permute.xlu0 %519  ;;  %v2764_v6 = vpop.permute.xlu1 %528 }
  0x8c   : > { %v522_v7 = vmul.f32 %v2762_v5, %v435_v4  ;;  %v531_v8 = vmul.f32 %v2764_v6, %v435_v4 }
  0x8e   : > { %524 = vrot.lane.b32.xlu0 %v522_v7, %s2628_s18  ;;  %533 = vrot.lane.b32.xlu2 %v531_v8, %s2623_s0 }
  0x93   : > { %v2772_v10 = vpop.permute.xlu0 %548  ;;  %v2774_v11 = vpop.permute.xlu1 %557 }
  0x94   : > { %v551_v13 = vmul.f32 %v2772_v10, %v435_v4  ;;  %v560_v14 = vmul.f32 %v2774_v11, %v435_v4 }
  0x96   : > { %553 = vrot.lane.b32.xlu1 %v551_v13, %s2628_s18  ;;  %562 = vrot.lane.b32.xlu0 %v560_v14, %s2623_s0 }
  0x97   : > { %583 = vrot.lane.b32.xlu2 %v581_v12, %s2623_s0 }
  0x9e   : > { %574 = vrot.lane.b32.xlu1 %v531_v8, %s2628_s18  ;;  %v2833_v8 = vcvt.s32.f32 %v2723_v1 }
  0xe8   : > { %v534_v20 = vpop.permute.xlu2 %533 }
  0xf1   : > { %v584_v28 = vpop.permute.xlu2 %583 }
 0x100   : > { %v525_v18 = vpop.permute.xlu0 %524 }
 0x101   : > { %v527_v19 = vadd.f32 %v525_v18, %v517_v17 }
 0x103   : > { %v536_v21 = vadd.f32 %v534_v20, %v527_v19 }
 0x105   : > { %539 = vperm.xlu0 %2526, %v536_v21  }
 0x108   : > { %v554_v23 = vpop.permute.xlu1 %553  ;;  %v563_v24 = vpop.permute.xlu0 %562 }
 0x109   : > { %v556_v25 = vadd.f32 %v554_v23, %v547_v22 }
 0x10b   : > { %v565_v26 = vadd.f32 %v563_v24, %v556_v25  ;;  %v460_v24 = vld [vmem:[%s3447_s3 + $0x78] sm:$0xff]  ;;  %v459_v25 = vld [vmem:[%s3447_s3 + $0x70] sm:$0xff] }
 0x10c   : > { %461 = vmatpush.msra.mxu0 %v460_v24  ;;  %v2479_v24 = vld [vmem:[%s3449_s5 + $0x8] sm:$0xff] }
 0x10d   : > { %569 = vperm.xlu1 %2527, %v565_v26  }
 0x10e   : > { %462 = vmatpush.msra.mxu0 %v459_v25 }
 0x110   : > { %v575_v27 = vpop.permute.xlu1 %574 }
 0x111   : > { %v577_v29 = vadd.f32 %v575_v27, %v522_v7  ;;  %v458_v27 = vld [vmem:[%s3447_s3 + $0x68] sm:$0xff] }
 0x112   : > { %463 = vmatpush.msra.mxu0 %v458_v27 }
 0x113   : > { %v586_v30 = vadd.f32 %v584_v28, %v577_v29 }
 0x115   : > { %590 = vperm.xlu2 %2528, %v586_v30   ;;  %v436_v30 = vld [vmem:[%s429_s25] sm:$0xff]  ;;  %s2636_s25 = smov 5  }
 0x16f   : > { %v591_v32 = vpop.permute.xlu2 %590 }
 0x170   : > { %v593_v37 = vsel %vm587_vm6, %v591_v32, 0.0  ;;  %v456_v32 = vld [vmem:[%s3447_s3 + $0x58] sm:$0xff] }
 0x177   : > { %v540_v31 = vpop.permute.xlu0 %539 }
 0x178   : > { %v542_v34 = vsel %vm511_vm0, %v540_v31, 0.0  ;;  %v457_v31 = vld [vmem:[%s3447_s3 + $0x60] sm:$0xff] }
 0x179   : > { %464 = vmatpush.msra.mxu0 %v457_v31 }
 0x17b   : > { %465 = vmatpush.msra.mxu0 %v456_v32 }
 0x17f   : > { %v570_v33 = vpop.permute.xlu1 %569 }
 0x180   : > { %v572_v35 = vsel %vm566_vm5, %v570_v33, 0.0  ;;  %v455_v33 = vld [vmem:[%s3447_s3 + $0x50] sm:$0xff] }
 0x181   : > { %v573_v36 = vadd.f32 %v572_v35, %v542_v34  ;;  %v454_v34 = vld [vmem:[%s3447_s3 + $0x48] sm:$0xff]  ;;  %466 = vmatpush.msra.mxu0 %v455_v33  ;;  %v453_v35 = vld [vmem:[%s3447_s3 + $0x40] sm:$0xff] }
 0x183   : > { %v594_v38 = vadd.f32 %v593_v37, %v573_v36  ;;  %467 = vmatpush.msra.mxu0 %v454_v34  ;;  %v452_v36 = vld [vmem:[%s3447_s3 + $0x38] sm:$0xff]  ;;  %v451_v37 = vld [vmem:[%s3447_s3 + $0x30] sm:$0xff] }
 0x185   : > { %2323 = vmatpush.xpose.msk.msra.mxu1 %vm595_vm7, %v594_v38  ;;  %468 = vmatpush.msra.mxu0 %v453_v35 }
 0x187   : > { %469 = vmatpush.msra.mxu0 %v452_v36 }
 0x188   : > { %2324 = vmatmul.msk.f32.vlgmr.msra.gmra.mxu1 %vm595_vm7, %v594_v38  ;;  %v450_v38 = vld [vmem:[%s3447_s3 + $0x28] sm:$0xff] }
 0x189   : > { %470 = vmatpush.msra.mxu0 %v451_v37 }
 0x18b   : > { %471 = vmatpush.msra.mxu0 %v450_v38  ;;  %v2478_v38 = vld [vmem:[%s3449_s5] sm:$0xff] }
 0x205   : > { %v616_v40 = vpop.f32.mrf.mxu1 }
 0x206   : > { %2325 = vmatpush.msk.msra.mxu2 %vm3464_vm8, %v616_v40  ;;  %v619_v41 = vsel %vm3464_vm8, %v616_v40, 0.0  ;;  %v648_v47 = vmul.f32 2.0, %v616_v40  ;;  %v449_v40 = vld [vmem:[%s3447_s3 + $0x20] sm:$0xff] }
 0x207   : > { %2326 = vmatmul.msk.f32.vlgmr.msra.gmra.mxu2 %vm492_vm9, %v2630_v42  ;;  %v620_v43 = vsel %vm492_vm9, %v619_v41, 0.0  ;;  %v448_v41 = vld [vmem:[%s3447_s3 + $0x18] sm:$0xff]  ;;  %472 = vmatpush.msra.mxu0 %v449_v40 }
 0x208   : > { %621 = vadd.xlane.f32.xlu1 %v620_v43  ;;  %v447_v43 = vld [vmem:[%s3447_s3 + $0x10] sm:$0xff]  ;;  %795 = vmatpush.bf16.msrb.mxu2 %v2479_v24  ;;  %v2486_v24 = vld [vmem:[%s3452_s8] sm:$0xff] }
 0x209   : > { %473 = vmatpush.msra.mxu0 %v448_v41 }
 0x20b   : > { %474 = vmatpush.msra.mxu0 %v447_v43 }
 0x20c   : > { %796 = vmatpush.bf16.msrb.mxu2 %v2478_v38 }
 0x27b   : > { %v622_v46 = vpop.xlane.xlu1 %621 }
 0x28a   : > { %v643_v44 = vpop.f32.mrf.mxu2 }
 0x28b   : > { %v646_v45 = vperm.slane %v643_v44, 0  ;;  %v446_v44 = vld [vmem:[%s3447_s3 + $0x8] sm:$0xff] }
 0x28c   : > { %475 = vmatpush.msra.mxu0 %v446_v44  ;;  %v2481_v44 = vld [vmem:[%s3448_s4 + $0x18] sm:$0xff] }
 0x28d   : > { %v647_v48 = vadd.f32 %v646_v45, %v622_v46  ;;  %v445_v45 = vld [vmem:[%s3447_s3] sm:$0xff] }
 0x28e   : > { %476 = vmatpush.msra.mxu0 %v445_v45  ;;  %v2480_v45 = vld [vmem:[%s3448_s4 + $0x10] sm:$0xff] }
 0x28f   : > { %v649_v49 = vsub.f32 %v647_v48, %v648_v47 }
 0x291   : > { %v650_v50 = vmax.f32 %v649_v49, 0.0 }
 0x293   : > { %v651_v51 = vadd.f32 1e-12, %v650_v50 }
 0x295   : > { %2564 = vrsqrt.f32 %v651_v51  ;;  %vm659_vm15 = vcmp.eq.f32.partialorder %v651_v51, inf  ;;  %v662_v62 = vand.u32 2147483648, %v651_v51  ;;  %vm661_vm3 = vcmp.eq.f32.partialorder %v651_v51, 0.0 }
 0x29b   : > { %v2565_v52 = vpop.eup %2564 }
 0x29c   : > { %v653_v53 = vmul.f32 %v2565_v52, %v651_v51 }
 0x29e   : > { %v654_v55 = vmul.f32 %v2565_v52, %v653_v53  ;;  %v2476_v53 = vld [vmem:[%s3448_s4] sm:$0xff] }
 0x2a0   : > { %v655_v56 = vmul.f32 0.5, %v654_v55 }
 0x2a2   : > { %v656_v58 = vsub.f32 1.5, %v655_v56 }
 0x2a4   : > { %v657_v59 = vmul.f32 %v2565_v52, %v656_v58  ;;  %v2477_v52 = vld [vmem:[%s3448_s4 + $0x8] sm:$0xff] }
 0x2a5   : > { %822 = vmatpush.bf16.msrb.mxu1 %v2477_v52 }
 0x2a6   : > { %v658_v60 = vmul.f32 %v657_v59, %v651_v51 }
 0x2a8   : > { %v660_v63 = vsel %vm659_vm15, %v651_v51, %v658_v60 }
 0x2a9   : > { %v663_v0 = vsel %vm661_vm3, %v662_v62, %v660_v63  ;;  %823 = vmatpush.bf16.msrb.mxu1 %v2476_v53 }
 0x2aa   : > { %v667_v4 = vsel %vm2825_vm14, %v663_v0, 1e+30  ;;  %v664_v17 = vsub.f32 0.0, %v663_v0 }
 0x2ab   : > { %v668_v7 = vsel %vm492_vm9, %v667_v4, inf  ;;  %vm672_vm10 = vcmp.lt.f32.partialorder %v667_v4, 1e+30 }
 0x2ac   : > { %669 = vmin.xlane.f32.xlu2 %v668_v7  ;;  %v665_v18 = vmul.f32 1.442695, %v664_v17 }
 0x2ad   : > { %912 = vmatpush.bf16.msra.mxu1 %v2481_v44  ;;  %v2491_v44 = vld [vmem:[%s3456_s12 + $0x8] sm:$0xff] }
 0x2ae   : > { %2566 = vpow2.f32 %v665_v18 }
 0x2b1   : > { %913 = vmatpush.bf16.msra.mxu1 %v2480_v45  ;;  %v2561_v45 = vld [vmem:[%s3455_s11] ss:$0 sm:$0xff] }
 0x2b4   : > { %v2837_v20 = vpop.eup %2566 }
 0x31f   : > { %v670_v12 = vpop.xlane.xlu2 %669 }
 0x320   : > { %vm671_vm4 = vcmp.le.f32.partialorder %v667_v4, %v670_v12 }
 0x321   : > { %vm673_vm12 = vmand %vm671_vm4, %vm672_vm10 }
 0x322   : > { %v674_v13 = vsel %vm673_vm12, %v2833_v8, 8.0 }
 0x323   : > { %v675_v14 = vsel %vm492_vm9, %v674_v13, inf }
 0x324   : > { %676 = vmin.xlane.f32.xlu0 %v675_v14 }
 0x397   : > { %v677_v19 = vpop.xlane.xlu0 %676 }
 0x398   : > { %vm678_vm13 = vcmp.eq.f32.partialorder %v2833_v8, %v677_v19 }
 0x399   : > { %v679_v21 = vsel %vm678_vm13, %v2837_v20, 0.0  ;;  %v681_v22 = vsel %vm678_vm13, 1e+30, %v667_v4 }
 0x39a   : > { %v682_v23 = vsel %vm492_vm9, %v681_v22, inf  ;;  %vm686_vm3 = vcmp.lt.f32.partialorder %v681_v22, 1e+30 }
 0x39b   : > { %683 = vmin.xlane.f32.xlu2 %v682_v23 }
 0x40e   : > { %v684_v26 = vpop.xlane.xlu2 %683 }
 0x40f   : > { %vm685_vm15 = vcmp.le.f32.partialorder %v681_v22, %v684_v26 }
 0x410   : > { %vm687_vm4 = vmand %vm685_vm15, %vm686_vm3 }
 0x411   : > { %v688_v28 = vsel %vm687_vm4, %v2833_v8, 8.0  ;;  %vm785_vm4 = vcmask 261120  }
 0x412   : > { %v689_v29 = vsel %vm492_vm9, %v688_v28, inf }
 0x413   : > { %690 = vmin.xlane.f32.xlu1 %v689_v29 }
 0x42c   : > { %440 = vperm.xlu1 %2527, %v436_v30  }
 0x434   : > { %1188 = vrot.lane.b32.xlu1 %v2735_v3, %s2631_s30 }
 0x43c   : > { %1214 = vrot.lane.b32.xlu1 %v2735_v3, %s2634_s22 }
 0x486   : > { %v691_v46 = vpop.xlane.xlu1 %690 }
 0x487   : > { %vm692_vm10 = vcmp.eq.f32.partialorder %v2833_v8, %v691_v46  ;;  %v2558_v46 = vld [vmem:[%s3450_s6] ss:$0 sm:$0xff] }
 0x488   : > { %v693_v47 = vsel %vm692_vm10, %v2837_v20, 0.0  ;;  %v695_v48 = vsel %vm692_vm10, 1e+30, %v681_v22  ;;  %vm747_vm10 = vcmask 1043456  }
 0x489   : > { %v694_v49 = vadd.f32 %v693_v47, %v679_v21  ;;  %v696_v50 = vsel %vm492_vm9, %v695_v48, inf  ;;  %vm700_vm15 = vcmp.lt.f32.partialorder %v695_v48, 1e+30 }
 0x48a   : > { %697 = vmin.xlane.f32.xlu2 %v696_v50 }
 0x49e   : > { %v441_v51 = vpop.permute.xlu1 %440 }
 0x49f   : > { %vm442_vm12 = vcmp.eq.s32.totalorder %v2723_v1, %v441_v51 }
 0x4a0   : > { %2322 = vmatmul.msk.f32.vlgmr.msra.gmra.mxu0 %vm442_vm12, %v2630_v42 }
 0x4fd   : > { %v698_v54 = vpop.xlane.xlu2 %697 }
 0x4fe   : > { %vm699_vm13 = vcmp.le.f32.partialorder %v695_v48, %v698_v54 }
 0x4ff   : > { %vm701_vm3 = vmand %vm699_vm13, %vm700_vm15 }
 0x500   : > { %v702_v55 = vsel %vm701_vm3, %v2833_v8, 8.0 }
 0x501   : > { %v703_v56 = vsel %vm492_vm9, %v702_v55, inf  ;;  %v2483_v55 = vld [vmem:[%s3449_s5 + $0x18] sm:$0xff] }
 0x502   : > { %704 = vmin.xlane.f32.xlu0 %v703_v56  ;;  %885 = vmatpush.bf16.msra.mxu2 %v2483_v55  ;;  %v2482_v56 = vld [vmem:[%s3449_s5 + $0x10] sm:$0xff] }
 0x506   : > { %886 = vmatpush.bf16.msra.mxu2 %v2482_v56 }
 0x51d   : > { %v2910_v58 = vpop.f32.mrf.mxu0 }
 0x51e   : > { %v743_v59 = vpack.c.bf16 %v2910_v58, %v2910_v58 }
 0x520   : > { %2345 = vmatmul.msk.bf16.vlgmr.msrb.gmra.mxu1 %vm785_vm4, %v743_v59  ;;  %v749_v60 = vsel %vm747_vm10, %v743_v59, 0 }
 0x521   : > { %758 = vmatpush.bf16.msra.mxu3 %v749_v60 }
 0x575   : > { %v705_v62 = vpop.xlane.xlu0 %704 }
 0x576   : > { %vm706_vm12 = vcmp.eq.f32.partialorder %v2833_v8, %v705_v62 }
 0x577   : > { %v707_v63 = vsel %vm706_vm12, %v2837_v20, 0.0  ;;  %v709_v0 = vsel %vm706_vm12, 1e+30, %v695_v48 }
 0x578   : > { %v708_v4 = vadd.f32 %v707_v63, %v694_v49  ;;  %v710_v7 = vsel %vm492_vm9, %v709_v0, inf  ;;  %vm714_vm15 = vcmp.lt.f32.partialorder %v709_v0, 1e+30 }
 0x579   : > { %711 = vmin.xlane.f32.xlu2 %v710_v7  ;;  %v2487_v7 = vld [vmem:[%s3452_s8 + $0x8] sm:$0xff] }
 0x57a   : > { %974 = vmatpush.bf16.msrb.mxu0 %v2487_v7 }
 0x57e   : > { %975 = vmatpush.bf16.msrb.mxu0 %v2486_v24 }
 0x59d   : > { %v825_v12 = vpop.f32.mrf.mxu1 }
 0x5a5   : > { %v827_v13 = vpop.f32.mrf.mxu1 }
 0x5ec   : > { %v712_v14 = vpop.xlane.xlu2 %711 }
 0x5ed   : > { %vm713_vm13 = vcmp.le.f32.partialorder %v709_v0, %v712_v14  ;;  %v2485_v0 = vld [vmem:[%s3451_s7 + $0x8] sm:$0xff] }
 0x5ee   : > { %vm715_vm3 = vmand %vm713_vm13, %vm714_vm15 }
 0x5ef   : > { %v716_v17 = vsel %vm715_vm3, %v2833_v8, 8.0 }
 0x5f0   : > { %v717_v18 = vsel %vm492_vm9, %v716_v17, inf }
 0x5f1   : > { %718 = vmin.xlane.f32.xlu0 %v717_v18 }
 0x664   : > { %v719_v19 = vpop.xlane.xlu0 %718 }
 0x665   : > { %vm720_vm8 = vcmp.eq.f32.partialorder %v2833_v8, %v719_v19 }
 0x666   : > { %v721_v21 = vsel %vm720_vm8, %v2837_v20, 0.0 }
 0x667   : > { %v722_v22 = vadd.f32 %v721_v21, %v708_v4  ;;  %v2484_v4 = vld [vmem:[%s3451_s7] sm:$0xff] }
 0x669   : > { %v723_v23 = vsel %vm492_vm9, %v722_v22, 0.0 }
 0x66a   : > { %724 = vadd.xlane.f32.xlu2 %v723_v23 }
 0x682   : > { %1192 = vrot.lane.b32.xlu2 %v2735_v3, %s2633_s20 }
 0x68a   : > { %1250 = vrot.lane.b32.xlu2 %v2735_v3, %s2635_s24 }
 0x692   : > { %1276 = vrot.lane.b32.xlu2 %v2735_v3, %s2636_s25 }
 0x6dd   : > { %v725_v25 = vpop.xlane.xlu2 %724 }
 0x6de   : > { %v726_v26 = vadd.f32 1e-09, %v725_v25 }
 0x6e0   : > { %2568 = vrcp.f32 %v726_v26  ;;  %v738_v30 = vand.u32 2147483648, %v726_v26  ;;  %v736_v32 = vand.u32 2147483647, %v726_v26  ;;  %vm732_vm8 = vweird.f32 %v726_v26 }
 0x6e2   : > { %v739_v33 = vor.u32 1.1754944e-38, %v738_v30  ;;  %vm737_vm15 = vcmp.eq.f32.partialorder %v736_v32, 8.507059e+37  ;;  %v2489_v30 = vld [vmem:[%s3454_s10 + $0x8] sm:$0xff]  ;;  %v2560_v32 = vld [vmem:[%s3453_s9] ss:$0 sm:$0xff] }
 0x6e3   : > { %1045 = vmatpush.bf16.msrb.mxu1 %v2489_v30 }
 0x6e6   : > { %v2569_v27 = vpop.eup %2568 }
 0x6e7   : > { %v728_v28 = vmul.f32 %v2569_v27, %v726_v26  ;;  %vm733_vm12 = vweird.f32 %v2569_v27 }
 0x6e8   : > { %vm734_vm13 = vmor %vm732_vm8, %vm733_vm12 }
 0x6e9   : > { %v729_v29 = vsub.f32 1.0, %v728_v28 }
 0x6eb   : > { %v730_v31 = vmul.f32 %v2569_v27, %v729_v29 }
 0x6ed   : > { %v731_v20 = vadd.f32 %v2569_v27, %v730_v31  ;;  %v2488_v31 = vld [vmem:[%s3454_s10] sm:$0xff] }
 0x6ee   : > { %1046 = vmatpush.bf16.msrb.mxu1 %v2488_v31 }
 0x6ef   : > { %v735_v34 = vsel %vm734_vm13, %v2569_v27, %v731_v20 }
 0x6f0   : > { %v740_v35 = vsel %vm737_vm15, %v739_v33, %v735_v34 }
 0x6f1   : > { %v741_v36 = vmul.f32 %v740_v35, %v722_v22 }
 0x6f3   : > { %v742_v37 = vpack.c.bf16 %v741_v36, %v741_v36 }
 0x6f5   : > { %2327 = vmatmul.msk.bf16.vlgmr.msra.gmra.mxu3 %vm492_vm9, %v742_v37 }
 0x778   : > { %v760_v40 = vpop.f32.mrf.mxu3 }
 0x779   : > { %v768_v41 = vpack.c.bf16 %v760_v40, %v760_v40 }
 0x77b   : > { %2336 = vmatmul.msk.bf16.vlgmr.msrb.gmra.mxu2 %vm785_vm4, %v768_v41  ;;  %v491_v41 = vsel %vm2817_vm11, 1.0, %v2622_v2 }
 0x77c   : > { %1001 = vmatpush.bf16.msrb.mxu2 %v2485_v0 }
 0x780   : > { %v762_v43 = vpop.f32.mrf.mxu3  ;;  %1002 = vmatpush.bf16.msrb.mxu2 %v2484_v4 }
 0x781   : > { %v493_v43 = vsel %vm492_vm9, %v491_v41, 0.0 }
 0x782   : > { %494 = vadd.xlane.f32.xlu0 %v493_v43  ;;  %v3053_v43 = vpop.permute.xlu1 %1188 }
 0x796   : > { %1254 = vrot.lane.b32.xlu0 %v2735_v3, %s2632_s21 }
 0x7f5   : > { %v495_v4 = vpop.xlane.xlu0 %494 }
 0x7f6   : > { %vm501_vm8 = vweird.f32 %v495_v4 }
 0x7fe   : > { %v798_v47 = vpop.f32.mrf.mxu2 }
 0x7ff   : > { %v826_v48 = vadd.f32 %v825_v12, %v798_v47  ;;  %v2559_v12 = vld [vmem:[%s3450_s6 + $0x1] ss:$0 sm:$0xff] }
 0x801   : > { %v833_v49 = vadd.f32 %v2558_v46, %v826_v48  ;;  %v2490_v46 = vld [vmem:[%s3456_s12] sm:$0xff] }
 0x803   : > { %2570 = vtanh.f32 %v833_v49 }
 0x806   : > { %v800_v50 = vpop.f32.mrf.mxu2 }
 0x809   : > { %v2571_v51 = vpop.eup %2570 }
 0x80a   : > { %v835_v52 = vadd.f32 %v2571_v51, %v2910_v58 }
 0x80c   : > { %v836_v53 = vpack.c.bf16 %v835_v52, %v835_v52 }
 0x80e   : > { %2372 = vmatmul.msk.bf16.vlgmr.msra.gmra.mxu1 %vm785_vm4, %v836_v53  ;;  %v838_v54 = vsel %vm747_vm10, %v836_v53, 0 }
 0x80f   : > { %847 = vmatpush.bf16.msrb.mxu3 %v838_v54 }
 0x812   : > { %2346 = vmatmul.msk.bf16.vlgmr.msrb.gmra.mxu3 %vm492_vm9, %v742_v37 }
 0x88b   : > { %v915_v59 = vpop.f32.mrf.mxu1 }
 0x893   : > { %v917_v58 = vpop.f32.mrf.mxu1 }
 0x895   : > { %v849_v60 = vpop.f32.mrf.mxu3 }
 0x896   : > { %v858_v62 = vpack.c.bf16 %v849_v60, %v849_v60 }
 0x898   : > { %2363 = vmatmul.msk.bf16.vlgmr.msra.gmra.mxu2 %vm785_vm4, %v858_v62 }
 0x89d   : > { %v851_v63 = vpop.f32.mrf.mxu3 }
 0x91b   : > { %v888_v13 = vpop.f32.mrf.mxu2 }
 0x91c   : > { %v916_v14 = vadd.f32 %v915_v59, %v888_v13 }
 0x91e   : > { %v924_v17 = vadd.f32 %v2559_v12, %v916_v14 }
 0x920   : > { %2572 = vtanh.f32 %v924_v17  ;;  %v507_v17 = vand.u32 2147483648, %v495_v4 }
 0x923   : > { %v890_v18 = vpop.f32.mrf.mxu2 }
 0x926   : > { %v2573_v19 = vpop.eup %2572 }
 0x927   : > { %v926_v21 = vadd.f32 %v2573_v19, %v835_v52  ;;  %v505_v19 = vand.u32 2147483647, %v495_v4 }
 0x929   : > { %v927_v22 = vpack.c.bf16 %v926_v21, %v926_v21 }
 0x92b   : > { %2392 = vmatmul.msk.bf16.vlgmr.msrb.gmra.mxu2 %vm785_vm4, %v927_v22  ;;  %v929_v23 = vsel %vm747_vm10, %v927_v22, 0 }
 0x92c   : > { %938 = vmatpush.bf16.msra.mxu3 %v929_v23 }
 0x92f   : > { %2374 = vmatmul.msk.bf16.vlgmr.msra.gmra.mxu3 %vm492_vm9, %v742_v37 }
 0x930   : > { %1098 = vmatpush.bf16.msrb.mxu3 %v2491_v44  ;;  %v3055_v44 = vpop.permute.xlu0 %1254 }
 0x934   : > { %1099 = vmatpush.bf16.msrb.mxu3 %v2490_v46  ;;  %v3064_v46 = vpop.permute.xlu1 %1214 }
 0x9ae   : > { %v1004_v25 = vpop.f32.mrf.mxu2 }
 0x9b2   : > { %v940_v26 = vpop.f32.mrf.mxu3 }
 0x9b3   : > { %v948_v27 = vpack.c.bf16 %v940_v26, %v940_v26 }
 0x9b5   : > { %2383 = vmatmul.msk.bf16.vlgmr.msrb.gmra.mxu0 %vm785_vm4, %v948_v27 }
 0x9b6   : > { %v1006_v28 = vpop.f32.mrf.mxu2 }
 0x9ba   : > { %v942_v29 = vpop.f32.mrf.mxu3 }
 0xa32   : > { %v977_v20 = vpop.f32.mrf.mxu0 }
 0xa33   : > { %v1005_v33 = vadd.f32 %v1004_v25, %v977_v20 }
 0xa35   : > { %v1012_v34 = vadd.f32 %v2560_v32, %v1005_v33 }
 0xa37   : > { %2574 = vtanh.f32 %v1012_v34 }
 0xa3a   : > { %v979_v35 = vpop.f32.mrf.mxu0 }
 0xa3b   : > { %v3039_v35 = vpop.permute.xlu2 %1192 }
 0xa3d   : > { %v2575_v36 = vpop.eup %2574 }
 0xa3e   : > { %v2980_v37 = vadd.f32 %v2575_v36, %v926_v21  ;;  %v508_v21 = vor.u32 1.1754944e-38, %v507_v17 }
 0xa40   : > { %v2984_v38 = vpack.c.bf16 %v2980_v37, %v2980_v37 }
 0xa42   : > { %2401 = vmatmul.msk.bf16.vlgmr.msrb.gmra.mxu1 %vm785_vm4, %v2984_v38  ;;  %v1695_v40 = vsel %vm747_vm10, %v2984_v38, 0 }
 0xa43   : > { %1704 = vmatpush.bf16.msra.mxu0 %v1695_v40 }
 0xabf   : > { %v1048_v47 = vpop.f32.mrf.mxu1 }
 0xac0   : > { %v1049_v57 = vadd.f32 %v2561_v45, %v1048_v47 }
 0xac2   : > { %v2402_v2 = vmul.f32 -1.442695, %v1049_v57 }
 0xac4   : > { %2576 = vpow2.f32 %v2402_v2  ;;  %v3074_v2 = vpop.permute.xlu2 %1250 }
 0xac7   : > { %v1050_v48 = vpop.f32.mrf.mxu1 }
 0xaca   : > { %v2577_v49 = vpop.eup %2576 }
 0xacb   : > { %v1055_v50 = vadd.f32 1.0, %v2577_v49 }
 0xacc   : > { %v3076_v48 = vpop.permute.xlu2 %1276 }
 0xacd   : > { %2578 = vrcp.f32 %v1055_v50  ;;  %v1067_v54 = vand.u32 2147483648, %v1055_v50  ;;  %v1065_v56 = vand.u32 2147483647, %v1055_v50  ;;  %vm1061_vm10 = vweird.f32 %v1055_v50 }
 0xace   : > { %2580 = vrcp.f32 %v495_v4 }
 0xacf   : > { %v1068_v58 = vor.u32 1.1754944e-38, %v1067_v54  ;;  %vm1066_vm12 = vcmp.eq.f32.partialorder %v1065_v56, 8.507059e+37 }
 0xad3   : > { %v2579_v51 = vpop.eup %2578 }
 0xad4   : > { %v1057_v52 = vmul.f32 %v2579_v51, %v1055_v50  ;;  %vm1062_vm11 = vweird.f32 %v2579_v51  ;;  %v2581_v7 = vpop.eup %2580 }
 0xad5   : > { %vm1063_vm3 = vmor %vm1061_vm10, %vm1062_vm11  ;;  %v497_v12 = vmul.f32 %v2581_v7, %v495_v4  ;;  %vm502_vm13 = vweird.f32 %v2581_v7  ;;  %vm506_vm11 = vcmp.eq.f32.partialorder %v505_v19, 8.507059e+37  ;;  %vm1206_vm10 = vcmp.eq.s32.totalorder %v2723_v1, 3 }
 0xad6   : > { %v1058_v53 = vsub.f32 1.0, %v1057_v52  ;;  %vm503_vm15 = vmor %vm501_vm8, %vm502_vm13  ;;  %vm3466_vm8 = vcmp.eq.s32.totalorder %v2723_v1, 7  ;;  %vm3474_vm13 = vcmp.eq.s32.totalorder %v2801_v39, %v2723_v1 }
 0xad7   : > { %v498_v13 = vsub.f32 1.0, %v497_v12 }
 0xad8   : > { %v1059_v55 = vmul.f32 %v2579_v51, %v1058_v53 }
 0xad9   : > { %v499_v14 = vmul.f32 %v2581_v7, %v498_v13 }
 0xada   : > { %v1060_v59 = vadd.f32 %v2579_v51, %v1059_v55 }
 0xadb   : > { %v500_v18 = vadd.f32 %v2581_v7, %v499_v14 }
 0xadc   : > { %v1064_v60 = vsel %vm1063_vm3, %v2579_v51, %v1060_v59  ;;  %vm1242_vm3 = vcmp.eq.s32.totalorder %v2723_v1, 5 }
 0xadd   : > { %v1069_v62 = vsel %vm1066_vm12, %v1068_v58, %v1064_v60  ;;  %v504_v22 = vsel %vm503_vm15, %v2581_v7, %v500_v18  ;;  %vm1268_vm12 = vcmp.eq.s32.totalorder %v2723_v1, 6  ;;  %vm3475_vm15 = vmmov %vm3474_vm13 }
 0xade   : > { %v1071_v63 = vmul.f32 %v1069_v62, %v1049_v57  ;;  %v509_v23 = vsel %vm506_vm11, %v508_v21, %v504_v22  ;;  %v2638_v21 = vmov 6  }
 0xadf   : > { %v3016_v25 = vmul.f32 %v509_v23, %v491_v41 }
 0xae0   : > { %v1072_v0 = vpack.c.bf16 %v1071_v63, %v1071_v63  ;;  %v2637_v63 = vmov 3  }
 0xae2   : > { %2411 = vmatmul.msk.bf16.vlgmr.msrb.gmra.mxu3 %vm785_vm4, %v1072_v0 }
 0xb65   : > { %v1101_v24 = vpop.f32.mrf.mxu3 }
 0xb66   : > { %1123 = vmatpush.msra.mxu1 %v1101_v24 }
 0xb67   : > { %2412 = vmatmul.msk.f32.vlgmr.msra.gmra.mxu1 %vm492_vm9, %v3016_v25 }
 0xb6d   : > { %v1103_v26 = vpop.f32.mrf.mxu3 }
 0xbe4   : > { %v1125_v27 = vpop.f32.mrf.mxu1 }
 0xbe5   : > { %2582 = vtanh.f32 %v1125_v27 }
 0xbeb   : > { %v2583_v28 = vpop.eup %2582 }
 0xbec   : > { %v1129_v29 = vmul.f32 0.1, %v2583_v28 }
 0xbee   : > { %v3021_v30 = vadd.f32 %v1129_v29, %v2735_v3 }
 0xbf0   : > { %v1152_v31 = vmul.f32 %v3021_v30, %v2772_v10  ;;  %v1138_v32 = vmul.f32 %v3021_v30, %v2764_v6  ;;  %v1132_v20 = vmul.f32 %v3021_v30, %v2762_v5  ;;  %v1175_v33 = vmul.f32 %v3021_v30, %v2770_v9 }
 0xbf1   : > { %v1158_v34 = vmul.f32 %v3021_v30, %v2774_v11  ;;  %v1151_v36 = vmul.f32 %v3021_v30, %v2786_v16  ;;  %v1131_v40 = vmul.f32 %v3021_v30, %v2735_v3  ;;  %v1195_v41 = vmul.f32 %v3039_v35, %v3021_v30 }
 0xbf2   : > { %1154 = vrot.lane.b32.xlu0 %v1152_v31, %s2628_s18  ;;  %1140 = vrot.lane.b32.xlu2 %v1138_v32, %s2623_s0  ;;  %v3059_v45 = vmul.f32 %v3055_v44, %v3021_v30  ;;  %v1191_v47 = vmul.f32 %v3053_v43, %v3021_v30  ;;  %v1217_v57 = vmul.f32 %v3064_v46, %v3021_v30 }
 0xbf3   : > { %1134 = vrot.lane.b32.xlu1 %v1132_v20, %s2628_s18  ;;  %v1253_v27 = vmul.f32 %v3074_v2, %v3021_v30  ;;  %v1279_v28 = vmul.f32 %v3076_v48, %v3021_v30 }
 0xbfa   : > { %1171 = vrot.lane.b32.xlu0 %v1138_v32, %s2628_s18  ;;  %1177 = vrot.lane.b32.xlu2 %v1175_v33, %s2623_s0 }
 0xbfb   : > { %1160 = vrot.lane.b32.xlu1 %v1158_v34, %s2623_s0 }
 0xc02   : > { %1202 = vrot.lane.b32.xlu0 %v1151_v36, %s2623_s0  ;;  %1219 = vrot.lane.b32.xlu2 %v1131_v40, %s2628_s18 }
 0xc03   : > { %1197 = vrot.lane.b32.xlu1 %v1195_v41, %s2628_s18 }
 0xc0a   : > { %1234 = vrot.lane.b32.xlu0 %v1151_v36, %s2628_s18  ;;  %1285 = vrot.lane.b32.xlu2 %v1195_v41, %s2623_s0 }
 0xc0b   : > { %1223 = vrot.lane.b32.xlu1 %v1132_v20, %s2623_s0 }
 0xc12   : > { %1259 = vrot.lane.b32.xlu0 %v3059_v45, %s2628_s18 }
 0xc13   : > { %1238 = vrot.lane.b32.xlu1 %v1152_v31, %s2623_s0 }
 0xc1a   : > { %1281 = vrot.lane.b32.xlu0 %v1191_v47, %s2628_s18 }
 0xc1b   : > { %1264 = vrot.lane.b32.xlu1 %v1217_v57, %s2623_s0 }
 0xc22   : > { %1301 = vrot.lane.b32.xlu0 %v1131_v40, %s2623_s0 }
 0xc23   : > { %1297 = vrot.lane.b32.xlu1 %v1217_v57, %s2628_s18 }
 0xc4c   : > { %v1141_v49 = vpop.permute.xlu2 %1140 }
 0xc54   : > { %v1178_v58 = vpop.permute.xlu2 %1177 }
 0xc5c   : > { %v1220_v13 = vpop.permute.xlu2 %1219 }
 0xc5d   : > { %v1222_v14 = vadd.f32 %v1220_v13, %v1217_v57 }
 0xc64   : > { %v1155_v50 = vpop.permute.xlu0 %1154  ;;  %v1286_v33 = vpop.permute.xlu2 %1285 }
 0xc65   : > { %v1135_v51 = vpop.permute.xlu1 %1134  ;;  %v1157_v54 = vadd.f32 %v1155_v50, %v1151_v36 }
 0xc66   : > { %v1137_v52 = vadd.f32 %v1135_v51, %v1131_v40 }
 0xc68   : > { %v1143_v53 = vadd.f32 %v1141_v49, %v1137_v52 }
 0xc6a   : > { %1146 = vperm.xlu2 %2528, %v1143_v53  }
 0xc6c   : > { %v1172_v55 = vpop.permute.xlu0 %1171 }
 0xc6d   : > { %v1174_v56 = vadd.f32 %v1172_v55, %v1132_v20  ;;  %v1161_v59 = vpop.permute.xlu1 %1160 }
 0xc6e   : > { %v1163_v60 = vadd.f32 %v1161_v59, %v1157_v54 }
 0xc6f   : > { %v1180_v62 = vadd.f32 %v1178_v58, %v1174_v56 }
 0xc70   : > { %1166 = vperm.xlu1 %2527, %v1163_v60  }
 0xc71   : > { %1183 = vperm.xlu0 %2526, %v1180_v62  }
 0xc72   : > { %2529 = vset.pattern.permute.xlu2 %v2637_v63 }
 0xc74   : > { %v1203_v0 = vpop.permute.xlu0 %1202 }
 0xc75   : > { %v1198_v4 = vpop.permute.xlu1 %1197 }
 0xc76   : > { %v1200_v7 = vadd.f32 %v1198_v4, %v1191_v47 }
 0xc78   : > { %v1205_v12 = vadd.f32 %v1203_v0, %v1200_v7  ;;  %2530 = vset.pattern.permute.xlu1 %v2637_v63 }
 0xc79   : > { %2531 = vset.pattern.permute.xlu0 %v2637_v63 }
 0xc7a   : > { %1209 = vperm.xlu2 %2529, %v1205_v12  }
 0xc7c   : > { %v1235_v17 = vpop.permute.xlu0 %1234 }
 0xc7d   : > { %v1224_v18 = vpop.permute.xlu1 %1223  ;;  %v1237_v22 = vadd.f32 %v1235_v17, %v1195_v41 }
 0xc7e   : > { %v1226_v19 = vadd.f32 %v1224_v18, %v1222_v14 }
 0xc80   : > { %1229 = vperm.xlu1 %2530, %v1226_v19  }
 0xc82   : > { %2532 = vset.pattern.permute.xlu2 %v2638_v21 }
 0xc84   : > { %v1260_v23 = vpop.permute.xlu0 %1259 }
 0xc85   : > { %v1239_v24 = vpop.permute.xlu1 %1238  ;;  %v1262_v29 = vadd.f32 %v1260_v23, %v1253_v27 }
 0xc86   : > { %v1241_v26 = vadd.f32 %v1239_v24, %v1237_v22 }
 0xc88   : > { %1245 = vperm.xlu0 %2531, %v1241_v26   ;;  %2533 = vset.pattern.permute.xlu1 %v2638_v21 }
 0xc8c   : > { %v1282_v31 = vpop.permute.xlu0 %1281 }
 0xc8d   : > { %v1284_v32 = vadd.f32 %v1282_v31, %v1279_v28  ;;  %v1265_v20 = vpop.permute.xlu1 %1264 }
 0xc8e   : > { %v1267_v34 = vadd.f32 %v1265_v20, %v1262_v29 }
 0xc8f   : > { %v1288_v36 = vadd.f32 %v1286_v33, %v1284_v32 }
 0xc90   : > { %1271 = vperm.xlu2 %2532, %v1267_v34   ;;  %2535 = vset.pattern.permute.xlu0 %v2629_v15 }
 0xc91   : > { %1292 = vperm.xlu1 %2533, %v1288_v36  }
 0xc94   : > { %v1302_v47 = vpop.permute.xlu0 %1301 }
 0xc95   : > { %v1298_v40 = vpop.permute.xlu1 %1297 }
 0xc96   : > { %v1300_v41 = vadd.f32 %v1298_v40, %v3059_v45 }
 0xc98   : > { %v1304_v57 = vadd.f32 %v1302_v47, %v1300_v41 }
 0xc99   : > { %2534 = vset.pattern.permute.xlu1 %v2629_v15 }
 0xc9a   : > { %1307 = vperm.xlu2 %2532, %v1304_v57  }
 0xca2   : > { %2536 = vset.pattern.permute.xlu2 %v2629_v15 }
 0xcc4   : > { %v1147_v30 = vpop.permute.xlu2 %1146 }
 0xcc5   : > { %v1149_v52 = vsel %vm511_vm0, %v1147_v30, 0.0 }
 0xcd4   : > { %v1210_v53 = vpop.permute.xlu2 %1209 }
 0xcd5   : > { %v1212_v59 = vsel %vm1206_vm10, %v1210_v53, 0.0 }
 0xce2   : > { %v1167_v49 = vpop.permute.xlu1 %1166 }
 0xce3   : > { %v1169_v50 = vsel %vm566_vm5, %v1167_v49, 0.0  ;;  %v1184_v51 = vpop.permute.xlu0 %1183 }
 0xce4   : > { %v1170_v54 = vadd.f32 %v1169_v50, %v1149_v52  ;;  %v1186_v45 = vsel %vm587_vm6, %v1184_v51, 0.0 }
 0xce6   : > { %v1187_v55 = vadd.f32 %v1186_v45, %v1170_v54 }
 0xce8   : > { %v1213_v0 = vadd.f32 %v1212_v59, %v1187_v55 }
 0xcea   : > { %v1272_v62 = vpop.permute.xlu2 %1271 }
 0xceb   : > { %v1274_v13 = vsel %vm1268_vm12, %v1272_v62, 0.0 }
 0xcf2   : > { %v1230_v56 = vpop.permute.xlu1 %1229 }
 0xcf3   : > { %v1232_v58 = vsel %vm512_vm1, %v1230_v56, 0.0 }
 0xcf4   : > { %v1233_v7 = vadd.f32 %v1232_v58, %v1213_v0  ;;  %v1308_v14 = vpop.permute.xlu2 %1307 }
 0xcf5   : > { %v1310_v23 = vsel %vm3465_vm2, %v1308_v14, 0.0 }
 0xcfa   : > { %v1246_v60 = vpop.permute.xlu0 %1245 }
 0xcfb   : > { %v1248_v4 = vsel %vm1242_vm3, %v1246_v60, 0.0 }
 0xcfc   : > { %v1249_v12 = vadd.f32 %v1248_v4, %v1233_v7 }
 0xcfe   : > { %v1275_v18 = vadd.f32 %v1274_v13, %v1249_v12 }
 0xd03   : > { %v1293_v17 = vpop.permute.xlu1 %1292 }
 0xd04   : > { %v1295_v19 = vsel %vm3466_vm8, %v1293_v17, 0.0 }
 0xd05   : > { %v1296_v22 = vadd.f32 %v1295_v19, %v1275_v18 }
 0xd07   : > { %v3113_v24 = vadd.f32 %v1310_v23, %v1296_v22 }
 0xd09   : > { %v1333_v26 = vmul.f32 %v3113_v24, %v2772_v10  ;;  %v1319_v27 = vmul.f32 %v3113_v24, %v2764_v6  ;;  %v1313_v28 = vmul.f32 %v3113_v24, %v2762_v5  ;;  %v1356_v29 = vmul.f32 %v3113_v24, %v2770_v9 }
 0xd0a   : > { %v1339_v31 = vmul.f32 %v3113_v24, %v2774_v11  ;;  %v1332_v32 = vmul.f32 %v3113_v24, %v2786_v16  ;;  %v1312_v20 = vmul.f32 %v3113_v24, %v2735_v3  ;;  %v1370_v33 = vmul.f32 %v3113_v24, %v3039_v35 }
 0xd0b   : > { %1335 = vrot.lane.b32.xlu0 %v1333_v26, %s2628_s18  ;;  %1321 = vrot.lane.b32.xlu2 %v1319_v27, %s2623_s0  ;;  %v1388_v34 = vmul.f32 %v3113_v24, %v3064_v46  ;;  %v1369_v36 = vmul.f32 %v3113_v24, %v3053_v43  ;;  %v1421_v40 = vmul.f32 %v3113_v24, %v3055_v44 }
 0xd0c   : > { %1315 = vrot.lane.b32.xlu1 %v1313_v28, %s2628_s18  ;;  %v1420_v22 = vmul.f32 %v3113_v24, %v3074_v2 }
 0xd13   : > { %1352 = vrot.lane.b32.xlu0 %v1319_v27, %s2628_s18  ;;  %1358 = vrot.lane.b32.xlu2 %v1356_v29, %s2623_s0 }
 0xd14   : > { %1341 = vrot.lane.b32.xlu1 %v1339_v31, %s2623_s0 }
 0xd1b   : > { %1377 = vrot.lane.b32.xlu0 %v1332_v32, %s2623_s0  ;;  %1390 = vrot.lane.b32.xlu2 %v1312_v20, %s2628_s18 }
 0xd1c   : > { %1372 = vrot.lane.b32.xlu1 %v1370_v33, %s2628_s18 }
 0xd23   : > { %1405 = vrot.lane.b32.xlu0 %v1332_v32, %s2628_s18  ;;  %1409 = vrot.lane.b32.xlu2 %v1333_v26, %s2623_s0 }
 0xd24   : > { %1394 = vrot.lane.b32.xlu1 %v1313_v28, %s2623_s0 }
 0xd2b   : > { %1428 = vrot.lane.b32.xlu0 %v1388_v34, %s2623_s0  ;;  %1441 = vrot.lane.b32.xlu2 %v1369_v36, %s2628_s18 }
 0xd2c   : > { %1423 = vrot.lane.b32.xlu1 %v1421_v40, %s2628_s18 }
 0xd33   : > { %1456 = vrot.lane.b32.xlu0 %v1388_v34, %s2628_s18  ;;  %1460 = vrot.lane.b32.xlu2 %v1312_v20, %s2623_s0 }
 0xd34   : > { %1445 = vrot.lane.b32.xlu1 %v1370_v33, %s2623_s0 }
 0xd65   : > { %v1322_v41 = vpop.permute.xlu2 %1321 }
 0xd6d   : > { %v1359_v30 = vpop.permute.xlu2 %1358 }
 0xd75   : > { %v1391_v56 = vpop.permute.xlu2 %1390 }
 0xd76   : > { %v1393_v4 = vadd.f32 %v1391_v56, %v1388_v34 }
 0xd7d   : > { %v1336_v47 = vpop.permute.xlu0 %1335  ;;  %v1410_v0 = vpop.permute.xlu2 %1409 }
 0xd7e   : > { %v1316_v57 = vpop.permute.xlu1 %1315  ;;  %v1338_v51 = vadd.f32 %v1336_v47, %v1332_v32 }
 0xd7f   : > { %v1318_v49 = vadd.f32 %v1316_v57, %v1312_v20 }
 0xd81   : > { %v1324_v50 = vadd.f32 %v1322_v41, %v1318_v49 }
 0xd83   : > { %1327 = vperm.xlu1 %2534, %v1324_v50  }
 0xd85   : > { %v1353_v52 = vpop.permute.xlu0 %1352  ;;  %v1442_v18 = vpop.permute.xlu2 %1441 }
 0xd86   : > { %v1355_v53 = vadd.f32 %v1353_v52, %v1313_v28  ;;  %v1342_v54 = vpop.permute.xlu1 %1341  ;;  %v1439_v28 = vmul.f32 %v3113_v24, %v3076_v48 }
 0xd87   : > { %v1344_v45 = vadd.f32 %v1342_v54, %v1338_v51 }
 0xd88   : > { %v1361_v55 = vadd.f32 %v1359_v30, %v1355_v53  ;;  %v1444_v29 = vadd.f32 %v1442_v18, %v1439_v28 }
 0xd89   : > { %1347 = vperm.xlu0 %2535, %v1344_v45  }
 0xd8a   : > { %1364 = vperm.xlu2 %2536, %v1361_v55  }
 0xd8b   : > { %2537 = vset.pattern.permute.xlu1 %v2637_v63 }
 0xd8d   : > { %v1378_v59 = vpop.permute.xlu0 %1377 }
 0xd8e   : > { %v1373_v58 = vpop.permute.xlu1 %1372 }
 0xd8f   : > { %v1375_v60 = vadd.f32 %v1373_v58, %v1369_v36 }
 0xd91   : > { %v1380_v62 = vadd.f32 %v1378_v59, %v1375_v60  ;;  %2539 = vset.pattern.permute.xlu0 %v2638_v21 }
 0xd92   : > { %2538 = vset.pattern.permute.xlu2 %v2637_v63 }
 0xd93   : > { %1383 = vperm.xlu1 %2537, %v1380_v62  }
 0xd95   : > { %v1406_v7 = vpop.permute.xlu0 %1405 }
 0xd96   : > { %v1408_v12 = vadd.f32 %v1406_v7, %v1370_v33  ;;  %v1395_v13 = vpop.permute.xlu1 %1394  ;;  %v1461_v33 = vpop.permute.xlu2 %1460 }
 0xd97   : > { %v1397_v14 = vadd.f32 %v1395_v13, %v1393_v4 }
 0xd98   : > { %v1412_v17 = vadd.f32 %v1410_v0, %v1408_v12 }
 0xd99   : > { %1400 = vperm.xlu2 %2538, %v1397_v14  }
 0xd9b   : > { %1415 = vperm.xlu1 %2537, %v1412_v17  }
 0xd9d   : > { %v1429_v19 = vpop.permute.xlu0 %1428 }
 0xd9e   : > { %v1424_v23 = vpop.permute.xlu1 %1423 }
 0xd9f   : > { %v1426_v26 = vadd.f32 %v1424_v23, %v1420_v22  ;;  %v2598_v23 = vld [vmem:[%s2759_s23] sm:$0xff] }
 0xda1   : > { %v1431_v27 = vadd.f32 %v1429_v19, %v1426_v26  ;;  %2540 = vset.pattern.permute.xlu2 %v2638_v21 }
 0xda3   : > { %1434 = vperm.xlu0 %2539, %v1431_v27   ;;  %2541 = vset.pattern.permute.xlu1 %v2638_v21 }
 0xda5   : > { %v1457_v31 = vpop.permute.xlu0 %1456 }
 0xda6   : > { %v1459_v32 = vadd.f32 %v1457_v31, %v1421_v40  ;;  %v1446_v20 = vpop.permute.xlu1 %1445 }
 0xda7   : > { %v1448_v34 = vadd.f32 %v1446_v20, %v1444_v29 }
 0xda8   : > { %v1463_v36 = vadd.f32 %v1461_v33, %v1459_v32 }
 0xda9   : > { %1451 = vperm.xlu2 %2540, %v1448_v34  }
 0xdaa   : > { %1466 = vperm.xlu1 %2541, %v1463_v36  }
 0xdab   : > { %2544 = vset.pattern.permute.xlu0 %v2629_v15 }
 0xdb1   : > { %2542 = vset.pattern.permute.xlu2 %v2629_v15 }
 0xdb2   : > { %2543 = vset.pattern.permute.xlu1 %v2629_v15 }
 0xde4   : > { %v1365_v49 = vpop.permute.xlu2 %1364 }
 0xde5   : > { %v1367_v51 = vsel %vm587_vm6, %v1365_v49, 0.0 }
 0xdf3   : > { %v1401_v54 = vpop.permute.xlu2 %1400 }
 0xdf4   : > { %v1403_v56 = vsel %vm512_vm1, %v1401_v54, 0.0 }
 0xdf5   : > { %v1328_v41 = vpop.permute.xlu1 %1327 }
 0xdf6   : > { %v1330_v40 = vsel %vm511_vm0, %v1328_v41, 0.0 }
 0xdfb   : > { %v1348_v47 = vpop.permute.xlu0 %1347 }
 0xdfc   : > { %v1350_v30 = vsel %vm566_vm5, %v1348_v47, 0.0 }
 0xdfd   : > { %v1351_v50 = vadd.f32 %v1350_v30, %v1330_v40 }
 0xdff   : > { %v1368_v53 = vadd.f32 %v1367_v51, %v1351_v50 }
 0xe03   : > { %v1452_v4 = vpop.permute.xlu2 %1451 }
 0xe04   : > { %v1454_v12 = vsel %vm3466_vm8, %v1452_v4, 0.0 }
 0xe05   : > { %v1384_v57 = vpop.permute.xlu1 %1383 }
 0xe06   : > { %v1386_v52 = vsel %vm1206_vm10, %v1384_v57, 0.0 }
 0xe07   : > { %v1387_v45 = vadd.f32 %v1386_v52, %v1368_v53 }
 0xe09   : > { %v1404_v58 = vadd.f32 %v1403_v56, %v1387_v45 }
 0xe0d   : > { %v1416_v55 = vpop.permute.xlu1 %1415 }
 0xe0e   : > { %v1418_v59 = vsel %vm1242_vm3, %v1416_v55, 0.0 }
 0xe0f   : > { %v1419_v62 = vadd.f32 %v1418_v59, %v1404_v58 }
 0xe15   : > { %v1435_v60 = vpop.permute.xlu0 %1434 }
 0xe16   : > { %v1437_v0 = vsel %vm1268_vm12, %v1435_v60, 0.0 }
 0xe17   : > { %v1438_v7 = vadd.f32 %v1437_v0, %v1419_v62 }
 0xe19   : > { %v1455_v13 = vadd.f32 %v1454_v12, %v1438_v7 }
 0xe1c   : > { %v1467_v14 = vpop.permute.xlu1 %1466 }
 0xe1d   : > { %v1469_v17 = vsel %vm3465_vm2, %v1467_v14, 0.0 }
 0xe1e   : > { %v1470_v18 = vadd.f32 %v1469_v17, %v1455_v13  ;;  %v2493_v13 = vld [vmem:[%s3451_s7 + $0x18] sm:$0xff] }
 0xe20   : > { %v1471_v19 = vperm.slane %v1470_v18, 0 }
 0xe22   : > { %1483 = vrot.lane.b32.xlu0 %v1471_v19, %s2624_s14  ;;  %1503 = vrot.lane.b32.xlu1 %v1471_v19, %s3471_s26  ;;  %v1472_v47 = vmul.f32 %v2598_v23, %v1471_v19 }
 0xe23   : > { %1474 = vrot.lane.b32.xlu2 %v1471_v19, %s2623_s0 }
 0xe2a   : > { %1499 = vrot.lane.b32.xlu0 %v1471_v19, %s2628_s18  ;;  %1532 = vrot.lane.b32.xlu1 %v1471_v19, %s3472_s27 }
 0xe2b   : > { %1512 = vrot.lane.b32.xlu2 %v1471_v19, %s3473_s17  ;;  %v2492_v19 = vld [vmem:[%s3451_s7 + $0x10] sm:$0xff] }
 0xe7d   : > { %v1475_v22 = vpop.permute.xlu2 %1474 }
 0xe7e   : > { %v1477_v26 = vmul.f32 %v2598_v23, %v1475_v22 }
 0xe80   : > { %1479 = vrot.lane.b32.xlu2 %v1477_v26, %s2628_s18 }
 0xe85   : > { %v1513_v27 = vpop.permute.xlu2 %1512 }
 0xe86   : > { %v1515_v28 = vmul.f32 %v2598_v23, %v1513_v27 }
 0xe88   : > { %1517 = vrot.lane.b32.xlu2 %v1515_v28, %s2623_s0 }
 0xe94   : > { %v1484_v29 = vpop.permute.xlu0 %1483  ;;  %v1504_v31 = vpop.permute.xlu1 %1503 }
 0xe95   : > { %v1486_v32 = vmul.f32 %v2598_v23, %v1484_v29  ;;  %v1506_v20 = vmul.f32 %v2598_v23, %v1504_v31 }
 0xe97   : > { %1488 = vrot.lane.b32.xlu0 %v1486_v32, %s2623_s0  ;;  %1508 = vrot.lane.b32.xlu1 %v1506_v20, %s2628_s18 }
 0xe9c   : > { %v1533_v33 = vpop.permute.xlu1 %1532  ;;  %v1500_v36 = vpop.permute.xlu0 %1499 }
 0xe9d   : > { %v1535_v34 = vmul.f32 %v2598_v23, %v1533_v33  ;;  %v1502_v57 = vmul.f32 %v2598_v23, %v1500_v36 }
 0xe9f   : > { %1528 = vrot.lane.b32.xlu1 %v1486_v32, %s2628_s18  ;;  %1537 = vrot.lane.b32.xlu0 %v1535_v34, %s2623_s0 }
 0xeda   : > { %v1480_v41 = vpop.permute.xlu2 %1479 }
 0xedb   : > { %v1482_v30 = vadd.f32 %v1480_v41, %v1472_v47 }
 0xee2   : > { %v1518_v52 = vpop.permute.xlu2 %1517 }
 0xf09   : > { %v1489_v49 = vpop.permute.xlu0 %1488  ;;  %v1509_v40 = vpop.permute.xlu1 %1508 }
 0xf0a   : > { %v1491_v50 = vadd.f32 %v1489_v49, %v1482_v30  ;;  %v1511_v51 = vadd.f32 %v1509_v40, %v1502_v57 }
 0xf0c   : > { %v1520_v53 = vadd.f32 %v1518_v52, %v1511_v51  ;;  %1494 = vperm.xlu2 %2542, %v1491_v50  }
 0xf0e   : > { %1523 = vperm.xlu1 %2543, %v1520_v53  }
 0xf11   : > { %v1529_v54 = vpop.permute.xlu1 %1528  ;;  %v1538_v55 = vpop.permute.xlu0 %1537 }
 0xf12   : > { %v1531_v45 = vadd.f32 %v1529_v54, %v1477_v26 }
 0xf14   : > { %v1540_v56 = vadd.f32 %v1538_v55, %v1531_v45 }
 0xf16   : > { %1543 = vperm.xlu0 %2544, %v1540_v56  }
 0xf66   : > { %v1495_v58 = vpop.permute.xlu2 %1494 }
 0xf67   : > { %v1497_v62 = vsel %vm511_vm0, %v1495_v58, 0.0 }
 0xf80   : > { %v1524_v59 = vpop.permute.xlu1 %1523 }
 0xf81   : > { %v1526_v60 = vsel %vm566_vm5, %v1524_v59, 0.0 }
 0xf82   : > { %v1527_v0 = vadd.f32 %v1526_v60, %v1497_v62 }
 0xf88   : > { %v1544_v4 = vpop.permute.xlu0 %1543 }
 0xf89   : > { %v1546_v7 = vsel %vm587_vm6, %v1544_v4, 0.0 }
 0xf8a   : > { %v1547_v12 = vadd.f32 %v1546_v7, %v1527_v0 }
 0xf8c   : > { %2413 = vmatpush.xpose.msk.msra.mxu2 %vm595_vm7, %v1547_v12 }
 0xf8f   : > { %2414 = vmatmul.msk.f32.vlgmr.msra.gmra.mxu2 %vm595_vm7, %v1547_v12 }
0x1012   : > { %v1568_v14 = vpop.f32.mrf.mxu2 }
0x1013   : > { %2415 = vmatpush.msk.msrb.mxu1 %vm3474_vm13, %v1568_v14  ;;  %v1571_v17 = vsel %vm3475_vm15, %v1568_v14, 0.0  ;;  %v1597_v39 = vmul.f32 2.0, %v1568_v14 }
0x1014   : > { %2416 = vmatmul.msk.f32.vlgmr.msrb.gmra.mxu1 %vm492_vm9, %v2630_v42  ;;  %v1572_v18 = vsel %vm492_vm9, %v1571_v17, 0.0 }
0x1015   : > { %1767 = vmatpush.bf16.msra.mxu1 %v2493_v13  ;;  %1573 = vadd.xlane.f32.xlu2 %v1572_v18 }
0x1019   : > { %1768 = vmatpush.bf16.msra.mxu1 %v2492_v19 }
0x101c   : > { %2443 = vmatmul.msk.bf16.vlgmr.msra.gmra.mxu1 %vm785_vm4, %v2984_v38 }
0x1088   : > { %v1574_v26 = vpop.xlane.xlu2 %1573 }
0x1091   : > { %v1592_v22 = vpop.f32.mrf.mxu1 }
0x1092   : > { %v1595_v23 = vperm.slane %v1592_v22, 0 }
0x1094   : > { %v1596_v27 = vadd.f32 %v1595_v23, %v1574_v26 }
0x1096   : > { %v1598_v28 = vsub.f32 %v1596_v27, %v1597_v39 }
0x1098   : > { %v1599_v29 = vmax.f32 %v1598_v28, 0.0 }
0x1099   : > { %v3223_v42 = vpop.f32.mrf.mxu1 }
0x109a   : > { %v1600_v31 = vadd.f32 1e-12, %v1599_v29 }
0x109c   : > { %2584 = vrsqrt.f32 %v1600_v31  ;;  %vm1608_vm7 = vcmp.eq.f32.partialorder %v1600_v31, inf  ;;  %v1611_v38 = vand.u32 2147483648, %v1600_v31  ;;  %vm1610_vm11 = vcmp.eq.f32.partialorder %v1600_v31, 0.0 }
0x10a1   : > { %v1772_v32 = vpop.f32.mrf.mxu1 }
0x10a2   : > { %v2585_v20 = vpop.eup %2584 }
0x10a3   : > { %v1602_v33 = vmul.f32 %v2585_v20, %v1600_v31 }
0x10a5   : > { %v1603_v34 = vmul.f32 %v2585_v20, %v1602_v33 }
0x10a7   : > { %v1604_v36 = vmul.f32 0.5, %v1603_v34 }
0x10a9   : > { %v1605_v41 = vsub.f32 1.5, %v1604_v36 }
0x10ab   : > { %v1606_v47 = vmul.f32 %v2585_v20, %v1605_v41 }
0x10ad   : > { %v1607_v57 = vmul.f32 %v1606_v47, %v1600_v31 }
0x10af   : > { %v1609_v30 = vsel %vm1608_vm7, %v1600_v31, %v1607_v57 }
0x10b0   : > { %v1612_v49 = vsel %vm1610_vm11, %v1611_v38, %v1609_v30 }
0x10b1   : > { %v1616_v40 = vsel %vm2825_vm14, %v1612_v49, 1e+30  ;;  %v1613_v54 = vsub.f32 0.0, %v1612_v49 }
0x10b2   : > { %v1617_v50 = vsel %vm492_vm9, %v1616_v40, inf  ;;  %vm1621_vm13 = vcmp.lt.f32.partialorder %v1616_v40, 1e+30 }
0x10b3   : > { %1618 = vmin.xlane.f32.xlu1 %v1617_v50  ;;  %v1614_v45 = vmul.f32 1.442695, %v1613_v54 }
0x10b5   : > { %2586 = vpow2.f32 %v1614_v45 }
0x10bb   : > { %v2587_v56 = vpop.eup %2586 }
0x1126   : > { %v1619_v51 = vpop.xlane.xlu1 %1618 }
0x1127   : > { %vm1620_vm15 = vcmp.le.f32.partialorder %v1616_v40, %v1619_v51 }
0x1128   : > { %vm1622_vm2 = vmand %vm1620_vm15, %vm1621_vm13 }
0x1129   : > { %v1623_v52 = vsel %vm1622_vm2, %v2833_v8, 8.0 }
0x112a   : > { %v1624_v53 = vsel %vm492_vm9, %v1623_v52, inf }
0x112b   : > { %1625 = vmin.xlane.f32.xlu0 %v1624_v53 }
0x119e   : > { %v1626_v55 = vpop.xlane.xlu0 %1625 }
0x119f   : > { %vm1627_vm7 = vcmp.eq.f32.partialorder %v2833_v8, %v1626_v55  ;;  %v2494_v55 = vld [vmem:[%s3452_s8 + $0x10] sm:$0xff] }
0x11a0   : > { %v1628_v61 = vsel %vm1627_vm7, %v2587_v56, 0.0  ;;  %v1630_v59 = vsel %vm1627_vm7, 1e+30, %v1616_v40 }
0x11a1   : > { %v1631_v58 = vsel %vm492_vm9, %v1630_v59, inf  ;;  %vm1635_vm14 = vcmp.lt.f32.partialorder %v1630_v59, 1e+30 }
0x11a2   : > { %1632 = vmin.xlane.f32.xlu2 %v1631_v58  ;;  %v2497_v58 = vld [vmem:[%s3454_s10 + $0x18] sm:$0xff] }
0x11a3   : > { %1814 = vmatpush.bf16.msra.mxu3 %v2497_v58 }
0x1215   : > { %v1633_v60 = vpop.xlane.xlu2 %1632 }
0x1216   : > { %vm1634_vm11 = vcmp.le.f32.partialorder %v1630_v59, %v1633_v60  ;;  %v2496_v60 = vld [vmem:[%s3454_s10 + $0x10] sm:$0xff] }
0x1217   : > { %vm1636_vm13 = vmand %vm1634_vm11, %vm1635_vm14  ;;  %1815 = vmatpush.bf16.msra.mxu3 %v2496_v60 }
0x1218   : > { %v1637_v62 = vsel %vm1636_vm13, %v2833_v8, 8.0 }
0x1219   : > { %v1638_v0 = vsel %vm492_vm9, %v1637_v62, inf  ;;  %v2562_v62 = vld [vmem:[%s3453_s9 + $0x1] ss:$0 sm:$0xff] }
0x121a   : > { %1639 = vmin.xlane.f32.xlu1 %v1638_v0 }
0x128d   : > { %v1640_v4 = vpop.xlane.xlu1 %1639 }
0x128e   : > { %vm1641_vm2 = vcmp.eq.f32.partialorder %v2833_v8, %v1640_v4 }
0x128f   : > { %v1642_v7 = vsel %vm1641_vm2, %v2587_v56, 0.0  ;;  %v1644_v12 = vsel %vm1641_vm2, 1e+30, %v1630_v59 }
0x1290   : > { %v1643_v13 = vadd.f32 %v1642_v7, %v1628_v61  ;;  %v1645_v14 = vsel %vm492_vm9, %v1644_v12, inf  ;;  %vm1649_vm15 = vcmp.lt.f32.partialorder %v1644_v12, 1e+30 }
0x1291   : > { %1646 = vmin.xlane.f32.xlu2 %v1645_v14 }
0x1304   : > { %v1647_v17 = vpop.xlane.xlu2 %1646 }
0x1305   : > { %vm1648_vm7 = vcmp.le.f32.partialorder %v1644_v12, %v1647_v17 }
0x1306   : > { %vm1650_vm8 = vmand %vm1648_vm7, %vm1649_vm15 }
0x1307   : > { %v1651_v18 = vsel %vm1650_vm8, %v2833_v8, 8.0 }
0x1308   : > { %v1652_v19 = vsel %vm492_vm9, %v1651_v18, inf  ;;  %v2563_v18 = vld [vmem:[%s3455_s11 + $0x1] ss:$0 sm:$0xff] }
0x1309   : > { %1653 = vmin.xlane.f32.xlu1 %v1652_v19  ;;  %v2499_v19 = vld [vmem:[%s3456_s12 + $0x18] sm:$0xff] }
0x130a   : > { %1868 = vmatpush.bf16.msrb.mxu0 %v2499_v19 }
0x137c   : > { %v1654_v22 = vpop.xlane.xlu1 %1653 }
0x137d   : > { %vm1655_vm14 = vcmp.eq.f32.partialorder %v2833_v8, %v1654_v22 }
0x137e   : > { %v1656_v23 = vsel %vm1655_vm14, %v2587_v56, 0.0  ;;  %v1658_v26 = vsel %vm1655_vm14, 1e+30, %v1644_v12 }
0x137f   : > { %v1657_v39 = vadd.f32 %v1656_v23, %v1643_v13  ;;  %v1659_v27 = vsel %vm492_vm9, %v1658_v26, inf  ;;  %vm1663_vm8 = vcmp.lt.f32.partialorder %v1658_v26, 1e+30  ;;  %v2498_v23 = vld [vmem:[%s3456_s12 + $0x10] sm:$0xff] }
0x1380   : > { %1660 = vmin.xlane.f32.xlu0 %v1659_v27  ;;  %1869 = vmatpush.bf16.msrb.mxu0 %v2498_v23 }
0x1394   : > { %1900 = vrot.lane.b32.xlu0 %v3113_v24, %s2623_s0 }
0x139c   : > { %1909 = vrot.lane.b32.xlu0 %v3113_v24, %s2624_s14 }
0x13a4   : > { %1958 = vrot.lane.b32.xlu0 %v3113_v24, %s3472_s27 }
0x13ac   : > { %2038 = vrot.lane.b32.xlu0 %v3113_v24, %s2632_s21 }
0x13f3   : > { %v1661_v28 = vpop.xlane.xlu0 %1660 }
0x13f4   : > { %vm1662_vm11 = vcmp.le.f32.partialorder %v1658_v26, %v1661_v28 }
0x13f5   : > { %vm1664_vm13 = vmand %vm1662_vm11, %vm1663_vm8 }
0x13f6   : > { %v1665_v29 = vsel %vm1664_vm13, %v2833_v8, 8.0 }
0x13f7   : > { %v1666_v31 = vsel %vm492_vm9, %v1665_v29, inf }
0x13f8   : > { %1667 = vmin.xlane.f32.xlu2 %v1666_v31 }
0x1410   : > { %1938 = vrot.lane.b32.xlu2 %v3113_v24, %s3473_s17 }
0x1418   : > { %1925 = vrot.lane.b32.xlu2 %v3113_v24, %s2628_s18 }
0x1420   : > { %1999 = vrot.lane.b32.xlu2 %v3113_v24, %s2634_s22 }
0x1428   : > { %2034 = vrot.lane.b32.xlu2 %v3113_v24, %s2635_s24 }
0x1430   : > { %2059 = vrot.lane.b32.xlu2 %v3113_v24, %s2636_s25 }
0x146b   : > { %v1668_v32 = vpop.xlane.xlu2 %1667 }
0x146c   : > { %vm1669_vm2 = vcmp.eq.f32.partialorder %v2833_v8, %v1668_v32  ;;  %v2495_v8 = vld [vmem:[%s3452_s8 + $0x18] sm:$0xff] }
0x146d   : > { %v1670_v20 = vsel %vm1669_vm2, %v2587_v56, 0.0  ;;  %1742 = vmatpush.bf16.msrb.mxu2 %v2495_v8 }
0x146e   : > { %v1671_v33 = vadd.f32 %v1670_v20, %v1657_v39 }
0x1470   : > { %v1672_v34 = vsel %vm492_vm9, %v1671_v33, 0.0 }
0x1471   : > { %1673 = vadd.xlane.f32.xlu1 %v1672_v34  ;;  %1743 = vmatpush.bf16.msrb.mxu2 %v2494_v55 }
0x148a   : > { %1929 = vrot.lane.b32.xlu1 %v3113_v24, %s3471_s26 }
0x1492   : > { %1978 = vrot.lane.b32.xlu1 %v3113_v24, %s2633_s20 }
0x149a   : > { %1974 = vrot.lane.b32.xlu1 %v3113_v24, %s2631_s30  ;;  %s432_s30 = scalar_lea.vmem %s3457_s13, %s2751_s19 }
0x14e4   : > { %v1674_v36 = vpop.xlane.xlu1 %1673 }
0x14e5   : > { %v1675_v41 = vadd.f32 1e-09, %v1674_v36 }
0x14e7   : > { %2588 = vrcp.f32 %v1675_v41  ;;  %v1687_v30 = vand.u32 2147483648, %v1675_v41  ;;  %v1685_v40 = vand.u32 2147483647, %v1675_v41  ;;  %vm1681_vm7 = vweird.f32 %v1675_v41 }
0x14e9   : > { %v1688_v51 = vor.u32 1.1754944e-38, %v1687_v30  ;;  %vm1686_vm8 = vcmp.eq.f32.partialorder %v1685_v40, 8.507059e+37 }
0x14ed   : > { %v2589_v47 = vpop.eup %2588 }
0x14ee   : > { %v1677_v57 = vmul.f32 %v2589_v47, %v1675_v41  ;;  %vm1682_vm15 = vweird.f32 %v2589_v47 }
0x14ef   : > { %vm1683_vm14 = vmor %vm1681_vm7, %vm1682_vm15 }
0x14f0   : > { %v1678_v38 = vsub.f32 1.0, %v1677_v57 }
0x14f2   : > { %v1679_v49 = vmul.f32 %v2589_v47, %v1678_v38 }
0x14f4   : > { %v1680_v50 = vadd.f32 %v2589_v47, %v1679_v49  ;;  %v1939_v49 = vpop.permute.xlu2 %1938 }
0x14f6   : > { %v1684_v52 = vsel %vm1683_vm14, %v2589_v47, %v1680_v50 }
0x14f7   : > { %v1689_v53 = vsel %vm1686_vm8, %v1688_v51, %v1684_v52  ;;  %v1901_v51 = vpop.permute.xlu0 %1900 }
0x14f8   : > { %v1690_v54 = vmul.f32 %v1689_v53, %v1671_v33 }
0x14fa   : > { %v1691_v45 = vpack.c.bf16 %v1690_v54, %v1690_v54 }
0x14fc   : > { %2417 = vmatmul.msk.bf16.vlgmr.msra.gmra.mxu0 %vm492_vm9, %v1691_v45  ;;  %v1926_v40 = vpop.permute.xlu2 %1925  ;;  %v1930_v58 = vpop.permute.xlu1 %1929 }
0x14ff   : > { %v1910_v55 = vpop.permute.xlu0 %1909 }
0x1504   : > { %v2000_v52 = vpop.permute.xlu2 %1999 }
0x1579   : > { %v1706_v56 = vpop.f32.mrf.mxu0 }
0x157a   : > { %v1715_v61 = vpack.c.bf16 %v1706_v56, %v1706_v56 }
0x157c   : > { %2434 = vmatmul.msk.bf16.vlgmr.msrb.gmra.mxu2 %vm785_vm4, %v1715_v61 }
0x1581   : > { %v1708_v59 = vpop.f32.mrf.mxu0 }
0x1582   : > { %v2035_v59 = vpop.permute.xlu2 %2034 }
0x15ff   : > { %v1745_v0 = vpop.f32.mrf.mxu2 }
0x1600   : > { %v1771_v4 = vadd.f32 %v3223_v42, %v1745_v0 }
0x1602   : > { %v1779_v7 = vadd.f32 %v2562_v62, %v1771_v4  ;;  %v1959_v4 = vpop.permute.xlu0 %1958 }
0x1604   : > { %2590 = vtanh.f32 %v1779_v7  ;;  %v1979_v7 = vpop.permute.xlu1 %1978 }
0x1607   : > { %v1747_v12 = vpop.f32.mrf.mxu2 }
0x160a   : > { %v2591_v13 = vpop.eup %2590 }
0x160b   : > { %v1781_v14 = vadd.f32 %v2591_v13, %v2980_v37 }
0x160c   : > { %v1975_v19 = vpop.permute.xlu1 %1974 }
0x160d   : > { %v1782_v17 = vpack.c.bf16 %v1781_v14, %v1781_v14  ;;  %v2039_v14 = vpop.permute.xlu0 %2038 }
0x160f   : > { %2458 = vmatmul.msk.bf16.vlgmr.msra.gmra.mxu3 %vm785_vm4, %v1782_v17 }
0x1692   : > { %v1817_v22 = vpop.f32.mrf.mxu3 }
0x1693   : > { %v1818_v42 = vadd.f32 %v2563_v18, %v1817_v22 }
0x1695   : > { %v2459_v26 = vmul.f32 -1.442695, %v1818_v42 }
0x1697   : > { %2592 = vpow2.f32 %v2459_v26 }
0x169a   : > { %v1819_v37 = vpop.f32.mrf.mxu3 }
0x169d   : > { %v2593_v39 = vpop.eup %2592 }
0x169e   : > { %v1824_v27 = vadd.f32 1.0, %v2593_v39 }
0x16a0   : > { %2594 = vrcp.f32 %v1824_v27  ;;  %v1836_v32 = vand.u32 2147483648, %v1824_v27  ;;  %v1834_v33 = vand.u32 2147483647, %v1824_v27  ;;  %vm1830_vm13 = vweird.f32 %v1824_v27 }
0x16a2   : > { %v1837_v36 = vor.u32 1.1754944e-38, %v1836_v32  ;;  %vm1835_vm15 = vcmp.eq.f32.partialorder %v1834_v33, 8.507059e+37 }
0x16a6   : > { %v2595_v28 = vpop.eup %2594 }
0x16a7   : > { %v1826_v29 = vmul.f32 %v2595_v28, %v1824_v27  ;;  %vm1831_vm11 = vweird.f32 %v2595_v28 }
0x16a8   : > { %vm1832_vm2 = vmor %vm1830_vm13, %vm1831_vm11 }
0x16a9   : > { %v1827_v31 = vsub.f32 1.0, %v1826_v29 }
0x16ab   : > { %v1828_v20 = vmul.f32 %v2595_v28, %v1827_v31 }
0x16ad   : > { %v1829_v34 = vadd.f32 %v2595_v28, %v1828_v20 }
0x16af   : > { %v1833_v41 = vsel %vm1832_vm2, %v2595_v28, %v1829_v34 }
0x16b0   : > { %v1838_v8 = vsel %vm1835_vm15, %v1837_v36, %v1833_v41 }
0x16b1   : > { %v1840_v47 = vmul.f32 %v1838_v8, %v1818_v42 }
0x16b3   : > { %v1841_v57 = vpack.c.bf16 %v1840_v47, %v1840_v47 }
0x16b5   : > { %2472 = vmatmul.msk.bf16.vlgmr.msrb.gmra.mxu0 %vm785_vm4, %v1841_v57  ;;  %vm3477_vm4 = vcmp.eq.s32.totalorder %v2723_v1, 8 }
0x1732   : > { %v1871_v38 = vpop.f32.mrf.mxu0 }
0x1733   : > { %1890 = vmatpush.msra.mxu2 %v1871_v38 }
0x1734   : > { %2473 = vmatmul.msk.f32.vlgmr.msra.gmra.mxu2 %vm492_vm9, %v3016_v25  ;;  %vm3476_vm9 = vcmp.eq.s32.totalorder %v2723_v1, 7 }
0x173a   : > { %v1873_v30 = vpop.f32.mrf.mxu0 }
0x17b7   : > { %v1892_v50 = vpop.f32.mrf.mxu2 }
0x17b8   : > { %2596 = vtanh.f32 %v1892_v50 }
0x17be   : > { %v2597_v53 = vpop.eup %2596 }
0x17bf   : > { %v1896_v54 = vmul.f32 0.1, %v2597_v53 }
0x17c1   : > { %v3301_v45 = vadd.f32 %v1896_v54, %v2735_v3 }
0x17c3   : > { %v1912_v56 = vmul.f32 %v1910_v55, %v3301_v45  ;;  %v1903_v61 = vmul.f32 %v1901_v51, %v3301_v45  ;;  %v3309_v25 = vmul.f32 %v2035_v59, %v3301_v45  ;;  %v1928_v60 = vmul.f32 %v1926_v40, %v3301_v45 }
0x17c4   : > { %v1941_v62 = vmul.f32 %v1939_v49, %v3301_v45  ;;  %v1932_v0 = vmul.f32 %v1930_v58, %v3301_v45  ;;  %v1981_v12 = vmul.f32 %v1979_v7, %v3301_v45  ;;  %v1961_v13 = vmul.f32 %v1959_v4, %v3301_v45 }
0x17c5   : > { %1954 = vrot.lane.b32.xlu1 %v1912_v56, %s2628_s18  ;;  %1914 = vrot.lane.b32.xlu0 %v1912_v56, %s2623_s0  ;;  %v3323_v17 = vmul.f32 %v2039_v14, %v3301_v45  ;;  %v1898_v18 = vmul.f32 %v3301_v45, %v3113_v24  ;;  %v1977_v22 = vmul.f32 %v1975_v19, %v3301_v45  ;;  %v2060_v24 = vpop.permute.xlu2 %2059 }
0x17c6   : > { %1905 = vrot.lane.b32.xlu2 %v1903_v61, %s2628_s18  ;;  %v2002_v42 = vmul.f32 %v2000_v52, %v3301_v45  ;;  %v2062_v52 = vmul.f32 %v2060_v24, %v3301_v45 }
0x17cd   : > { %1988 = vrot.lane.b32.xlu1 %v1928_v60, %s2623_s0  ;;  %1943 = vrot.lane.b32.xlu0 %v1941_v62, %s2623_s0 }
0x17ce   : > { %1934 = vrot.lane.b32.xlu2 %v1932_v0, %s2628_s18 }
0x17d5   : > { %2019 = vrot.lane.b32.xlu1 %v1928_v60, %s2628_s18  ;;  %1983 = vrot.lane.b32.xlu0 %v1981_v12, %s2628_s18 }
0x17d6   : > { %1963 = vrot.lane.b32.xlu2 %v1961_v13, %s2623_s0 }
0x17dd   : > { %2043 = vrot.lane.b32.xlu1 %v3323_v17, %s2628_s18  ;;  %2008 = vrot.lane.b32.xlu0 %v1903_v61, %s2623_s0 }
0x17de   : > { %2004 = vrot.lane.b32.xlu2 %v1898_v18, %s2628_s18 }
0x17e5   : > { %2023 = vrot.lane.b32.xlu0 %v1932_v0, %s2623_s0  ;;  %2064 = vrot.lane.b32.xlu1 %v1977_v22, %s2628_s18 }
0x17e6   : > { %2068 = vrot.lane.b32.xlu2 %v1981_v12, %s2623_s0 }
0x17ed   : > { %2048 = vrot.lane.b32.xlu0 %v2002_v42, %s2623_s0  ;;  %2083 = vrot.lane.b32.xlu1 %v1898_v18, %s2623_s0 }
0x17f5   : > { %2079 = vrot.lane.b32.xlu0 %v2002_v42, %s2628_s18 }
0x1820   : > { %v1906_v23 = vpop.permute.xlu2 %1905 }
0x1821   : > { %v1908_v37 = vadd.f32 %v1906_v23, %v1898_v18 }
0x1828   : > { %v1935_v26 = vpop.permute.xlu2 %1934 }
0x1829   : > { %v1937_v20 = vadd.f32 %v1935_v26, %v1928_v60 }
0x1830   : > { %v1964_v31 = vpop.permute.xlu2 %1963 }
0x1837   : > { %v1915_v39 = vpop.permute.xlu0 %1914  ;;  %v1955_v27 = vpop.permute.xlu1 %1954 }
0x1838   : > { %v1917_v28 = vadd.f32 %v1915_v39, %v1908_v37  ;;  %v1957_v29 = vadd.f32 %v1955_v27, %v1903_v61  ;;  %v2005_v38 = vpop.permute.xlu2 %2004 }
0x1839   : > { %v2007_v30 = vadd.f32 %v2005_v38, %v2002_v42 }
0x183a   : > { %v1966_v32 = vadd.f32 %v1964_v31, %v1957_v29  ;;  %1920 = vperm.xlu1 %2543, %v1917_v28  }
0x183c   : > { %1969 = vperm.xlu0 %2544, %v1966_v32  }
0x183f   : > { %v1944_v33 = vpop.permute.xlu0 %1943  ;;  %v1989_v34 = vpop.permute.xlu1 %1988 }
0x1840   : > { %v1946_v36 = vadd.f32 %v1944_v33, %v1937_v20  ;;  %v2069_v61 = vpop.permute.xlu2 %2068 }
0x1842   : > { %1949 = vperm.xlu2 %2542, %v1946_v36   ;;  %2545 = vset.pattern.permute.xlu1 %v2637_v63 }
0x1844   : > { %2547 = vset.pattern.permute.xlu0 %v2637_v63 }
0x1847   : > { %v1984_v41 = vpop.permute.xlu0 %1983  ;;  %v2020_v8 = vpop.permute.xlu1 %2019 }
0x1848   : > { %v1986_v47 = vadd.f32 %v1984_v41, %v1977_v22  ;;  %v2022_v51 = vadd.f32 %v2020_v8, %v1981_v12 }
0x184a   : > { %v1991_v57 = vadd.f32 %v1989_v34, %v1986_v47  ;;  %2546 = vset.pattern.permute.xlu2 %v2637_v63 }
0x184c   : > { %1994 = vperm.xlu1 %2545, %v1991_v57  }
0x184f   : > { %v2009_v49 = vpop.permute.xlu0 %2008  ;;  %v2044_v40 = vpop.permute.xlu1 %2043 }
0x1850   : > { %v2011_v50 = vadd.f32 %v2009_v49, %v2007_v30  ;;  %v2046_v58 = vadd.f32 %v2044_v40, %v3309_v25 }
0x1852   : > { %2014 = vperm.xlu2 %2546, %v2011_v50  }
0x1854   : > { %2548 = vset.pattern.permute.xlu1 %v2638_v21 }
0x1857   : > { %v2024_v53 = vpop.permute.xlu0 %2023  ;;  %v2065_v54 = vpop.permute.xlu1 %2064 }
0x1858   : > { %v2026_v55 = vadd.f32 %v2024_v53, %v2022_v51  ;;  %v2067_v56 = vadd.f32 %v2065_v54, %v2062_v52 }
0x185a   : > { %v2071_v59 = vadd.f32 %v2069_v61, %v2067_v56  ;;  %2029 = vperm.xlu0 %2547, %v2026_v55   ;;  %2549 = vset.pattern.permute.xlu2 %v2638_v21 }
0x185c   : > { %2074 = vperm.xlu2 %2549, %v2071_v59  }
0x185f   : > { %v2049_v60 = vpop.permute.xlu0 %2048  ;;  %v2084_v4 = vpop.permute.xlu1 %2083 }
0x1860   : > { %v2051_v62 = vadd.f32 %v2049_v60, %v2046_v58 }
0x1862   : > { %2054 = vperm.xlu1 %2548, %v2051_v62   ;;  %2551 = vset.pattern.permute.xlu0 %v2629_v15 }
0x1864   : > { %2550 = vset.pattern.permute.xlu2 %v2629_v15 }
0x1867   : > { %v2080_v45 = vpop.permute.xlu0 %2079 }
0x1868   : > { %v2082_v0 = vadd.f32 %v2080_v45, %v3323_v17 }
0x186a   : > { %v2086_v7 = vadd.f32 %v2084_v4, %v2082_v0 }
0x186c   : > { %2089 = vperm.xlu1 %2548, %v2086_v7  }
0x1874   : > { %2552 = vset.pattern.permute.xlu1 %v2629_v15 }
0x189c   : > { %v1950_v13 = vpop.permute.xlu2 %1949 }
0x189d   : > { %v1952_v18 = vsel %vm566_vm5, %v1950_v13, 0.0 }
0x18ac   : > { %v1921_v12 = vpop.permute.xlu1 %1920  ;;  %v2015_v23 = vpop.permute.xlu2 %2014 }
0x18ad   : > { %v1923_v25 = vsel %vm511_vm0, %v1921_v12, 0.0  ;;  %v2017_v39 = vsel %vm512_vm1, %v2015_v23, 0.0 }
0x18ae   : > { %v1970_v14 = vpop.permute.xlu0 %1969  ;;  %v1953_v19 = vadd.f32 %v1952_v18, %v1923_v25 }
0x18af   : > { %v1972_v42 = vsel %vm587_vm6, %v1970_v14, 0.0 }
0x18b0   : > { %v1973_v24 = vadd.f32 %v1972_v42, %v1953_v19 }
0x18b6   : > { %v2075_v32 = vpop.permute.xlu2 %2074 }
0x18b7   : > { %v2077_v33 = vsel %vm3476_vm9, %v2075_v32, 0.0 }
0x18be   : > { %v1995_v22 = vpop.permute.xlu1 %1994 }
0x18bf   : > { %v1997_v17 = vsel %vm1206_vm10, %v1995_v22, 0.0 }
0x18c0   : > { %v1998_v15 = vadd.f32 %v1997_v17, %v1973_v24 }
0x18c2   : > { %v2018_v28 = vadd.f32 %v2017_v39, %v1998_v15 }
0x18cc   : > { %v2030_v26 = vpop.permute.xlu0 %2029 }
0x18cd   : > { %v2032_v27 = vsel %vm1242_vm3, %v2030_v26, 0.0 }
0x18ce   : > { %v2033_v31 = vadd.f32 %v2032_v27, %v2018_v28 }
0x18d4   : > { %v2055_v37 = vpop.permute.xlu1 %2054 }
0x18d5   : > { %v2057_v29 = vsel %vm1268_vm12, %v2055_v37, 0.0 }
0x18d6   : > { %v2058_v20 = vadd.f32 %v2057_v29, %v2033_v31 }
0x18d8   : > { %v2078_v34 = vadd.f32 %v2077_v33, %v2058_v20 }
0x18de   : > { %v2090_v36 = vpop.permute.xlu1 %2089 }
0x18df   : > { %v2092_v41 = vsel %vm3477_vm4, %v2090_v36, 0.0 }
0x18e0   : > { %v3368_v8 = vadd.f32 %v2092_v41, %v2078_v34 }
0x18e2   : > { %v2115_v47 = vmul.f32 %v3368_v8, %v2772_v10  ;;  %v2101_v57 = vmul.f32 %v3368_v8, %v2764_v6  ;;  %v2095_v38 = vmul.f32 %v3368_v8, %v2762_v5  ;;  %v2138_v30 = vmul.f32 %v3368_v8, %v2770_v9 }
0x18e3   : > { %v2121_v49 = vmul.f32 %v3368_v8, %v2774_v11  ;;  %v2114_v5 = vmul.f32 %v3368_v8, %v2786_v16  ;;  %v2094_v6 = vmul.f32 %v3368_v8, %v2735_v3  ;;  %v2152_v10 = vmul.f32 %v3368_v8, %v3039_v35 }
0x18e4   : > { %2117 = vrot.lane.b32.xlu0 %v2115_v47, %s2628_s18  ;;  %2103 = vrot.lane.b32.xlu1 %v2101_v57, %s2623_s0  ;;  %v2170_v9 = vmul.f32 %v3368_v8, %v3064_v46  ;;  %v2151_v3 = vmul.f32 %v3368_v8, %v3053_v43  ;;  %v2203_v11 = vmul.f32 %v3368_v8, %v3055_v44 }
0x18e5   : > { %2097 = vrot.lane.b32.xlu2 %v2095_v38, %s2628_s18  ;;  %v2202_v14 = vmul.f32 %v3368_v8, %v3074_v2  ;;  %v2221_v19 = vmul.f32 %v3368_v8, %v3076_v48 }
0x18ec   : > { %2134 = vrot.lane.b32.xlu0 %v2101_v57, %s2628_s18  ;;  %2140 = vrot.lane.b32.xlu1 %v2138_v30, %s2623_s0 }
0x18ed   : > { %2123 = vrot.lane.b32.xlu2 %v2121_v49, %s2623_s0 }
0x18f4   : > { %2159 = vrot.lane.b32.xlu0 %v2114_v5, %s2623_s0  ;;  %2172 = vrot.lane.b32.xlu1 %v2094_v6, %s2628_s18 }
0x18f5   : > { %2154 = vrot.lane.b32.xlu2 %v2152_v10, %s2628_s18 }
0x18fc   : > { %2187 = vrot.lane.b32.xlu0 %v2114_v5, %s2628_s18  ;;  %2191 = vrot.lane.b32.xlu1 %v2115_v47, %s2623_s0 }
0x18fd   : > { %2176 = vrot.lane.b32.xlu2 %v2095_v38, %s2623_s0 }
0x1904   : > { %2210 = vrot.lane.b32.xlu0 %v2170_v9, %s2623_s0  ;;  %2223 = vrot.lane.b32.xlu1 %v2151_v3, %s2628_s18 }
0x1905   : > { %2205 = vrot.lane.b32.xlu2 %v2203_v11, %s2628_s18 }
0x190c   : > { %2238 = vrot.lane.b32.xlu0 %v2170_v9, %s2628_s18  ;;  %2242 = vrot.lane.b32.xlu1 %v2094_v6, %s2623_s0 }
0x190d   : > { %2227 = vrot.lane.b32.xlu2 %v2152_v10, %s2623_s0 }
0x193f   : > { %v2098_v16 = vpop.permute.xlu2 %2097 }
0x1940   : > { %v2100_v46 = vadd.f32 %v2098_v16, %v2094_v6 }
0x1947   : > { %v2124_v35 = vpop.permute.xlu2 %2123 }
0x194f   : > { %v2155_v44 = vpop.permute.xlu2 %2154 }
0x1950   : > { %v2157_v59 = vadd.f32 %v2155_v44, %v2151_v3 }
0x1956   : > { %v2118_v40 = vpop.permute.xlu0 %2117  ;;  %v2104_v43 = vpop.permute.xlu1 %2103 }
0x1957   : > { %v2120_v50 = vadd.f32 %v2118_v40, %v2114_v5  ;;  %v2106_v51 = vadd.f32 %v2104_v43, %v2100_v46  ;;  %v2177_v61 = vpop.permute.xlu2 %2176 }
0x1959   : > { %v2126_v52 = vadd.f32 %v2124_v35, %v2120_v50  ;;  %2109 = vperm.xlu2 %2550, %v2106_v51  }
0x195b   : > { %2129 = vperm.xlu0 %2551, %v2126_v52  }
0x195e   : > { %v2135_v53 = vpop.permute.xlu0 %2134  ;;  %v2141_v54 = vpop.permute.xlu1 %2140 }
0x195f   : > { %v2137_v55 = vadd.f32 %v2135_v53, %v2095_v38  ;;  %v2206_v4 = vpop.permute.xlu2 %2205 }
0x1960   : > { %v2208_v18 = vadd.f32 %v2206_v4, %v2202_v14 }
0x1961   : > { %v2143_v56 = vadd.f32 %v2141_v54, %v2137_v55  ;;  %2553 = vset.pattern.permute.xlu2 %v2637_v63 }
0x1963   : > { %2146 = vperm.xlu1 %2552, %v2143_v56   ;;  %2555 = vset.pattern.permute.xlu0 %v2638_v21 }
0x1966   : > { %v2160_v58 = vpop.permute.xlu0 %2159  ;;  %v2173_v60 = vpop.permute.xlu1 %2172 }
0x1967   : > { %v2162_v62 = vadd.f32 %v2160_v58, %v2157_v59  ;;  %v2175_v45 = vadd.f32 %v2173_v60, %v2170_v9  ;;  %v2228_v24 = vpop.permute.xlu2 %2227 }
0x1969   : > { %v2179_v0 = vadd.f32 %v2177_v61, %v2175_v45  ;;  %2165 = vperm.xlu2 %2553, %v2162_v62  }
0x196b   : > { %2554 = vset.pattern.permute.xlu1 %v2637_v63 }
0x196c   : > { %2182 = vperm.xlu1 %2554, %v2179_v0  }
0x196e   : > { %v2188_v7 = vpop.permute.xlu0 %2187  ;;  %v2192_v12 = vpop.permute.xlu1 %2191 }
0x196f   : > { %v2190_v13 = vadd.f32 %v2188_v7, %v2152_v10 }
0x1971   : > { %v2194_v25 = vadd.f32 %v2192_v12, %v2190_v13 }
0x1973   : > { %2197 = vperm.xlu2 %2553, %v2194_v25  }
0x1974   : > { %2556 = vset.pattern.permute.xlu1 %v2638_v21 }
0x1976   : > { %v2211_v22 = vpop.permute.xlu0 %2210  ;;  %v2224_v42 = vpop.permute.xlu1 %2223 }
0x1977   : > { %v2213_v17 = vadd.f32 %v2211_v22, %v2208_v18  ;;  %v2226_v63 = vadd.f32 %v2224_v42, %v2221_v19 }
0x1979   : > { %v2230_v23 = vadd.f32 %v2228_v24, %v2226_v63  ;;  %2216 = vperm.xlu0 %2555, %v2213_v17  }
0x197b   : > { %2233 = vperm.xlu1 %2556, %v2230_v23   ;;  %2557 = vset.pattern.permute.xlu2 %v2638_v21 }
0x197e   : > { %v2239_v15 = vpop.permute.xlu0 %2238  ;;  %v2243_v2 = vpop.permute.xlu1 %2242 }
0x197f   : > { %v2241_v26 = vadd.f32 %v2239_v15, %v2203_v11 }
0x1981   : > { %v2245_v37 = vadd.f32 %v2243_v2, %v2241_v26 }
0x1983   : > { %2248 = vperm.xlu2 %2557, %v2245_v37  }
0x19b3   : > { %v2110_v39 = vpop.permute.xlu2 %2109 }
0x19b4   : > { %v2112_v31 = vsel %vm511_vm0, %v2110_v39, 0.0  ;;  %vm3478_vm0 = vmmov %vm3476_vm9 }
0x19c3   : > { %v2166_v29 = vpop.permute.xlu2 %2165 }
0x19c4   : > { %v2168_v34 = vsel %vm1206_vm10, %v2166_v29, 0.0 }
0x19cd   : > { %v2130_v28 = vpop.permute.xlu0 %2129  ;;  %v2198_v41 = vpop.permute.xlu2 %2197 }
0x19ce   : > { %v2132_v48 = vsel %vm566_vm5, %v2130_v28, 0.0  ;;  %v2200_v57 = vsel %vm1242_vm3, %v2198_v41, 0.0  ;;  %vm2253_vm5 = vcmask 65536  }
0x19cf   : > { %v2133_v20 = vadd.f32 %v2132_v48, %v2112_v31 }
0x19d5   : > { %v2147_v27 = vpop.permute.xlu1 %2146 }
0x19d6   : > { %v2149_v32 = vsel %vm587_vm6, %v2147_v27, 0.0 }
0x19d7   : > { %v2150_v21 = vadd.f32 %v2149_v32, %v2133_v20 }
0x19d9   : > { %v2169_v8 = vadd.f32 %v2168_v34, %v2150_v21 }
0x19dd   : > { %v2249_v5 = vpop.permute.xlu2 %2248 }
0x19de   : > { %v2183_v33 = vpop.permute.xlu1 %2182 }
0x19df   : > { %v2185_v36 = vsel %vm512_vm1, %v2183_v33, 0.0  ;;  %vm3479_vm1 = vmmov %vm3477_vm4 }
0x19e0   : > { %v2186_v47 = vadd.f32 %v2185_v36, %v2169_v8  ;;  %v2251_v11 = vsel %vm3479_vm1, %v2249_v5, 0.0 }
0x19e2   : > { %v2201_v30 = vadd.f32 %v2200_v57, %v2186_v47 }
0x19eb   : > { %v2217_v38 = vpop.permute.xlu0 %2216 }
0x19ec   : > { %v2219_v49 = vsel %vm1268_vm12, %v2217_v38, 0.0 }
0x19ed   : > { %v2220_v6 = vadd.f32 %v2219_v49, %v2201_v30  ;;  %v2234_v10 = vpop.permute.xlu1 %2233 }
0x19ee   : > { %v2236_v9 = vsel %vm3478_vm0, %v2234_v10, 0.0 }
0x19ef   : > { %v2237_v3 = vadd.f32 %v2236_v9, %v2220_v6 }
0x19f1   : > { %v2252_v16 = vadd.f32 %v2251_v11, %v2237_v3 }
0x19f3   : > { %2254 = vst.msk [vmem:[%s432_s30] sm:$0x1] %vm2253_vm5, %v2252_v16 }
0x19f4 PF: > { %s31_s29 = sadd.s32 1, %s2619_s29  }
0x19f5   : > { %p28_p4 = scmp.ge.s32.totalorder %s31_s29, 4  }
0x19f7   :  { %30 = sbr.rel (!%p28_p4) target bundleno = 7 (0x7), region = 110 }

</bundles_post_ra>
